<compile_context>
chip_gen: v5e
topology: v5e:2x2
jax: 0.10.0
libtpu: 0.0.40
codegen_flags: <defaults>
</compile_context>

<pallas_src>
import numpy as np

import jax
import jax.numpy as jnp
from jax.experimental import pallas as pl
from jax.experimental.pallas import tpu as pltpu


# ----------------------------------------------------------------------------
# Architecture constants
# ----------------------------------------------------------------------------
IMG = 16          # input spatial size (H == W)
S1 = IMG // 2     # 8  : encoder conv1 / decoder conv1 spatial size
S2 = IMG // 4     # 4  : encoder conv2 (bottleneck) spatial size
C_IN = 3
C1 = 16
C2 = 32
K1P = 32          # conv1 im2col contracting dim (3*3*3 = 27) zero-padded to 32


# ----------------------------------------------------------------------------
# The fused generator kernel — single invocation, everything stays in VMEM.
# All maps are laid out TRANSPOSED: rows = channels, cols = flattened positions.
# Position column order: [styleS0..styleS{N-1} | contentS0..contentS{N-1}].
# Channel row order (encoder): [style-branch channels | content-branch channels].
# ----------------------------------------------------------------------------
def _generator_kernel(
    pt_ref,                       # (2*K1P, 2N*64) bf16 : conv1 patches (block layout), transposed
    w1t_ref, b1_ref,              # (2*C1, 2*K1P) bf16, (2*C1, 1) f32   block-diag conv1
    selc_ref, w2t_ref, b2_ref,    # (9, 2N*64, 2N*16) bf16, (9, 2*C2, 2*C1) bf16, (2*C2, 1) f32
    poolbc_ref,                   # (2N*16, N*16) f32 : per-sample mean-pool ∘ broadcast constant
    mwt_ref, mbt_ref,             # (2*C2, C2) f32, (2*C2, 1) f32       style MLP (transposed)
    a1t_ref, dw1t_ref, db1_ref,   # (9, N*16, N*64) bf16, (9, C1, C2) bf16, (C1, 1) f32
    a2t_ref, dw2t_ref, db2_ref,   # (9, N*64, N*256) bf16, (9, C_IN, C1) bf16, (C_IN, 1) f32
    out_ref,                      # (N, C_IN, IMG*IMG) f32  (flat NCHW)
):
    f32, bf16 = jnp.float32, jnp.bfloat16
    N = out_ref.shape[0]
    n_bneck = N * S2 * S2         # content bottleneck positions per batch (N*16)

    # ---- fused Style+Content encoder conv1 (3x3 stride-2) + ReLU ------------
    h1t = jnp.dot(w1t_ref[...], pt_ref[...], preferred_element_type=f32)
    h1t = jnp.maximum(h1t + b1_ref[...], 0.0)                    # (2*C1, 2N*64)
    h1t_bf = h1t.astype(bf16)

    # ---- fused encoder conv2 (3x3 stride-2) via 9 constant tap selectors ----
    acc_e = jnp.zeros((2 * C2, 2 * n_bneck), f32)
    for t in range(9):
        xt = jnp.dot(h1t_bf, selc_ref[t], preferred_element_type=f32)      # (2*C1, 2N*16)
        acc_e = acc_e + jnp.dot(w2t_ref[t], xt.astype(bf16),
                                preferred_element_type=f32)                # (2*C2, 2N*16)
    feat_t = jnp.maximum(acc_e + b2_ref[...], 0.0)               # (64, 2N*16)

    # ---- style path: per-sample global-avg-pool (composed with the per-sample
    #      broadcast to the content positions), then the style MLP.  All f32. ----
    style_b = jnp.dot(feat_t[:C2, :], poolbc_ref[...],
                      preferred_element_type=f32)                # (C2, N*16)
    srows = jnp.dot(mwt_ref[...], style_b,
                    preferred_element_type=f32) + mbt_ref[...]   # (2*C2, N*16)

    # ---- AdaIN-style modulation of the content features + ReLU --------------
    c_feat_t = feat_t[C2:, n_bneck:]                             # (C2, N*16)
    mod_t = jnp.maximum(c_feat_t * (1.0 + srows[:C2, :]) + srows[C2:, :], 0.0)
    mod_bf = mod_t.astype(bf16)

    # ---- decoder conv1: (2x nearest upsample ∘ pad ∘ 3x3 tap) folded into the
    #      constant a1t per tap; 9 taps, f32 accumulation, ReLU ----------------
    acc1 = jnp.zeros((C1, N * S1 * S1), f32)
    for t in range(9):
        tmp = jnp.dot(dw1t_ref[t], mod_bf, preferred_element_type=f32)     # (C1, N*16)
        acc1 = acc1 + jnp.dot(tmp.astype(bf16), a1t_ref[t],
                              preferred_element_type=f32)                  # (C1, N*64)
    d1_t = jnp.maximum(acc1 + db1_ref[...], 0.0)                 # (16, N*64)
    d1_bf = d1_t.astype(bf16)

    # ---- decoder conv2 (upsample ∘ pad ∘ tap folded) + tanh, lane-dense -----
    acc2 = jnp.zeros((C_IN, N * IMG * IMG), f32)
    for t in range(9):
        tmp = jnp.dot(dw2t_ref[t], d1_bf, preferred_element_type=f32)      # (3, N*64)
        acc2 = acc2 + jnp.dot(tmp.astype(bf16), a2t_ref[t],
                              preferred_element_type=f32)                  # (3, N*256)
    res = jnp.tanh(acc2 + db2_ref[...])                          # (3, N*256) f32

    for n in range(N):                                           # 256-lane dense stores
        out_ref[n] = res[:, n * IMG * IMG:(n + 1) * IMG * IMG]


# ----------------------------------------------------------------------------
# Wrapper-side helpers: im2col, constant operator matrices, weight packing
# ----------------------------------------------------------------------------
def _im2col(x, ksize, stride, pad):
    """x:[N,H,W,C] -> patches [N*Ho*Wo, k*k*C] with (kh,kw) outer, C inner."""
    N, H, W, C = x.shape
    Ho = (H + 2 * pad - ksize) // stride + 1
    Wo = (W + 2 * pad - ksize) // stride + 1
    xp = jnp.pad(x, ((0, 0), (pad, pad), (pad, pad), (0, 0)))
    cols = []
    for kh in range(ksize):
        for kw in range(ksize):
            cols.append(xp[:, kh:kh + stride * Ho:stride,
                           kw:kw + stride * Wo:stride, :])
    cols = jnp.concatenate(cols, axis=-1)
    return cols.reshape(N * Ho * Wo, ksize * ksize * C), (N, Ho, Wo)


def _tap_selectors(h_in, stride):
    """(9, ho^2, h_in^2) 0/1 matrices: S[t] @ flat(x) == tap t of a 3x3 pad-1 conv."""
    h_out = (h_in + 2 - 3) // stride + 1
    sel = np.zeros((9, h_out * h_out, h_in * h_in), np.float32)
    for kh in range(3):
        for kw in range(3):
            t = kh * 3 + kw
            for ho in range(h_out):
                for wo in range(h_out):
                    hi, wi = stride * ho + kh - 1, stride * wo + kw - 1
                    if 0 <= hi < h_in and 0 <= wi < h_in:
                        sel[t, ho * h_out + wo, hi * h_in + wi] = 1.0
    return sel


def _upsample2_matrix(h_in):
    """((2h)^2, h^2) 0/1 matrix implementing nearest 2x upsampling on flat maps."""
    h_out = 2 * h_in
    up = np.zeros((h_out * h_out, h_in * h_in), np.float32)
    for ho in range(h_out):
        for wo in range(h_out):
            up[ho * h_out + wo, (ho // 2) * h_in + (wo // 2)] = 1.0
    return up


def _build_constants(N):
    """Pre-composed, transposed 0/1 operator constants (exact in bf16)."""
    sel2_8 = _tap_selectors(S1, 2)            # (9, 16, 64)   encoder conv2 taps
    sel1_8 = _tap_selectors(S1, 1)            # (9, 64, 64)   decoder conv1 taps
    sel1_16 = _tap_selectors(IMG, 1)          # (9, 256, 256) decoder conv2 taps
    up4 = _upsample2_matrix(S2)               # (64, 16)
    up8 = _upsample2_matrix(S1)               # (256, 64)

    eye_n = np.eye(N, dtype=np.float32)
    eye_2n = np.eye(2 * N, dtype=np.float32)

    # encoder conv2 tap selectors, transposed, block-diag over the 2N maps
    selc = np.stack([np.kron(eye_2n, sel2_8[t].T) for t in range(9)])       # (9, 2N*64, 2N*16)
    # decoder conv1: (tap-shift ∘ pad ∘ upsample 4->8) pre-composed, transposed
    a1t = np.stack([np.kron(eye_n, (sel1_8[t] @ up4).T) for t in range(9)]) # (9, N*16, N*64)
    # decoder conv2: (tap-shift ∘ pad ∘ upsample 8->16) pre-composed, transposed
    a2t = np.stack([np.kron(eye_n, (sel1_16[t] @ up8).T) for t in range(9)])  # (9, N*64, N*256)

    # per-sample mean pool over the style bottleneck positions, pre-composed with
    # the per-sample broadcast onto that sample's content positions.
    pool = np.zeros((2 * N * S2 * S2, N), np.float32)
    for n in range(N):
        pool[n * S2 * S2:(n + 1) * S2 * S2, n] = 1.0 / (S2 * S2)
    bcast = np.kron(eye_n, np.ones((1, S2 * S2), np.float32))               # (N, N*16)
    poolbc = pool @ bcast                                                   # (2N*16, N*16)

    return selc, a1t, a2t, poolbc


def init_params(key):
    ks = jax.random.split(key, 7)
    def w(k, shape, scale=0.1):
        return scale * jax.random.normal(k, shape, dtype=jnp.float32)
    return {
        "se_w1": w(ks[0], (3, 3, 3, 16)),  "se_b1": jnp.zeros((16,), jnp.float32),
        "se_w2": w(ks[1], (3, 3, 16, 32)), "se_b2": jnp.zeros((32,), jnp.float32),
        "ce_w1": w(ks[2], (3, 3, 3, 16)),  "ce_b1": jnp.zeros((16,), jnp.float32),
        "ce_w2": w(ks[3], (3, 3, 16, 32)), "ce_b2": jnp.zeros((32,), jnp.float32),
        "mlp_w": w(ks[4], (32, 64)),       "mlp_b": jnp.zeros((64,), jnp.float32),
        "de_w1": w(ks[5], (3, 3, 32, 16)), "de_b1": jnp.zeros((16,), jnp.float32),
        "de_w2": w(ks[6], (3, 3, 16, 3)),  "de_b2": jnp.zeros((3,), jnp.float32),
    }


def _prep_weights(params):
    bf16, f32 = jnp.bfloat16, jnp.float32

    def conv1_wT(w):       # (3,3,3,16) -> (16, K1P): rows=out ch, cols=(kh,kw,ci) zero-padded
        w2 = w.reshape(9 * w.shape[2], w.shape[3])
        w2 = jnp.pad(w2, ((0, K1P - w2.shape[0]), (0, 0)))
        return w2.T

    def tapsT(w):          # (3,3,Cin,Cout) -> (9, Cout, Cin), tap index = kh*3+kw
        return jnp.transpose(w.reshape(9, w.shape[2], w.shape[3]), (0, 2, 1))

    def blockdiag2(a, b):
        za = jnp.zeros((a.shape[0], b.shape[1]), a.dtype)
        zb = jnp.zeros((b.shape[0], a.shape[1]), b.dtype)
        return jnp.concatenate(
            [jnp.concatenate([a, za], axis=1),
             jnp.concatenate([zb, b], axis=1)], axis=0)

    w1t = blockdiag2(conv1_wT(params["se_w1"]),
                     conv1_wT(params["ce_w1"])).astype(bf16)                 # (32, 64)
    b1 = jnp.concatenate([params["se_b1"], params["ce_b1"]]).reshape(-1, 1).astype(f32)

    se2, ce2 = tapsT(params["se_w2"]), tapsT(params["ce_w2"])                # (9, 32, 16) each
    w2t = jnp.stack([blockdiag2(se2[t], ce2[t]) for t in range(9)]).astype(bf16)  # (9, 64, 32)
    b2 = jnp.concatenate([params["se_b2"], params["ce_b2"]]).reshape(-1, 1).astype(f32)

    mwt = params["mlp_w"].T.astype(f32)                                      # (64, 32)
    mbt = params["mlp_b"].reshape(-1, 1).astype(f32)                         # (64, 1)

    dw1t = tapsT(params["de_w1"]).astype(bf16)                               # (9, 16, 32)
    db1 = params["de_b1"].reshape(-1, 1).astype(f32)
    dw2t = tapsT(params["de_w2"]).astype(bf16)                               # (9, 3, 16)
    db2 = params["de_b2"].reshape(-1, 1).astype(f32)

    return w1t, b1, w2t, b2, mwt, mbt, dw1t, db1, dw2t, db2


def generator_forward(params, style_images, content_image):
    N, _, H, W = style_images.shape
    assert (H, W) == (IMG, IMG) and content_image.shape == style_images.shape
    bf16, f32 = jnp.bfloat16, jnp.float32

    # NCHW -> NHWC + first-layer im2col on the HBM-resident inputs (one-time,
    # tiny), contracting dim zero-padded 27 -> 32, then laid out block-wise /
    # transposed so the whole kernel can run in (channels, positions) orientation.
    s = jnp.transpose(style_images, (0, 2, 3, 1)).astype(f32)
    c = jnp.transpose(content_image, (0, 2, 3, 1)).astype(f32)
    ps, _ = _im2col(s, 3, 2, 1)                                   # (N*64, 27)
    pc, _ = _im2col(c, 3, 2, 1)
    ps = jnp.pad(ps, ((0, 0), (0, K1P - ps.shape[1])))            # (N*64, 32)
    pc = jnp.pad(pc, ((0, 0), (0, K1P - pc.shape[1])))
    p_style = jnp.pad(ps, ((0, 0), (0, K1P)))                     # style rows use K cols 0:32
    p_content = jnp.pad(pc, ((0, 0), (K1P, 0)))                   # content rows use K cols 32:64
    pt = jnp.concatenate([p_style, p_content], axis=0).T.astype(bf16)   # (64, 2N*64)

    w1t, b1, w2t, b2, mwt, mbt, dw1t, db1, dw2t, db2 = _prep_weights(params)

    selc_np, a1_np, a2_np, poolbc_np = _build_constants(N)
    selc = jnp.asarray(selc_np, bf16)
    a1t = jnp.asarray(a1_np, bf16)
    a2t = jnp.asarray(a2_np, bf16)
    poolbc = jnp.asarray(poolbc_np, f32)

    args = (pt, w1t, b1, selc, w2t, b2, poolbc, mwt, mbt,
            a1t, dw1t, db1, a2t, dw2t, db2)

    def fullspec(shape):
        nd = len(shape)
        return pl.BlockSpec(shape, lambda i, _nd=nd: (0,) * _nd)

    out = pl.pallas_call(
        _generator_kernel,
        out_shape=jax.ShapeDtypeStruct((N, C_IN, IMG * IMG), f32),
        grid=(1,),                                    # single step: batch folded into matmul rows
        in_specs=[fullspec(a.shape) for a in args],
        out_specs=fullspec((N, C_IN, IMG * IMG)),
        compiler_params=pltpu.CompilerParams(dimension_semantics=("arbitrary",)),
    )(*args)

    # (N, 3, 256) is already flat NCHW — reshape only, no transpose.
    return out.reshape(N, C_IN, IMG, IMG)


# ----------------------------------------------------------------------------
# Pure-JAX f32 reference (same math, no Pallas) for a tolerance check
# ----------------------------------------------------------------------------
def _conv3x3_ref(x, w, b, stride, act):
    patches, (N, Ho, Wo) = _im2col(x, 3, stride, 1)
    out = patches @ w.reshape(-1, w.shape[-1]) + b
    if act == "relu":
        out = jnp.maximum(out, 0.0)
    elif act == "tanh":
        out = jnp.tanh(out)
    return out.reshape(N, Ho, Wo, w.shape[-1])


def generator_reference(params, style_images, content_image):
    s = jnp.transpose(style_images, (0, 2, 3, 1)).astype(jnp.float32)
    c = jnp.transpose(content_image, (0, 2, 3, 1)).astype(jnp.float32)
    h = _conv3x3_ref(s, params["se_w1"], params["se_b1"], 2, "relu")
    h = _conv3x3_ref(h, params["se_w2"], params["se_b2"], 2, "relu")
    Nn, Hh, Ww, Cc = h.shape
    style = jnp.mean(h.reshape(Nn, Hh * Ww, Cc), axis=1)
    g = _conv3x3_ref(c, params["ce_w1"], params["ce_b1"], 2, "relu")
    g = _conv3x3_ref(g, params["ce_w2"], params["ce_b2"], 2, "relu")
    ss = style @ params["mlp_w"] + params["mlp_b"]
    scale, shift = ss[:, :C2], ss[:, C2:]
    Ng, Hg, Wg, Cg = g.shape
    mod = jnp.maximum(
        g.reshape(Ng, Hg * Wg, Cg) * (1.0 + scale[:, None, :]) + shift[:, None, :],
        0.0).reshape(Ng, Hg, Wg, Cg)
    up = jnp.repeat(jnp.repeat(mod, 2, axis=1), 2, axis=2)
    d = _conv3x3_ref(up, params["de_w1"], params["de_b1"], 1, "relu")
    up2 = jnp.repeat(jnp.repeat(d, 2, axis=1), 2, axis=2)
    o = _conv3x3_ref(up2, params["de_w2"], params["de_b2"], 1, "tanh")
    return jnp.transpose(o, (0, 3, 1, 2))


if __name__ == "__main__":
    key = jax.random.PRNGKey(0)
    k_params, k_style, k_content = jax.random.split(key, 3)

    params = init_params(k_params)
    style_images = jax.random.normal(k_style, (2, 3, 16, 16), dtype=jnp.float32)
    content_image = jax.random.normal(k_content, (2, 3, 16, 16), dtype=jnp.float32)

    image = jax.block_until_ready(
        jax.jit(generator_forward)(params, style_images, content_image))
    ref = jax.block_until_ready(
        jax.jit(generator_reference)(params, style_images, content_image))

    assert image.shape == (2, 3, 16, 16), image.shape
    assert bool(jnp.all(jnp.isfinite(image)))
    max_err = float(jnp.max(jnp.abs(image - ref)))
    assert max_err < 5e-2, f"kernel vs f32 reference max abs err {max_err}"
    print("KERNEL_OK")
</pallas_src>

<mosaic_0001>
module attributes {stable_mosaic.version = 11 : i64} {
  func.func @_generator_kernel(%arg0: i32, %arg1: memref<64x256xbf16, #tpu.memory_space<vmem>>, %arg2: memref<32x64xbf16, #tpu.memory_space<vmem>>, %arg3: memref<32x1xf32, #tpu.memory_space<vmem>>, %arg4: memref<9x256x64xbf16, #tpu.memory_space<vmem>>, %arg5: memref<9x64x32xbf16, #tpu.memory_space<vmem>>, %arg6: memref<64x1xf32, #tpu.memory_space<vmem>>, %arg7: memref<64x32xf32, #tpu.memory_space<vmem>>, %arg8: memref<64x32xf32, #tpu.memory_space<vmem>>, %arg9: memref<64x1xf32, #tpu.memory_space<vmem>>, %arg10: memref<9x32x128xbf16, #tpu.memory_space<vmem>>, %arg11: memref<9x16x32xbf16, #tpu.memory_space<vmem>>, %arg12: memref<16x1xf32, #tpu.memory_space<vmem>>, %arg13: memref<9x128x512xbf16, #tpu.memory_space<vmem>>, %arg14: memref<9x3x16xbf16, #tpu.memory_space<vmem>>, %arg15: memref<3x1xf32, #tpu.memory_space<vmem>>, %arg16: memref<2x3x256xf32, #tpu.memory_space<vmem>>) attributes {dimension_semantics = [#tpu.dimension_semantics<arbitrary>], iteration_bounds = array<i64: 1>, scalar_prefetch = 0 : i64, scratch_operands = 0 : i64, tpu.core_type = #tpu.core_type<tc>, window_params = [{pipeline_mode = #tpu.pipeline_mode<synchronous>, transform_indices = @transform_0, window_bounds = array<i64: 64, 256>}, {pipeline_mode = #tpu.pipeline_mode<synchronous>, transform_indices = @transform_1, window_bounds = array<i64: 32, 64>}, {pipeline_mode = #tpu.pipeline_mode<synchronous>, transform_indices = @transform_2, window_bounds = array<i64: 32, 1>}, {pipeline_mode = #tpu.pipeline_mode<synchronous>, transform_indices = @transform_3, window_bounds = array<i64: 9, 256, 64>}, {pipeline_mode = #tpu.pipeline_mode<synchronous>, transform_indices = @transform_4, window_bounds = array<i64: 9, 64, 32>}, {pipeline_mode = #tpu.pipeline_mode<synchronous>, transform_indices = @transform_5, window_bounds = array<i64: 64, 1>}, {pipeline_mode = #tpu.pipeline_mode<synchronous>, transform_indices = @transform_6, window_bounds = array<i64: 64, 32>}, {pipeline_mode = #tpu.pipeline_mode<synchronous>, transform_indices = @transform_7, window_bounds = array<i64: 64, 32>}, {pipeline_mode = #tpu.pipeline_mode<synchronous>, transform_indices = @transform_8, window_bounds = array<i64: 64, 1>}, {pipeline_mode = #tpu.pipeline_mode<synchronous>, transform_indices = @transform_9, window_bounds = array<i64: 9, 32, 128>}, {pipeline_mode = #tpu.pipeline_mode<synchronous>, transform_indices = @transform_10, window_bounds = array<i64: 9, 16, 32>}, {pipeline_mode = #tpu.pipeline_mode<synchronous>, transform_indices = @transform_11, window_bounds = array<i64: 16, 1>}, {pipeline_mode = #tpu.pipeline_mode<synchronous>, transform_indices = @transform_12, window_bounds = array<i64: 9, 128, 512>}, {pipeline_mode = #tpu.pipeline_mode<synchronous>, transform_indices = @transform_13, window_bounds = array<i64: 9, 3, 16>}, {pipeline_mode = #tpu.pipeline_mode<synchronous>, transform_indices = @transform_14, window_bounds = array<i64: 3, 1>}, {pipeline_mode = #tpu.pipeline_mode<synchronous>, transform_indices = @transform_15, window_bounds = array<i64: 2, 3, 256>}]} {
    %c0 = arith.constant 0 : index
    %c0_0 = arith.constant 0 : index
    %0 = vector.load %arg2[%c0, %c0_0] : memref<32x64xbf16, #tpu.memory_space<vmem>>, vector<32x64xbf16>
    %c0_1 = arith.constant 0 : index
    %c0_2 = arith.constant 0 : index
    %1 = vector.load %arg1[%c0_1, %c0_2] : memref<64x256xbf16, #tpu.memory_space<vmem>>, vector<64x256xbf16>
    %cst = arith.constant dense<0.000000e+00> : vector<32x256xf32>
    %2 = tpu.matmul %0, %1, %cst {dimension_numbers = #tpu.dot_dimension_numbers<[1], [0], [0], [1], [0, 0, 1, 1], [], []>} : vector<32x64xbf16>, vector<64x256xbf16>, vector<32x256xf32> -> vector<32x256xf32>
    %c0_3 = arith.constant 0 : index
    %c0_4 = arith.constant 0 : index
    %3 = vector.load %arg3[%c0_3, %c0_4] : memref<32x1xf32, #tpu.memory_space<vmem>>, vector<32x1xf32>
    %4 = vector.broadcast %3 : vector<32x1xf32> to vector<32x256xf32>
    %5 = arith.addf %2, %4 : vector<32x256xf32>
    %cst_5 = arith.constant 0.000000e+00 : f32
    %6 = vector.broadcast %cst_5 : f32 to vector<32x256xf32>
    %7 = arith.maximumf %5, %6 : vector<32x256xf32>
    %8 = arith.truncf %7 : vector<32x256xf32> to vector<32x256xbf16>
    %cst_6 = arith.constant 0.000000e+00 : f32
    %9 = vector.broadcast %cst_6 : f32 to vector<64x64xf32>
    %c0_7 = arith.constant 0 : index
    %c0_8 = arith.constant 0 : index
    %c0_9 = arith.constant 0 : index
    %10 = vector.load %arg4[%c0_7, %c0_8, %c0_9] : memref<9x256x64xbf16, #tpu.memory_space<vmem>>, vector<1x256x64xbf16>
    %11 = vector.shape_cast %10 : vector<1x256x64xbf16> to vector<256x64xbf16>
    %cst_10 = arith.constant dense<0.000000e+00> : vector<32x64xf32>
    %12 = tpu.matmul %8, %11, %cst_10 {dimension_numbers = #tpu.dot_dimension_numbers<[1], [0], [0], [1], [0, 0, 1, 1], [], []>} : vector<32x256xbf16>, vector<256x64xbf16>, vector<32x64xf32> -> vector<32x64xf32>
    %c0_11 = arith.constant 0 : index
    %c0_12 = arith.constant 0 : index
    %c0_13 = arith.constant 0 : index
    %13 = vector.load %arg5[%c0_11, %c0_12, %c0_13] : memref<9x64x32xbf16, #tpu.memory_space<vmem>>, vector<1x64x32xbf16>
    %14 = vector.shape_cast %13 : vector<1x64x32xbf16> to vector<64x32xbf16>
    %15 = arith.truncf %12 : vector<32x64xf32> to vector<32x64xbf16>
    %cst_14 = arith.constant dense<0.000000e+00> : vector<64x64xf32>
    %16 = tpu.matmul %14, %15, %cst_14 {dimension_numbers = #tpu.dot_dimension_numbers<[1], [0], [0], [1], [0, 0, 1, 1], [], []>} : vector<64x32xbf16>, vector<32x64xbf16>, vector<64x64xf32> -> vector<64x64xf32>
    %17 = arith.addf %9, %16 : vector<64x64xf32>
    %c1 = arith.constant 1 : index
    %c0_15 = arith.constant 0 : index
    %c0_16 = arith.constant 0 : index
    %18 = vector.load %arg4[%c1, %c0_15, %c0_16] : memref<9x256x64xbf16, #tpu.memory_space<vmem>>, vector<1x256x64xbf16>
    %19 = vector.shape_cast %18 : vector<1x256x64xbf16> to vector<256x64xbf16>
    %cst_17 = arith.constant dense<0.000000e+00> : vector<32x64xf32>
    %20 = tpu.matmul %8, %19, %cst_17 {dimension_numbers = #tpu.dot_dimension_numbers<[1], [0], [0], [1], [0, 0, 1, 1], [], []>} : vector<32x256xbf16>, vector<256x64xbf16>, vector<32x64xf32> -> vector<32x64xf32>
    %c1_18 = arith.constant 1 : index
    %c0_19 = arith.constant 0 : index
    %c0_20 = arith.constant 0 : index
    %21 = vector.load %arg5[%c1_18, %c0_19, %c0_20] : memref<9x64x32xbf16, #tpu.memory_space<vmem>>, vector<1x64x32xbf16>
    %22 = vector.shape_cast %21 : vector<1x64x32xbf16> to vector<64x32xbf16>
    %23 = arith.truncf %20 : vector<32x64xf32> to vector<32x64xbf16>
    %cst_21 = arith.constant dense<0.000000e+00> : vector<64x64xf32>
    %24 = tpu.matmul %22, %23, %cst_21 {dimension_numbers = #tpu.dot_dimension_numbers<[1], [0], [0], [1], [0, 0, 1, 1], [], []>} : vector<64x32xbf16>, vector<32x64xbf16>, vector<64x64xf32> -> vector<64x64xf32>
    %25 = arith.addf %17, %24 : vector<64x64xf32>
    %c2 = arith.constant 2 : index
    %c0_22 = arith.constant 0 : index
    %c0_23 = arith.constant 0 : index
    %26 = vector.load %arg4[%c2, %c0_22, %c0_23] : memref<9x256x64xbf16, #tpu.memory_space<vmem>>, vector<1x256x64xbf16>
    %27 = vector.shape_cast %26 : vector<1x256x64xbf16> to vector<256x64xbf16>
    %cst_24 = arith.constant dense<0.000000e+00> : vector<32x64xf32>
    %28 = tpu.matmul %8, %27, %cst_24 {dimension_numbers = #tpu.dot_dimension_numbers<[1], [0], [0], [1], [0, 0, 1, 1], [], []>} : vector<32x256xbf16>, vector<256x64xbf16>, vector<32x64xf32> -> vector<32x64xf32>
    %c2_25 = arith.constant 2 : index
    %c0_26 = arith.constant 0 : index
    %c0_27 = arith.constant 0 : index
    %29 = vector.load %arg5[%c2_25, %c0_26, %c0_27] : memref<9x64x32xbf16, #tpu.memory_space<vmem>>, vector<1x64x32xbf16>
    %30 = vector.shape_cast %29 : vector<1x64x32xbf16> to vector<64x32xbf16>
    %31 = arith.truncf %28 : vector<32x64xf32> to vector<32x64xbf16>
    %cst_28 = arith.constant dense<0.000000e+00> : vector<64x64xf32>
    %32 = tpu.matmul %30, %31, %cst_28 {dimension_numbers = #tpu.dot_dimension_numbers<[1], [0], [0], [1], [0, 0, 1, 1], [], []>} : vector<64x32xbf16>, vector<32x64xbf16>, vector<64x64xf32> -> vector<64x64xf32>
    %33 = arith.addf %25, %32 : vector<64x64xf32>
    %c3 = arith.constant 3 : index
    %c0_29 = arith.constant 0 : index
    %c0_30 = arith.constant 0 : index
    %34 = vector.load %arg4[%c3, %c0_29, %c0_30] : memref<9x256x64xbf16, #tpu.memory_space<vmem>>, vector<1x256x64xbf16>
    %35 = vector.shape_cast %34 : vector<1x256x64xbf16> to vector<256x64xbf16>
    %cst_31 = arith.constant dense<0.000000e+00> : vector<32x64xf32>
    %36 = tpu.matmul %8, %35, %cst_31 {dimension_numbers = #tpu.dot_dimension_numbers<[1], [0], [0], [1], [0, 0, 1, 1], [], []>} : vector<32x256xbf16>, vector<256x64xbf16>, vector<32x64xf32> -> vector<32x64xf32>
    %c3_32 = arith.constant 3 : index
    %c0_33 = arith.constant 0 : index
    %c0_34 = arith.constant 0 : index
    %37 = vector.load %arg5[%c3_32, %c0_33, %c0_34] : memref<9x64x32xbf16, #tpu.memory_space<vmem>>, vector<1x64x32xbf16>
    %38 = vector.shape_cast %37 : vector<1x64x32xbf16> to vector<64x32xbf16>
    %39 = arith.truncf %36 : vector<32x64xf32> to vector<32x64xbf16>
    %cst_35 = arith.constant dense<0.000000e+00> : vector<64x64xf32>
    %40 = tpu.matmul %38, %39, %cst_35 {dimension_numbers = #tpu.dot_dimension_numbers<[1], [0], [0], [1], [0, 0, 1, 1], [], []>} : vector<64x32xbf16>, vector<32x64xbf16>, vector<64x64xf32> -> vector<64x64xf32>
    %41 = arith.addf %33, %40 : vector<64x64xf32>
    %c4 = arith.constant 4 : index
    %c0_36 = arith.constant 0 : index
    %c0_37 = arith.constant 0 : index
    %42 = vector.load %arg4[%c4, %c0_36, %c0_37] : memref<9x256x64xbf16, #tpu.memory_space<vmem>>, vector<1x256x64xbf16>
    %43 = vector.shape_cast %42 : vector<1x256x64xbf16> to vector<256x64xbf16>
    %cst_38 = arith.constant dense<0.000000e+00> : vector<32x64xf32>
    %44 = tpu.matmul %8, %43, %cst_38 {dimension_numbers = #tpu.dot_dimension_numbers<[1], [0], [0], [1], [0, 0, 1, 1], [], []>} : vector<32x256xbf16>, vector<256x64xbf16>, vector<32x64xf32> -> vector<32x64xf32>
    %c4_39 = arith.constant 4 : index
    %c0_40 = arith.constant 0 : index
    %c0_41 = arith.constant 0 : index
    %45 = vector.load %arg5[%c4_39, %c0_40, %c0_41] : memref<9x64x32xbf16, #tpu.memory_space<vmem>>, vector<1x64x32xbf16>
    %46 = vector.shape_cast %45 : vector<1x64x32xbf16> to vector<64x32xbf16>
    %47 = arith.truncf %44 : vector<32x64xf32> to vector<32x64xbf16>
    %cst_42 = arith.constant dense<0.000000e+00> : vector<64x64xf32>
    %48 = tpu.matmul %46, %47, %cst_42 {dimension_numbers = #tpu.dot_dimension_numbers<[1], [0], [0], [1], [0, 0, 1, 1], [], []>} : vector<64x32xbf16>, vector<32x64xbf16>, vector<64x64xf32> -> vector<64x64xf32>
    %49 = arith.addf %41, %48 : vector<64x64xf32>
    %c5 = arith.constant 5 : index
    %c0_43 = arith.constant 0 : index
    %c0_44 = arith.constant 0 : index
    %50 = vector.load %arg4[%c5, %c0_43, %c0_44] : memref<9x256x64xbf16, #tpu.memory_space<vmem>>, vector<1x256x64xbf16>
    %51 = vector.shape_cast %50 : vector<1x256x64xbf16> to vector<256x64xbf16>
    %cst_45 = arith.constant dense<0.000000e+00> : vector<32x64xf32>
    %52 = tpu.matmul %8, %51, %cst_45 {dimension_numbers = #tpu.dot_dimension_numbers<[1], [0], [0], [1], [0, 0, 1, 1], [], []>} : vector<32x256xbf16>, vector<256x64xbf16>, vector<32x64xf32> -> vector<32x64xf32>
    %c5_46 = arith.constant 5 : index
    %c0_47 = arith.constant 0 : index
    %c0_48 = arith.constant 0 : index
    %53 = vector.load %arg5[%c5_46, %c0_47, %c0_48] : memref<9x64x32xbf16, #tpu.memory_space<vmem>>, vector<1x64x32xbf16>
    %54 = vector.shape_cast %53 : vector<1x64x32xbf16> to vector<64x32xbf16>
    %55 = arith.truncf %52 : vector<32x64xf32> to vector<32x64xbf16>
    %cst_49 = arith.constant dense<0.000000e+00> : vector<64x64xf32>
    %56 = tpu.matmul %54, %55, %cst_49 {dimension_numbers = #tpu.dot_dimension_numbers<[1], [0], [0], [1], [0, 0, 1, 1], [], []>} : vector<64x32xbf16>, vector<32x64xbf16>, vector<64x64xf32> -> vector<64x64xf32>
    %57 = arith.addf %49, %56 : vector<64x64xf32>
    %c6 = arith.constant 6 : index
    %c0_50 = arith.constant 0 : index
    %c0_51 = arith.constant 0 : index
    %58 = vector.load %arg4[%c6, %c0_50, %c0_51] : memref<9x256x64xbf16, #tpu.memory_space<vmem>>, vector<1x256x64xbf16>
    %59 = vector.shape_cast %58 : vector<1x256x64xbf16> to vector<256x64xbf16>
    %cst_52 = arith.constant dense<0.000000e+00> : vector<32x64xf32>
    %60 = tpu.matmul %8, %59, %cst_52 {dimension_numbers = #tpu.dot_dimension_numbers<[1], [0], [0], [1], [0, 0, 1, 1], [], []>} : vector<32x256xbf16>, vector<256x64xbf16>, vector<32x64xf32> -> vector<32x64xf32>
    %c6_53 = arith.constant 6 : index
    %c0_54 = arith.constant 0 : index
    %c0_55 = arith.constant 0 : index
    %61 = vector.load %arg5[%c6_53, %c0_54, %c0_55] : memref<9x64x32xbf16, #tpu.memory_space<vmem>>, vector<1x64x32xbf16>
    %62 = vector.shape_cast %61 : vector<1x64x32xbf16> to vector<64x32xbf16>
    %63 = arith.truncf %60 : vector<32x64xf32> to vector<32x64xbf16>
    %cst_56 = arith.constant dense<0.000000e+00> : vector<64x64xf32>
    %64 = tpu.matmul %62, %63, %cst_56 {dimension_numbers = #tpu.dot_dimension_numbers<[1], [0], [0], [1], [0, 0, 1, 1], [], []>} : vector<64x32xbf16>, vector<32x64xbf16>, vector<64x64xf32> -> vector<64x64xf32>
    %65 = arith.addf %57, %64 : vector<64x64xf32>
    %c7 = arith.constant 7 : index
    %c0_57 = arith.constant 0 : index
    %c0_58 = arith.constant 0 : index
    %66 = vector.load %arg4[%c7, %c0_57, %c0_58] : memref<9x256x64xbf16, #tpu.memory_space<vmem>>, vector<1x256x64xbf16>
    %67 = vector.shape_cast %66 : vector<1x256x64xbf16> to vector<256x64xbf16>
    %cst_59 = arith.constant dense<0.000000e+00> : vector<32x64xf32>
    %68 = tpu.matmul %8, %67, %cst_59 {dimension_numbers = #tpu.dot_dimension_numbers<[1], [0], [0], [1], [0, 0, 1, 1], [], []>} : vector<32x256xbf16>, vector<256x64xbf16>, vector<32x64xf32> -> vector<32x64xf32>
    %c7_60 = arith.constant 7 : index
    %c0_61 = arith.constant 0 : index
    %c0_62 = arith.constant 0 : index
    %69 = vector.load %arg5[%c7_60, %c0_61, %c0_62] : memref<9x64x32xbf16, #tpu.memory_space<vmem>>, vector<1x64x32xbf16>
    %70 = vector.shape_cast %69 : vector<1x64x32xbf16> to vector<64x32xbf16>
    %71 = arith.truncf %68 : vector<32x64xf32> to vector<32x64xbf16>
    %cst_63 = arith.constant dense<0.000000e+00> : vector<64x64xf32>
    %72 = tpu.matmul %70, %71, %cst_63 {dimension_numbers = #tpu.dot_dimension_numbers<[1], [0], [0], [1], [0, 0, 1, 1], [], []>} : vector<64x32xbf16>, vector<32x64xbf16>, vector<64x64xf32> -> vector<64x64xf32>
    %73 = arith.addf %65, %72 : vector<64x64xf32>
    %c8 = arith.constant 8 : index
    %c0_64 = arith.constant 0 : index
    %c0_65 = arith.constant 0 : index
    %74 = vector.load %arg4[%c8, %c0_64, %c0_65] : memref<9x256x64xbf16, #tpu.memory_space<vmem>>, vector<1x256x64xbf16>
    %75 = vector.shape_cast %74 : vector<1x256x64xbf16> to vector<256x64xbf16>
    %cst_66 = arith.constant dense<0.000000e+00> : vector<32x64xf32>
    %76 = tpu.matmul %8, %75, %cst_66 {dimension_numbers = #tpu.dot_dimension_numbers<[1], [0], [0], [1], [0, 0, 1, 1], [], []>} : vector<32x256xbf16>, vector<256x64xbf16>, vector<32x64xf32> -> vector<32x64xf32>
    %c8_67 = arith.constant 8 : index
    %c0_68 = arith.constant 0 : index
    %c0_69 = arith.constant 0 : index
    %77 = vector.load %arg5[%c8_67, %c0_68, %c0_69] : memref<9x64x32xbf16, #tpu.memory_space<vmem>>, vector<1x64x32xbf16>
    %78 = vector.shape_cast %77 : vector<1x64x32xbf16> to vector<64x32xbf16>
    %79 = arith.truncf %76 : vector<32x64xf32> to vector<32x64xbf16>
    %cst_70 = arith.constant dense<0.000000e+00> : vector<64x64xf32>
    %80 = tpu.matmul %78, %79, %cst_70 {dimension_numbers = #tpu.dot_dimension_numbers<[1], [0], [0], [1], [0, 0, 1, 1], [], []>} : vector<64x32xbf16>, vector<32x64xbf16>, vector<64x64xf32> -> vector<64x64xf32>
    %81 = arith.addf %73, %80 : vector<64x64xf32>
    %c0_71 = arith.constant 0 : index
    %c0_72 = arith.constant 0 : index
    %82 = vector.load %arg6[%c0_71, %c0_72] : memref<64x1xf32, #tpu.memory_space<vmem>>, vector<64x1xf32>
    %83 = vector.broadcast %82 : vector<64x1xf32> to vector<64x64xf32>
    %84 = arith.addf %81, %83 : vector<64x64xf32>
    %cst_73 = arith.constant 0.000000e+00 : f32
    %85 = vector.broadcast %cst_73 : f32 to vector<64x64xf32>
    %86 = arith.maximumf %84, %85 : vector<64x64xf32>
    %87 = vector.extract_strided_slice %86 {offsets = [0, 0], sizes = [32, 64], strides = [1, 1]} : vector<64x64xf32> to vector<32x64xf32>
    %c0_74 = arith.constant 0 : index
    %c0_75 = arith.constant 0 : index
    %88 = vector.load %arg7[%c0_74, %c0_75] : memref<64x32xf32, #tpu.memory_space<vmem>>, vector<64x32xf32>
    %cst_76 = arith.constant dense<0.000000e+00> : vector<32x32xf32>
    %89 = tpu.matmul %87, %88, %cst_76 {dimension_numbers = #tpu.dot_dimension_numbers<[1], [0], [0], [1], [0, 0, 1, 1], [], []>} : vector<32x64xf32>, vector<64x32xf32>, vector<32x32xf32> -> vector<32x32xf32>
    %c0_77 = arith.constant 0 : index
    %c0_78 = arith.constant 0 : index
    %90 = vector.load %arg8[%c0_77, %c0_78] : memref<64x32xf32, #tpu.memory_space<vmem>>, vector<64x32xf32>
    %cst_79 = arith.constant dense<0.000000e+00> : vector<64x32xf32>
    %91 = tpu.matmul %90, %89, %cst_79 {dimension_numbers = #tpu.dot_dimension_numbers<[1], [0], [0], [1], [0, 0, 1, 1], [], []>} : vector<64x32xf32>, vector<32x32xf32>, vector<64x32xf32> -> vector<64x32xf32>
    %c0_80 = arith.constant 0 : index
    %c0_81 = arith.constant 0 : index
    %92 = vector.load %arg9[%c0_80, %c0_81] : memref<64x1xf32, #tpu.memory_space<vmem>>, vector<64x1xf32>
    %93 = vector.broadcast %92 : vector<64x1xf32> to vector<64x32xf32>
    %94 = arith.addf %91, %93 : vector<64x32xf32>
    %95 = vector.extract_strided_slice %86 {offsets = [32, 32], sizes = [32, 32], strides = [1, 1]} : vector<64x64xf32> to vector<32x32xf32>
    %96 = vector.extract_strided_slice %94 {offsets = [0, 0], sizes = [32, 32], strides = [1, 1]} : vector<64x32xf32> to vector<32x32xf32>
    %cst_82 = arith.constant 1.000000e+00 : f32
    %97 = vector.broadcast %cst_82 : f32 to vector<32x32xf32>
    %98 = arith.addf %97, %96 : vector<32x32xf32>
    %99 = arith.mulf %95, %98 : vector<32x32xf32>
    %100 = vector.extract_strided_slice %94 {offsets = [32, 0], sizes = [32, 32], strides = [1, 1]} : vector<64x32xf32> to vector<32x32xf32>
    %101 = arith.addf %99, %100 : vector<32x32xf32>
    %cst_83 = arith.constant 0.000000e+00 : f32
    %102 = vector.broadcast %cst_83 : f32 to vector<32x32xf32>
    %103 = arith.maximumf %101, %102 : vector<32x32xf32>
    %104 = arith.truncf %103 : vector<32x32xf32> to vector<32x32xbf16>
    %cst_84 = arith.constant 0.000000e+00 : f32
    %105 = vector.broadcast %cst_84 : f32 to vector<16x128xf32>
    %c0_85 = arith.constant 0 : index
    %c0_86 = arith.constant 0 : index
    %c0_87 = arith.constant 0 : index
    %106 = vector.load %arg11[%c0_85, %c0_86, %c0_87] : memref<9x16x32xbf16, #tpu.memory_space<vmem>>, vector<1x16x32xbf16>
    %107 = vector.shape_cast %106 : vector<1x16x32xbf16> to vector<16x32xbf16>
    %cst_88 = arith.constant dense<0.000000e+00> : vector<16x32xf32>
    %108 = tpu.matmul %107, %104, %cst_88 {dimension_numbers = #tpu.dot_dimension_numbers<[1], [0], [0], [1], [0, 0, 1, 1], [], []>} : vector<16x32xbf16>, vector<32x32xbf16>, vector<16x32xf32> -> vector<16x32xf32>
    %109 = arith.truncf %108 : vector<16x32xf32> to vector<16x32xbf16>
    %c0_89 = arith.constant 0 : index
    %c0_90 = arith.constant 0 : index
    %c0_91 = arith.constant 0 : index
    %110 = vector.load %arg10[%c0_89, %c0_90, %c0_91] : memref<9x32x128xbf16, #tpu.memory_space<vmem>>, vector<1x32x128xbf16>
    %111 = vector.shape_cast %110 : vector<1x32x128xbf16> to vector<32x128xbf16>
    %cst_92 = arith.constant dense<0.000000e+00> : vector<16x128xf32>
    %112 = tpu.matmul %109, %111, %cst_92 {dimension_numbers = #tpu.dot_dimension_numbers<[1], [0], [0], [1], [0, 0, 1, 1], [], []>} : vector<16x32xbf16>, vector<32x128xbf16>, vector<16x128xf32> -> vector<16x128xf32>
    %113 = arith.addf %105, %112 : vector<16x128xf32>
    %c1_93 = arith.constant 1 : index
    %c0_94 = arith.constant 0 : index
    %c0_95 = arith.constant 0 : index
    %114 = vector.load %arg11[%c1_93, %c0_94, %c0_95] : memref<9x16x32xbf16, #tpu.memory_space<vmem>>, vector<1x16x32xbf16>
    %115 = vector.shape_cast %114 : vector<1x16x32xbf16> to vector<16x32xbf16>
    %cst_96 = arith.constant dense<0.000000e+00> : vector<16x32xf32>
    %116 = tpu.matmul %115, %104, %cst_96 {dimension_numbers = #tpu.dot_dimension_numbers<[1], [0], [0], [1], [0, 0, 1, 1], [], []>} : vector<16x32xbf16>, vector<32x32xbf16>, vector<16x32xf32> -> vector<16x32xf32>
    %117 = arith.truncf %116 : vector<16x32xf32> to vector<16x32xbf16>
    %c1_97 = arith.constant 1 : index
    %c0_98 = arith.constant 0 : index
    %c0_99 = arith.constant 0 : index
    %118 = vector.load %arg10[%c1_97, %c0_98, %c0_99] : memref<9x32x128xbf16, #tpu.memory_space<vmem>>, vector<1x32x128xbf16>
    %119 = vector.shape_cast %118 : vector<1x32x128xbf16> to vector<32x128xbf16>
    %cst_100 = arith.constant dense<0.000000e+00> : vector<16x128xf32>
    %120 = tpu.matmul %117, %119, %cst_100 {dimension_numbers = #tpu.dot_dimension_numbers<[1], [0], [0], [1], [0, 0, 1, 1], [], []>} : vector<16x32xbf16>, vector<32x128xbf16>, vector<16x128xf32> -> vector<16x128xf32>
    %121 = arith.addf %113, %120 : vector<16x128xf32>
    %c2_101 = arith.constant 2 : index
    %c0_102 = arith.constant 0 : index
    %c0_103 = arith.constant 0 : index
    %122 = vector.load %arg11[%c2_101, %c0_102, %c0_103] : memref<9x16x32xbf16, #tpu.memory_space<vmem>>, vector<1x16x32xbf16>
    %123 = vector.shape_cast %122 : vector<1x16x32xbf16> to vector<16x32xbf16>
    %cst_104 = arith.constant dense<0.000000e+00> : vector<16x32xf32>
    %124 = tpu.matmul %123, %104, %cst_104 {dimension_numbers = #tpu.dot_dimension_numbers<[1], [0], [0], [1], [0, 0, 1, 1], [], []>} : vector<16x32xbf16>, vector<32x32xbf16>, vector<16x32xf32> -> vector<16x32xf32>
    %125 = arith.truncf %124 : vector<16x32xf32> to vector<16x32xbf16>
    %c2_105 = arith.constant 2 : index
    %c0_106 = arith.constant 0 : index
    %c0_107 = arith.constant 0 : index
    %126 = vector.load %arg10[%c2_105, %c0_106, %c0_107] : memref<9x32x128xbf16, #tpu.memory_space<vmem>>, vector<1x32x128xbf16>
    %127 = vector.shape_cast %126 : vector<1x32x128xbf16> to vector<32x128xbf16>
    %cst_108 = arith.constant dense<0.000000e+00> : vector<16x128xf32>
    %128 = tpu.matmul %125, %127, %cst_108 {dimension_numbers = #tpu.dot_dimension_numbers<[1], [0], [0], [1], [0, 0, 1, 1], [], []>} : vector<16x32xbf16>, vector<32x128xbf16>, vector<16x128xf32> -> vector<16x128xf32>
    %129 = arith.addf %121, %128 : vector<16x128xf32>
    %c3_109 = arith.constant 3 : index
    %c0_110 = arith.constant 0 : index
    %c0_111 = arith.constant 0 : index
    %130 = vector.load %arg11[%c3_109, %c0_110, %c0_111] : memref<9x16x32xbf16, #tpu.memory_space<vmem>>, vector<1x16x32xbf16>
    %131 = vector.shape_cast %130 : vector<1x16x32xbf16> to vector<16x32xbf16>
    %cst_112 = arith.constant dense<0.000000e+00> : vector<16x32xf32>
    %132 = tpu.matmul %131, %104, %cst_112 {dimension_numbers = #tpu.dot_dimension_numbers<[1], [0], [0], [1], [0, 0, 1, 1], [], []>} : vector<16x32xbf16>, vector<32x32xbf16>, vector<16x32xf32> -> vector<16x32xf32>
    %133 = arith.truncf %132 : vector<16x32xf32> to vector<16x32xbf16>
    %c3_113 = arith.constant 3 : index
    %c0_114 = arith.constant 0 : index
    %c0_115 = arith.constant 0 : index
    %134 = vector.load %arg10[%c3_113, %c0_114, %c0_115] : memref<9x32x128xbf16, #tpu.memory_space<vmem>>, vector<1x32x128xbf16>
    %135 = vector.shape_cast %134 : vector<1x32x128xbf16> to vector<32x128xbf16>
    %cst_116 = arith.constant dense<0.000000e+00> : vector<16x128xf32>
    %136 = tpu.matmul %133, %135, %cst_116 {dimension_numbers = #tpu.dot_dimension_numbers<[1], [0], [0], [1], [0, 0, 1, 1], [], []>} : vector<16x32xbf16>, vector<32x128xbf16>, vector<16x128xf32> -> vector<16x128xf32>
    %137 = arith.addf %129, %136 : vector<16x128xf32>
    %c4_117 = arith.constant 4 : index
    %c0_118 = arith.constant 0 : index
    %c0_119 = arith.constant 0 : index
    %138 = vector.load %arg11[%c4_117, %c0_118, %c0_119] : memref<9x16x32xbf16, #tpu.memory_space<vmem>>, vector<1x16x32xbf16>
    %139 = vector.shape_cast %138 : vector<1x16x32xbf16> to vector<16x32xbf16>
    %cst_120 = arith.constant dense<0.000000e+00> : vector<16x32xf32>
    %140 = tpu.matmul %139, %104, %cst_120 {dimension_numbers = #tpu.dot_dimension_numbers<[1], [0], [0], [1], [0, 0, 1, 1], [], []>} : vector<16x32xbf16>, vector<32x32xbf16>, vector<16x32xf32> -> vector<16x32xf32>
    %141 = arith.truncf %140 : vector<16x32xf32> to vector<16x32xbf16>
    %c4_121 = arith.constant 4 : index
    %c0_122 = arith.constant 0 : index
    %c0_123 = arith.constant 0 : index
    %142 = vector.load %arg10[%c4_121, %c0_122, %c0_123] : memref<9x32x128xbf16, #tpu.memory_space<vmem>>, vector<1x32x128xbf16>
    %143 = vector.shape_cast %142 : vector<1x32x128xbf16> to vector<32x128xbf16>
    %cst_124 = arith.constant dense<0.000000e+00> : vector<16x128xf32>
    %144 = tpu.matmul %141, %143, %cst_124 {dimension_numbers = #tpu.dot_dimension_numbers<[1], [0], [0], [1], [0, 0, 1, 1], [], []>} : vector<16x32xbf16>, vector<32x128xbf16>, vector<16x128xf32> -> vector<16x128xf32>
    %145 = arith.addf %137, %144 : vector<16x128xf32>
    %c5_125 = arith.constant 5 : index
    %c0_126 = arith.constant 0 : index
    %c0_127 = arith.constant 0 : index
    %146 = vector.load %arg11[%c5_125, %c0_126, %c0_127] : memref<9x16x32xbf16, #tpu.memory_space<vmem>>, vector<1x16x32xbf16>
    %147 = vector.shape_cast %146 : vector<1x16x32xbf16> to vector<16x32xbf16>
    %cst_128 = arith.constant dense<0.000000e+00> : vector<16x32xf32>
    %148 = tpu.matmul %147, %104, %cst_128 {dimension_numbers = #tpu.dot_dimension_numbers<[1], [0], [0], [1], [0, 0, 1, 1], [], []>} : vector<16x32xbf16>, vector<32x32xbf16>, vector<16x32xf32> -> vector<16x32xf32>
    %149 = arith.truncf %148 : vector<16x32xf32> to vector<16x32xbf16>
    %c5_129 = arith.constant 5 : index
    %c0_130 = arith.constant 0 : index
    %c0_131 = arith.constant 0 : index
    %150 = vector.load %arg10[%c5_129, %c0_130, %c0_131] : memref<9x32x128xbf16, #tpu.memory_space<vmem>>, vector<1x32x128xbf16>
    %151 = vector.shape_cast %150 : vector<1x32x128xbf16> to vector<32x128xbf16>
    %cst_132 = arith.constant dense<0.000000e+00> : vector<16x128xf32>
    %152 = tpu.matmul %149, %151, %cst_132 {dimension_numbers = #tpu.dot_dimension_numbers<[1], [0], [0], [1], [0, 0, 1, 1], [], []>} : vector<16x32xbf16>, vector<32x128xbf16>, vector<16x128xf32> -> vector<16x128xf32>
    %153 = arith.addf %145, %152 : vector<16x128xf32>
    %c6_133 = arith.constant 6 : index
    %c0_134 = arith.constant 0 : index
    %c0_135 = arith.constant 0 : index
    %154 = vector.load %arg11[%c6_133, %c0_134, %c0_135] : memref<9x16x32xbf16, #tpu.memory_space<vmem>>, vector<1x16x32xbf16>
    %155 = vector.shape_cast %154 : vector<1x16x32xbf16> to vector<16x32xbf16>
    %cst_136 = arith.constant dense<0.000000e+00> : vector<16x32xf32>
    %156 = tpu.matmul %155, %104, %cst_136 {dimension_numbers = #tpu.dot_dimension_numbers<[1], [0], [0], [1], [0, 0, 1, 1], [], []>} : vector<16x32xbf16>, vector<32x32xbf16>, vector<16x32xf32> -> vector<16x32xf32>
    %157 = arith.truncf %156 : vector<16x32xf32> to vector<16x32xbf16>
    %c6_137 = arith.constant 6 : index
    %c0_138 = arith.constant 0 : index
    %c0_139 = arith.constant 0 : index
    %158 = vector.load %arg10[%c6_137, %c0_138, %c0_139] : memref<9x32x128xbf16, #tpu.memory_space<vmem>>, vector<1x32x128xbf16>
    %159 = vector.shape_cast %158 : vector<1x32x128xbf16> to vector<32x128xbf16>
    %cst_140 = arith.constant dense<0.000000e+00> : vector<16x128xf32>
    %160 = tpu.matmul %157, %159, %cst_140 {dimension_numbers = #tpu.dot_dimension_numbers<[1], [0], [0], [1], [0, 0, 1, 1], [], []>} : vector<16x32xbf16>, vector<32x128xbf16>, vector<16x128xf32> -> vector<16x128xf32>
    %161 = arith.addf %153, %160 : vector<16x128xf32>
    %c7_141 = arith.constant 7 : index
    %c0_142 = arith.constant 0 : index
    %c0_143 = arith.constant 0 : index
    %162 = vector.load %arg11[%c7_141, %c0_142, %c0_143] : memref<9x16x32xbf16, #tpu.memory_space<vmem>>, vector<1x16x32xbf16>
    %163 = vector.shape_cast %162 : vector<1x16x32xbf16> to vector<16x32xbf16>
    %cst_144 = arith.constant dense<0.000000e+00> : vector<16x32xf32>
    %164 = tpu.matmul %163, %104, %cst_144 {dimension_numbers = #tpu.dot_dimension_numbers<[1], [0], [0], [1], [0, 0, 1, 1], [], []>} : vector<16x32xbf16>, vector<32x32xbf16>, vector<16x32xf32> -> vector<16x32xf32>
    %165 = arith.truncf %164 : vector<16x32xf32> to vector<16x32xbf16>
    %c7_145 = arith.constant 7 : index
    %c0_146 = arith.constant 0 : index
    %c0_147 = arith.constant 0 : index
    %166 = vector.load %arg10[%c7_145, %c0_146, %c0_147] : memref<9x32x128xbf16, #tpu.memory_space<vmem>>, vector<1x32x128xbf16>
    %167 = vector.shape_cast %166 : vector<1x32x128xbf16> to vector<32x128xbf16>
    %cst_148 = arith.constant dense<0.000000e+00> : vector<16x128xf32>
    %168 = tpu.matmul %165, %167, %cst_148 {dimension_numbers = #tpu.dot_dimension_numbers<[1], [0], [0], [1], [0, 0, 1, 1], [], []>} : vector<16x32xbf16>, vector<32x128xbf16>, vector<16x128xf32> -> vector<16x128xf32>
    %169 = arith.addf %161, %168 : vector<16x128xf32>
    %c8_149 = arith.constant 8 : index
    %c0_150 = arith.constant 0 : index
    %c0_151 = arith.constant 0 : index
    %170 = vector.load %arg11[%c8_149, %c0_150, %c0_151] : memref<9x16x32xbf16, #tpu.memory_space<vmem>>, vector<1x16x32xbf16>
    %171 = vector.shape_cast %170 : vector<1x16x32xbf16> to vector<16x32xbf16>
    %cst_152 = arith.constant dense<0.000000e+00> : vector<16x32xf32>
    %172 = tpu.matmul %171, %104, %cst_152 {dimension_numbers = #tpu.dot_dimension_numbers<[1], [0], [0], [1], [0, 0, 1, 1], [], []>} : vector<16x32xbf16>, vector<32x32xbf16>, vector<16x32xf32> -> vector<16x32xf32>
    %173 = arith.truncf %172 : vector<16x32xf32> to vector<16x32xbf16>
    %c8_153 = arith.constant 8 : index
    %c0_154 = arith.constant 0 : index
    %c0_155 = arith.constant 0 : index
    %174 = vector.load %arg10[%c8_153, %c0_154, %c0_155] : memref<9x32x128xbf16, #tpu.memory_space<vmem>>, vector<1x32x128xbf16>
    %175 = vector.shape_cast %174 : vector<1x32x128xbf16> to vector<32x128xbf16>
    %cst_156 = arith.constant dense<0.000000e+00> : vector<16x128xf32>
    %176 = tpu.matmul %173, %175, %cst_156 {dimension_numbers = #tpu.dot_dimension_numbers<[1], [0], [0], [1], [0, 0, 1, 1], [], []>} : vector<16x32xbf16>, vector<32x128xbf16>, vector<16x128xf32> -> vector<16x128xf32>
    %177 = arith.addf %169, %176 : vector<16x128xf32>
    %c0_157 = arith.constant 0 : index
    %c0_158 = arith.constant 0 : index
    %178 = vector.load %arg12[%c0_157, %c0_158] : memref<16x1xf32, #tpu.memory_space<vmem>>, vector<16x1xf32>
    %179 = vector.broadcast %178 : vector<16x1xf32> to vector<16x128xf32>
    %180 = arith.addf %177, %179 : vector<16x128xf32>
    %cst_159 = arith.constant 0.000000e+00 : f32
    %181 = vector.broadcast %cst_159 : f32 to vector<16x128xf32>
    %182 = arith.maximumf %180, %181 : vector<16x128xf32>
    %183 = arith.truncf %182 : vector<16x128xf32> to vector<16x128xbf16>
    %cst_160 = arith.constant 0.000000e+00 : f32
    %184 = vector.broadcast %cst_160 : f32 to vector<3x512xf32>
    %c0_161 = arith.constant 0 : index
    %c0_162 = arith.constant 0 : index
    %c0_163 = arith.constant 0 : index
    %185 = vector.load %arg14[%c0_161, %c0_162, %c0_163] : memref<9x3x16xbf16, #tpu.memory_space<vmem>>, vector<1x3x16xbf16>
    %186 = vector.shape_cast %185 : vector<1x3x16xbf16> to vector<3x16xbf16>
    %cst_164 = arith.constant dense<0.000000e+00> : vector<3x128xf32>
    %187 = tpu.matmul %186, %183, %cst_164 {dimension_numbers = #tpu.dot_dimension_numbers<[1], [0], [0], [1], [0, 0, 1, 1], [], []>} : vector<3x16xbf16>, vector<16x128xbf16>, vector<3x128xf32> -> vector<3x128xf32>
    %188 = arith.truncf %187 : vector<3x128xf32> to vector<3x128xbf16>
    %c0_165 = arith.constant 0 : index
    %c0_166 = arith.constant 0 : index
    %c0_167 = arith.constant 0 : index
    %189 = vector.load %arg13[%c0_165, %c0_166, %c0_167] : memref<9x128x512xbf16, #tpu.memory_space<vmem>>, vector<1x128x512xbf16>
    %190 = vector.shape_cast %189 : vector<1x128x512xbf16> to vector<128x512xbf16>
    %cst_168 = arith.constant dense<0.000000e+00> : vector<3x512xf32>
    %191 = tpu.matmul %188, %190, %cst_168 {dimension_numbers = #tpu.dot_dimension_numbers<[1], [0], [0], [1], [0, 0, 1, 1], [], []>} : vector<3x128xbf16>, vector<128x512xbf16>, vector<3x512xf32> -> vector<3x512xf32>
    %192 = arith.addf %184, %191 : vector<3x512xf32>
    %c1_169 = arith.constant 1 : index
    %c0_170 = arith.constant 0 : index
    %c0_171 = arith.constant 0 : index
    %193 = vector.load %arg14[%c1_169, %c0_170, %c0_171] : memref<9x3x16xbf16, #tpu.memory_space<vmem>>, vector<1x3x16xbf16>
    %194 = vector.shape_cast %193 : vector<1x3x16xbf16> to vector<3x16xbf16>
    %cst_172 = arith.constant dense<0.000000e+00> : vector<3x128xf32>
    %195 = tpu.matmul %194, %183, %cst_172 {dimension_numbers = #tpu.dot_dimension_numbers<[1], [0], [0], [1], [0, 0, 1, 1], [], []>} : vector<3x16xbf16>, vector<16x128xbf16>, vector<3x128xf32> -> vector<3x128xf32>
    %196 = arith.truncf %195 : vector<3x128xf32> to vector<3x128xbf16>
    %c1_173 = arith.constant 1 : index
    %c0_174 = arith.constant 0 : index
    %c0_175 = arith.constant 0 : index
    %197 = vector.load %arg13[%c1_173, %c0_174, %c0_175] : memref<9x128x512xbf16, #tpu.memory_space<vmem>>, vector<1x128x512xbf16>
    %198 = vector.shape_cast %197 : vector<1x128x512xbf16> to vector<128x512xbf16>
    %cst_176 = arith.constant dense<0.000000e+00> : vector<3x512xf32>
    %199 = tpu.matmul %196, %198, %cst_176 {dimension_numbers = #tpu.dot_dimension_numbers<[1], [0], [0], [1], [0, 0, 1, 1], [], []>} : vector<3x128xbf16>, vector<128x512xbf16>, vector<3x512xf32> -> vector<3x512xf32>
    %200 = arith.addf %192, %199 : vector<3x512xf32>
    %c2_177 = arith.constant 2 : index
    %c0_178 = arith.constant 0 : index
    %c0_179 = arith.constant 0 : index
    %201 = vector.load %arg14[%c2_177, %c0_178, %c0_179] : memref<9x3x16xbf16, #tpu.memory_space<vmem>>, vector<1x3x16xbf16>
    %202 = vector.shape_cast %201 : vector<1x3x16xbf16> to vector<3x16xbf16>
    %cst_180 = arith.constant dense<0.000000e+00> : vector<3x128xf32>
    %203 = tpu.matmul %202, %183, %cst_180 {dimension_numbers = #tpu.dot_dimension_numbers<[1], [0], [0], [1], [0, 0, 1, 1], [], []>} : vector<3x16xbf16>, vector<16x128xbf16>, vector<3x128xf32> -> vector<3x128xf32>
    %204 = arith.truncf %203 : vector<3x128xf32> to vector<3x128xbf16>
    %c2_181 = arith.constant 2 : index
    %c0_182 = arith.constant 0 : index
    %c0_183 = arith.constant 0 : index
    %205 = vector.load %arg13[%c2_181, %c0_182, %c0_183] : memref<9x128x512xbf16, #tpu.memory_space<vmem>>, vector<1x128x512xbf16>
    %206 = vector.shape_cast %205 : vector<1x128x512xbf16> to vector<128x512xbf16>
    %cst_184 = arith.constant dense<0.000000e+00> : vector<3x512xf32>
    %207 = tpu.matmul %204, %206, %cst_184 {dimension_numbers = #tpu.dot_dimension_numbers<[1], [0], [0], [1], [0, 0, 1, 1], [], []>} : vector<3x128xbf16>, vector<128x512xbf16>, vector<3x512xf32> -> vector<3x512xf32>
    %208 = arith.addf %200, %207 : vector<3x512xf32>
    %c3_185 = arith.constant 3 : index
    %c0_186 = arith.constant 0 : index
    %c0_187 = arith.constant 0 : index
    %209 = vector.load %arg14[%c3_185, %c0_186, %c0_187] : memref<9x3x16xbf16, #tpu.memory_space<vmem>>, vector<1x3x16xbf16>
    %210 = vector.shape_cast %209 : vector<1x3x16xbf16> to vector<3x16xbf16>
    %cst_188 = arith.constant dense<0.000000e+00> : vector<3x128xf32>
    %211 = tpu.matmul %210, %183, %cst_188 {dimension_numbers = #tpu.dot_dimension_numbers<[1], [0], [0], [1], [0, 0, 1, 1], [], []>} : vector<3x16xbf16>, vector<16x128xbf16>, vector<3x128xf32> -> vector<3x128xf32>
    %212 = arith.truncf %211 : vector<3x128xf32> to vector<3x128xbf16>
    %c3_189 = arith.constant 3 : index
    %c0_190 = arith.constant 0 : index
    %c0_191 = arith.constant 0 : index
    %213 = vector.load %arg13[%c3_189, %c0_190, %c0_191] : memref<9x128x512xbf16, #tpu.memory_space<vmem>>, vector<1x128x512xbf16>
    %214 = vector.shape_cast %213 : vector<1x128x512xbf16> to vector<128x512xbf16>
    %cst_192 = arith.constant dense<0.000000e+00> : vector<3x512xf32>
    %215 = tpu.matmul %212, %214, %cst_192 {dimension_numbers = #tpu.dot_dimension_numbers<[1], [0], [0], [1], [0, 0, 1, 1], [], []>} : vector<3x128xbf16>, vector<128x512xbf16>, vector<3x512xf32> -> vector<3x512xf32>
    %216 = arith.addf %208, %215 : vector<3x512xf32>
    %c4_193 = arith.constant 4 : index
    %c0_194 = arith.constant 0 : index
    %c0_195 = arith.constant 0 : index
    %217 = vector.load %arg14[%c4_193, %c0_194, %c0_195] : memref<9x3x16xbf16, #tpu.memory_space<vmem>>, vector<1x3x16xbf16>
    %218 = vector.shape_cast %217 : vector<1x3x16xbf16> to vector<3x16xbf16>
    %cst_196 = arith.constant dense<0.000000e+00> : vector<3x128xf32>
    %219 = tpu.matmul %218, %183, %cst_196 {dimension_numbers = #tpu.dot_dimension_numbers<[1], [0], [0], [1], [0, 0, 1, 1], [], []>} : vector<3x16xbf16>, vector<16x128xbf16>, vector<3x128xf32> -> vector<3x128xf32>
    %220 = arith.truncf %219 : vector<3x128xf32> to vector<3x128xbf16>
    %c4_197 = arith.constant 4 : index
    %c0_198 = arith.constant 0 : index
    %c0_199 = arith.constant 0 : index
    %221 = vector.load %arg13[%c4_197, %c0_198, %c0_199] : memref<9x128x512xbf16, #tpu.memory_space<vmem>>, vector<1x128x512xbf16>
    %222 = vector.shape_cast %221 : vector<1x128x512xbf16> to vector<128x512xbf16>
    %cst_200 = arith.constant dense<0.000000e+00> : vector<3x512xf32>
    %223 = tpu.matmul %220, %222, %cst_200 {dimension_numbers = #tpu.dot_dimension_numbers<[1], [0], [0], [1], [0, 0, 1, 1], [], []>} : vector<3x128xbf16>, vector<128x512xbf16>, vector<3x512xf32> -> vector<3x512xf32>
    %224 = arith.addf %216, %223 : vector<3x512xf32>
    %c5_201 = arith.constant 5 : index
    %c0_202 = arith.constant 0 : index
    %c0_203 = arith.constant 0 : index
    %225 = vector.load %arg14[%c5_201, %c0_202, %c0_203] : memref<9x3x16xbf16, #tpu.memory_space<vmem>>, vector<1x3x16xbf16>
    %226 = vector.shape_cast %225 : vector<1x3x16xbf16> to vector<3x16xbf16>
    %cst_204 = arith.constant dense<0.000000e+00> : vector<3x128xf32>
    %227 = tpu.matmul %226, %183, %cst_204 {dimension_numbers = #tpu.dot_dimension_numbers<[1], [0], [0], [1], [0, 0, 1, 1], [], []>} : vector<3x16xbf16>, vector<16x128xbf16>, vector<3x128xf32> -> vector<3x128xf32>
    %228 = arith.truncf %227 : vector<3x128xf32> to vector<3x128xbf16>
    %c5_205 = arith.constant 5 : index
    %c0_206 = arith.constant 0 : index
    %c0_207 = arith.constant 0 : index
    %229 = vector.load %arg13[%c5_205, %c0_206, %c0_207] : memref<9x128x512xbf16, #tpu.memory_space<vmem>>, vector<1x128x512xbf16>
    %230 = vector.shape_cast %229 : vector<1x128x512xbf16> to vector<128x512xbf16>
    %cst_208 = arith.constant dense<0.000000e+00> : vector<3x512xf32>
    %231 = tpu.matmul %228, %230, %cst_208 {dimension_numbers = #tpu.dot_dimension_numbers<[1], [0], [0], [1], [0, 0, 1, 1], [], []>} : vector<3x128xbf16>, vector<128x512xbf16>, vector<3x512xf32> -> vector<3x512xf32>
    %232 = arith.addf %224, %231 : vector<3x512xf32>
    %c6_209 = arith.constant 6 : index
    %c0_210 = arith.constant 0 : index
    %c0_211 = arith.constant 0 : index
    %233 = vector.load %arg14[%c6_209, %c0_210, %c0_211] : memref<9x3x16xbf16, #tpu.memory_space<vmem>>, vector<1x3x16xbf16>
    %234 = vector.shape_cast %233 : vector<1x3x16xbf16> to vector<3x16xbf16>
    %cst_212 = arith.constant dense<0.000000e+00> : vector<3x128xf32>
    %235 = tpu.matmul %234, %183, %cst_212 {dimension_numbers = #tpu.dot_dimension_numbers<[1], [0], [0], [1], [0, 0, 1, 1], [], []>} : vector<3x16xbf16>, vector<16x128xbf16>, vector<3x128xf32> -> vector<3x128xf32>
    %236 = arith.truncf %235 : vector<3x128xf32> to vector<3x128xbf16>
    %c6_213 = arith.constant 6 : index
    %c0_214 = arith.constant 0 : index
    %c0_215 = arith.constant 0 : index
    %237 = vector.load %arg13[%c6_213, %c0_214, %c0_215] : memref<9x128x512xbf16, #tpu.memory_space<vmem>>, vector<1x128x512xbf16>
    %238 = vector.shape_cast %237 : vector<1x128x512xbf16> to vector<128x512xbf16>
    %cst_216 = arith.constant dense<0.000000e+00> : vector<3x512xf32>
    %239 = tpu.matmul %236, %238, %cst_216 {dimension_numbers = #tpu.dot_dimension_numbers<[1], [0], [0], [1], [0, 0, 1, 1], [], []>} : vector<3x128xbf16>, vector<128x512xbf16>, vector<3x512xf32> -> vector<3x512xf32>
    %240 = arith.addf %232, %239 : vector<3x512xf32>
    %c7_217 = arith.constant 7 : index
    %c0_218 = arith.constant 0 : index
    %c0_219 = arith.constant 0 : index
    %241 = vector.load %arg14[%c7_217, %c0_218, %c0_219] : memref<9x3x16xbf16, #tpu.memory_space<vmem>>, vector<1x3x16xbf16>
    %242 = vector.shape_cast %241 : vector<1x3x16xbf16> to vector<3x16xbf16>
    %cst_220 = arith.constant dense<0.000000e+00> : vector<3x128xf32>
    %243 = tpu.matmul %242, %183, %cst_220 {dimension_numbers = #tpu.dot_dimension_numbers<[1], [0], [0], [1], [0, 0, 1, 1], [], []>} : vector<3x16xbf16>, vector<16x128xbf16>, vector<3x128xf32> -> vector<3x128xf32>
    %244 = arith.truncf %243 : vector<3x128xf32> to vector<3x128xbf16>
    %c7_221 = arith.constant 7 : index
    %c0_222 = arith.constant 0 : index
    %c0_223 = arith.constant 0 : index
    %245 = vector.load %arg13[%c7_221, %c0_222, %c0_223] : memref<9x128x512xbf16, #tpu.memory_space<vmem>>, vector<1x128x512xbf16>
    %246 = vector.shape_cast %245 : vector<1x128x512xbf16> to vector<128x512xbf16>
    %cst_224 = arith.constant dense<0.000000e+00> : vector<3x512xf32>
    %247 = tpu.matmul %244, %246, %cst_224 {dimension_numbers = #tpu.dot_dimension_numbers<[1], [0], [0], [1], [0, 0, 1, 1], [], []>} : vector<3x128xbf16>, vector<128x512xbf16>, vector<3x512xf32> -> vector<3x512xf32>
    %248 = arith.addf %240, %247 : vector<3x512xf32>
    %c8_225 = arith.constant 8 : index
    %c0_226 = arith.constant 0 : index
    %c0_227 = arith.constant 0 : index
    %249 = vector.load %arg14[%c8_225, %c0_226, %c0_227] : memref<9x3x16xbf16, #tpu.memory_space<vmem>>, vector<1x3x16xbf16>
    %250 = vector.shape_cast %249 : vector<1x3x16xbf16> to vector<3x16xbf16>
    %cst_228 = arith.constant dense<0.000000e+00> : vector<3x128xf32>
    %251 = tpu.matmul %250, %183, %cst_228 {dimension_numbers = #tpu.dot_dimension_numbers<[1], [0], [0], [1], [0, 0, 1, 1], [], []>} : vector<3x16xbf16>, vector<16x128xbf16>, vector<3x128xf32> -> vector<3x128xf32>
    %252 = arith.truncf %251 : vector<3x128xf32> to vector<3x128xbf16>
    %c8_229 = arith.constant 8 : index
    %c0_230 = arith.constant 0 : index
    %c0_231 = arith.constant 0 : index
    %253 = vector.load %arg13[%c8_229, %c0_230, %c0_231] : memref<9x128x512xbf16, #tpu.memory_space<vmem>>, vector<1x128x512xbf16>
    %254 = vector.shape_cast %253 : vector<1x128x512xbf16> to vector<128x512xbf16>
    %cst_232 = arith.constant dense<0.000000e+00> : vector<3x512xf32>
    %255 = tpu.matmul %252, %254, %cst_232 {dimension_numbers = #tpu.dot_dimension_numbers<[1], [0], [0], [1], [0, 0, 1, 1], [], []>} : vector<3x128xbf16>, vector<128x512xbf16>, vector<3x512xf32> -> vector<3x512xf32>
    %256 = arith.addf %248, %255 : vector<3x512xf32>
    %c0_233 = arith.constant 0 : index
    %c0_234 = arith.constant 0 : index
    %257 = vector.load %arg15[%c0_233, %c0_234] : memref<3x1xf32, #tpu.memory_space<vmem>>, vector<3x1xf32>
    %258 = vector.broadcast %257 : vector<3x1xf32> to vector<3x512xf32>
    %259 = arith.addf %256, %258 : vector<3x512xf32>
    %260 = math.tanh %259 : vector<3x512xf32>
    %261 = vector.extract_strided_slice %260 {offsets = [0, 0], sizes = [3, 256], strides = [1, 1]} : vector<3x512xf32> to vector<3x256xf32>
    %c0_235 = arith.constant 0 : index
    %c0_236 = arith.constant 0 : index
    %c0_237 = arith.constant 0 : index
    %262 = vector.load %arg16[%c0_235, %c0_236, %c0_237] : memref<2x3x256xf32, #tpu.memory_space<vmem>>, vector<1x3x256xf32>
    %263 = vector.shape_cast %262 : vector<1x3x256xf32> to vector<3x256xf32>
    %264 = vector.shape_cast %261 : vector<3x256xf32> to vector<1x3x256xf32>
    tpu.vector_store %arg16[%c0_235, %c0_236, %c0_237], %264 {strides = array<i32>} : memref<2x3x256xf32, #tpu.memory_space<vmem>>, vector<1x3x256xf32>,
    %265 = vector.extract_strided_slice %260 {offsets = [0, 256], sizes = [3, 256], strides = [1, 1]} : vector<3x512xf32> to vector<3x256xf32>
    %c1_238 = arith.constant 1 : index
    %c0_239 = arith.constant 0 : index
    %c0_240 = arith.constant 0 : index
    %266 = vector.load %arg16[%c1_238, %c0_239, %c0_240] : memref<2x3x256xf32, #tpu.memory_space<vmem>>, vector<1x3x256xf32>
    %267 = vector.shape_cast %266 : vector<1x3x256xf32> to vector<3x256xf32>
    %268 = vector.shape_cast %265 : vector<3x256xf32> to vector<1x3x256xf32>
    tpu.vector_store %arg16[%c1_238, %c0_239, %c0_240], %268 {strides = array<i32>} : memref<2x3x256xf32, #tpu.memory_space<vmem>>, vector<1x3x256xf32>,
    return
  }
  func.func @transform_0(%arg0: i32) -> (i32, i32) {
    %c0_i32 = arith.constant 0 : i32
    %c0_i32_0 = arith.constant 0 : i32
    %c0_i32_1 = arith.constant 0 : i32
    return %c0_i32, %c0_i32_0 : i32, i32
  }
  func.func @transform_1(%arg0: i32) -> (i32, i32) {
    %c0_i32 = arith.constant 0 : i32
    %c0_i32_0 = arith.constant 0 : i32
    %c0_i32_1 = arith.constant 0 : i32
    return %c0_i32, %c0_i32_0 : i32, i32
  }
  func.func @transform_2(%arg0: i32) -> (i32, i32) {
    %c0_i32 = arith.constant 0 : i32
    %c0_i32_0 = arith.constant 0 : i32
    %c0_i32_1 = arith.constant 0 : i32
    return %c0_i32, %c0_i32_0 : i32, i32
  }
  func.func @transform_3(%arg0: i32) -> (i32, i32, i32) {
    %c0_i32 = arith.constant 0 : i32
    %c0_i32_0 = arith.constant 0 : i32
    %c0_i32_1 = arith.constant 0 : i32
    %c0_i32_2 = arith.constant 0 : i32
    return %c0_i32, %c0_i32_0, %c0_i32_1 : i32, i32, i32
  }
  func.func @transform_4(%arg0: i32) -> (i32, i32, i32) {
    %c0_i32 = arith.constant 0 : i32
    %c0_i32_0 = arith.constant 0 : i32
    %c0_i32_1 = arith.constant 0 : i32
    %c0_i32_2 = arith.constant 0 : i32
    return %c0_i32, %c0_i32_0, %c0_i32_1 : i32, i32, i32
  }
  func.func @transform_5(%arg0: i32) -> (i32, i32) {
    %c0_i32 = arith.constant 0 : i32
    %c0_i32_0 = arith.constant 0 : i32
    %c0_i32_1 = arith.constant 0 : i32
    return %c0_i32, %c0_i32_0 : i32, i32
  }
  func.func @transform_6(%arg0: i32) -> (i32, i32) {
    %c0_i32 = arith.constant 0 : i32
    %c0_i32_0 = arith.constant 0 : i32
    %c0_i32_1 = arith.constant 0 : i32
    return %c0_i32, %c0_i32_0 : i32, i32
  }
  func.func @transform_7(%arg0: i32) -> (i32, i32) {
    %c0_i32 = arith.constant 0 : i32
    %c0_i32_0 = arith.constant 0 : i32
    %c0_i32_1 = arith.constant 0 : i32
    return %c0_i32, %c0_i32_0 : i32, i32
  }
  func.func @transform_8(%arg0: i32) -> (i32, i32) {
    %c0_i32 = arith.constant 0 : i32
    %c0_i32_0 = arith.constant 0 : i32
    %c0_i32_1 = arith.constant 0 : i32
    return %c0_i32, %c0_i32_0 : i32, i32
  }
  func.func @transform_9(%arg0: i32) -> (i32, i32, i32) {
    %c0_i32 = arith.constant 0 : i32
    %c0_i32_0 = arith.constant 0 : i32
    %c0_i32_1 = arith.constant 0 : i32
    %c0_i32_2 = arith.constant 0 : i32
    return %c0_i32, %c0_i32_0, %c0_i32_1 : i32, i32, i32
  }
  func.func @transform_10(%arg0: i32) -> (i32, i32, i32) {
    %c0_i32 = arith.constant 0 : i32
    %c0_i32_0 = arith.constant 0 : i32
    %c0_i32_1 = arith.constant 0 : i32
    %c0_i32_2 = arith.constant 0 : i32
    return %c0_i32, %c0_i32_0, %c0_i32_1 : i32, i32, i32
  }
  func.func @transform_11(%arg0: i32) -> (i32, i32) {
    %c0_i32 = arith.constant 0 : i32
    %c0_i32_0 = arith.constant 0 : i32
    %c0_i32_1 = arith.constant 0 : i32
    return %c0_i32, %c0_i32_0 : i32, i32
  }
  func.func @transform_12(%arg0: i32) -> (i32, i32, i32) {
    %c0_i32 = arith.constant 0 : i32
    %c0_i32_0 = arith.constant 0 : i32
    %c0_i32_1 = arith.constant 0 : i32
    %c0_i32_2 = arith.constant 0 : i32
    return %c0_i32, %c0_i32_0, %c0_i32_1 : i32, i32, i32
  }
  func.func @transform_13(%arg0: i32) -> (i32, i32, i32) {
    %c0_i32 = arith.constant 0 : i32
    %c0_i32_0 = arith.constant 0 : i32
    %c0_i32_1 = arith.constant 0 : i32
    %c0_i32_2 = arith.constant 0 : i32
    return %c0_i32, %c0_i32_0, %c0_i32_1 : i32, i32, i32
  }
  func.func @transform_14(%arg0: i32) -> (i32, i32) {
    %c0_i32 = arith.constant 0 : i32
    %c0_i32_0 = arith.constant 0 : i32
    %c0_i32_1 = arith.constant 0 : i32
    return %c0_i32, %c0_i32_0 : i32, i32
  }
  func.func @transform_15(%arg0: i32) -> (i32, i32, i32) {
    %c0_i32 = arith.constant 0 : i32
    %c0_i32_0 = arith.constant 0 : i32
    %c0_i32_1 = arith.constant 0 : i32
    %c0_i32_2 = arith.constant 0 : i32
    return %c0_i32, %c0_i32_0, %c0_i32_1 : i32, i32, i32
  }
}

</mosaic_0001>

<bundles_post_ra>
// kernel: generator_forward.1
= control target key start
LH: loop header
LB: loop body
LE: loop exit
PB: predicated region body
PF: predicated region fallthrough
CT: control target
= control target key end

     0   :  { %v8947_v0 = vmov 0   ;;  %vm137_vm0 = vcmask 523264   ;;  %vm568_vm1 = vcmask 261120   ;;  %s8948_s30 = smov 32   ;;  %vm3262_vm2 = vcmask 130048   ;;  %s11916_s2 = inlined_call_operand.vmem [shape: f32[32,1], index: 2, kind: input, shape index: {}]   ;;  %s11917_s0 = inlined_call_operand.vmem [shape: bf16[64,256], index: 0, kind: input, shape index: {}]   ;;  %s11918_s5 = inlined_call_operand.vmem [shape: f32[64,1], index: 5, kind: input, shape index: {}]   ;;  %s11919_s1 = inlined_call_operand.vmem [shape: bf16[32,64], index: 1, kind: input, shape index: {}]   ;;  %s11920_s8 = inlined_call_operand.vmem [shape: f32[64,1], index: 8, kind: input, shape index: {}]   ;;  %s11921_s3 = inlined_call_operand.vmem [shape: bf16[9,256,64], index: 3, kind: input, shape index: {}]   ;;  %s11922_s4 = inlined_call_operand.vmem [shape: bf16[9,64,32], index: 4, kind: input, shape index: {}]   ;;  %s11923_s6 = inlined_call_operand.vmem [shape: f32[64,32], index: 6, kind: input, shape index: {}]   ;;  %s11924_s7 = inlined_call_operand.vmem [shape: f32[64,32], index: 7, kind: input, shape index: {}]   ;;  %s11925_s11 = inlined_call_operand.vmem [shape: f32[16,1], index: 11, kind: input, shape index: {}]   ;;  %s11926_s14 = inlined_call_operand.vmem [shape: f32[3,1], index: 14, kind: input, shape index: {}]   ;;  %s11927_s9 = inlined_call_operand.vmem [shape: bf16[9,32,128], index: 9, kind: input, shape index: {}]   ;;  %s11928_s10 = inlined_call_operand.vmem [shape: bf16[9,16,32], index: 10, kind: input, shape index: {}]   ;;  %s11929_s12 = inlined_call_operand.vmem [shape: bf16[9,128,512], index: 12, kind: input, shape index: {}]   ;;  %s11930_s13 = inlined_call_operand.vmem [shape: bf16[9,3,16], index: 13, kind: input, shape index: {}]   ;;  %s11931_s15 = inlined_call_operand.vmem [shape: f32[2,3,256], index: 15, kind: output, shape index: {}]  }
   0x1   :  { %8937 = vset.pattern.permute.xlu1 %v8947_v0  ;;  %8936 = vset.pattern.permute.xlu0 %v8947_v0  ;;  %v65_v1 = vld [vmem:[%s11916_s2 + $0x10] sm:$0xff]  ;;  %v63_v2 = vld [vmem:[%s11916_s2] sm:$0xff]  ;;  %v8437_v4 = vld [vmem:[%s11917_s0 + $0x34] sm:$0xf0]  ;;  %vm5681_vm3 = vcmask 1043456  }
   0x2   :  { %v5730_v3 = vld [vmem:[%s11917_s0 + $0x30] sm:$0xf]  ;;  %79 = vperm.xlu1 %8937, %v65_v1   ;;  %69 = vperm.xlu0 %8936, %v63_v2   ;;  %v8436_v5 = vld [vmem:[%s11917_s0 + $0x34] sm:$0xf]  ;;  %v5732_v6 = vld [vmem:[%s11917_s0 + $0x38] sm:$0xf0] }
   0x3   :  { %v5731_v7 = vor.u32 %v8437_v4, %v5730_v3  ;;  %v5735_v8 = vor.u32 %v8436_v5, %v5732_v6  ;;  %v5722_v9 = vld [vmem:[%s11917_s0 + $0x20] sm:$0xf]  ;;  %v8435_v10 = vld [vmem:[%s11917_s0 + $0x24] sm:$0xf0]  ;;  %v8434_v11 = vld [vmem:[%s11917_s0 + $0x24] sm:$0xf]  ;;  %8938 = vset.pattern.permute.xlu2 %v8947_v0 }
   0x4   :  { %v5724_v12 = vld [vmem:[%s11917_s0 + $0x28] sm:$0xf0]  ;;  %v5723_v13 = vor.u32 %v8435_v10, %v5722_v9  ;;  %v5714_v15 = vld [vmem:[%s11917_s0 + $0x10] sm:$0xf]  ;;  %v8433_v16 = vld [vmem:[%s11917_s0 + $0x14] sm:$0xf0] }
   0x5   :  { %148 = vmatpush.bf16.msra.mxu0 %v5731_v7  ;;  %167 = vmatpush.bf16.msra.mxu1 %v5735_v8  ;;  %v5727_v14 = vor.u32 %v8434_v11, %v5724_v12  ;;  %v8432_v17 = vld [vmem:[%s11917_s0 + $0x14] sm:$0xf]  ;;  %v5716_v18 = vld [vmem:[%s11917_s0 + $0x18] sm:$0xf0]  ;;  %v64_v20 = vld [vmem:[%s11916_s2 + $0x8] sm:$0xff]  ;;  %v5715_v21 = vor.u32 %v8433_v16, %v5714_v15 }
   0x6   :  { %v66_v19 = vld [vmem:[%s11916_s2 + $0x18] sm:$0xff]  ;;  %v5719_v22 = vor.u32 %v8432_v17, %v5716_v18  ;;  %v5706_v23 = vld [vmem:[%s11917_s0] sm:$0xf]  ;;  %v8431_v24 = vld [vmem:[%s11917_s0 + $0x4] sm:$0xf0] }
   0x7   :  { %v8430_v25 = vld [vmem:[%s11917_s0 + $0x4] sm:$0xf]  ;;  %v5708_v26 = vld [vmem:[%s11917_s0 + $0x8] sm:$0xf0]  ;;  %v5707_v27 = vor.u32 %v8431_v24, %v5706_v23  ;;  %v2403_v29 = vld [vmem:[%s11918_s5 + $0x18] sm:$0xff] }
   0x8   :  { %v5711_v28 = vor.u32 %v8430_v25, %v5708_v26  ;;  %v2402_v30 = vld [vmem:[%s11918_s5 + $0x10] sm:$0xff]  ;;  %v8428_v31 = vld [vmem:[%s11919_s1] sm:$0xff]  ;;  %v2524_v33 = vld [vmem:[%s11920_s8 + $0x18] sm:$0xff] }
   0x9   :  { %149 = vmatpush.bf16.msra.mxu0 %v5723_v13  ;;  %168 = vmatpush.bf16.msra.mxu1 %v5727_v14  ;;  %v2521_v32 = vld [vmem:[%s11920_s8] sm:$0xff]  ;;  %v2528_v34 = vld [vmem:[%s11920_s8 + $0x38] sm:$0xff]  ;;  %v2527_v35 = vld [vmem:[%s11920_s8 + $0x30] sm:$0xff] }
   0xa   :  { %84 = vperm.xlu1 %8937, %v66_v19   ;;  %74 = vperm.xlu0 %8936, %v64_v20   ;;  %v8429_v36 = vld [vmem:[%s11919_s1 + $0x8] sm:$0xff]  ;;  %v2406_v37 = vld [vmem:[%s11918_s5 + $0x30] sm:$0xff]  ;;  %v2404_v40 = vld [vmem:[%s11918_s5 + $0x20] sm:$0xff]  ;;  %s8949_s1 = smov 96  }
   0xb   :  { %v2526_v38 = vld [vmem:[%s11920_s8 + $0x28] sm:$0xff]  ;;  %v8445_v41 = vld [vmem:[%s11921_s3 + $0x38] sm:$0xff]  ;;  %v8444_v45 = vld [vmem:[%s11921_s3 + $0x30] sm:$0xff] }
   0xc   :  { %v2405_v39 = vld [vmem:[%s11918_s5 + $0x28] sm:$0xff]  ;;  %v8453_v42 = vld [vmem:[%s11921_s3 + $0x78] sm:$0xff]  ;;  %322 = vmatpush.bf16.msra.mxu2 %v8445_v41  ;;  %v8452_v46 = vld [vmem:[%s11921_s3 + $0x70] sm:$0xff] }
   0xd   :  { %150 = vmatpush.bf16.msra.mxu0 %v5715_v21  ;;  %169 = vmatpush.bf16.msra.mxu1 %v5719_v22  ;;  %v8465_v43 = vld [vmem:[%s11921_s3 + $0xb8] sm:$0xff]  ;;  %v8464_v47 = vld [vmem:[%s11921_s3 + $0xb0] sm:$0xff]  ;;  %v8443_v49 = vld [vmem:[%s11921_s3 + $0x28] sm:$0xff] }
   0xe   :  { %v8473_v44 = vld [vmem:[%s11921_s3 + $0xf8] sm:$0xff]  ;;  %341 = vmatpush.bf16.msra.mxu3 %v8453_v42  ;;  %v8472_v48 = vld [vmem:[%s11921_s3 + $0xf0] sm:$0xff]  ;;  %v8451_v50 = vld [vmem:[%s11921_s3 + $0x68] sm:$0xff] }
   0xf   :  { %v8463_v51 = vld [vmem:[%s11921_s3 + $0xa8] sm:$0xff]  ;;  %v8442_v53 = vld [vmem:[%s11921_s3 + $0x20] sm:$0xff]  ;;  %v8441_v57 = vld [vmem:[%s11921_s3 + $0x18] sm:$0xff] }
  0x10   :  { %323 = vmatpush.bf16.msra.mxu2 %v8444_v45  ;;  %v8471_v52 = vld [vmem:[%s11921_s3 + $0xe8] sm:$0xff]  ;;  %v8450_v54 = vld [vmem:[%s11921_s3 + $0x60] sm:$0xff]  ;;  %v8449_v58 = vld [vmem:[%s11921_s3 + $0x58] sm:$0xff] }
  0x11   :  { %151 = vmatpush.bf16.msra.mxu0 %v5707_v27  ;;  %170 = vmatpush.bf16.msra.mxu1 %v5711_v28  ;;  %v8462_v55 = vld [vmem:[%s11921_s3 + $0xa0] sm:$0xff]  ;;  %v8461_v59 = vld [vmem:[%s11921_s3 + $0x98] sm:$0xff]  ;;  %v8440_v61 = vld [vmem:[%s11921_s3 + $0x10] sm:$0xff] }
  0x12   :  { %2425 = vperm.xlu1 %8937, %v2403_v29   ;;  %2420 = vperm.xlu0 %8936, %v2402_v30   ;;  %v8470_v56 = vld [vmem:[%s11921_s3 + $0xe0] sm:$0xff]  ;;  %v8469_v60 = vld [vmem:[%s11921_s3 + $0xd8] sm:$0xff]  ;;  %v8448_v62 = vld [vmem:[%s11921_s3 + $0x50] sm:$0xff] }
  0x13   :  { %342 = vmatpush.bf16.msra.mxu3 %v8452_v46  ;;  %v8460_v63 = vld [vmem:[%s11921_s3 + $0x90] sm:$0xff]  ;;  %v8439_v1 = vld [vmem:[%s11921_s3 + $0x8] sm:$0xff]  ;;  %v8438_v5 = vld [vmem:[%s11921_s3] sm:$0xff] }
  0x14   :  { %5736 = vmatmul.msk.bf16.vlgmr.msra.gmra.mxu0 %vm137_vm0, %v8428_v31  ;;  %5738 = vmatmul.msk.bf16.vlgmr.msra.gmra.mxu1 %vm137_vm0, %v8428_v31  ;;  %v8468_v0 = vld [vmem:[%s11921_s3 + $0xd0] sm:$0xff]  ;;  %v8447_v2 = vld [vmem:[%s11921_s3 + $0x48] sm:$0xff]  ;;  %v8446_v6 = vld [vmem:[%s11921_s3 + $0x40] sm:$0xff] }
  0x15   :  { %499 = vmatpush.bf16.msrb.mxu0 %v8465_v43  ;;  %518 = vmatpush.bf16.msrb.mxu1 %v8473_v44  ;;  %v8459_v3 = vld [vmem:[%s11921_s3 + $0x88] sm:$0xff]  ;;  %v8458_v7 = vld [vmem:[%s11921_s3 + $0x80] sm:$0xff]  ;;  %v8485_v9 = vld [vmem:[%s11921_s3 + $0x138] sm:$0xff] }
  0x16   :  { %324 = vmatpush.bf16.msra.mxu2 %v8443_v49  ;;  %v8467_v4 = vld [vmem:[%s11921_s3 + $0xc8] sm:$0xff]  ;;  %v8466_v8 = vld [vmem:[%s11921_s3 + $0xc0] sm:$0xff]  ;;  %v8493_v10 = vld [vmem:[%s11921_s3 + $0x178] sm:$0xff] }
  0x17   :  { %343 = vmatpush.bf16.msra.mxu3 %v8451_v50  ;;  %v8484_v11 = vld [vmem:[%s11921_s3 + $0x130] sm:$0xff]  ;;  %v8483_v13 = vld [vmem:[%s11921_s3 + $0x128] sm:$0xff]  ;;  %v8482_v15 = vld [vmem:[%s11921_s3 + $0x120] sm:$0xff] }
  0x18   :  { %v8492_v12 = vld [vmem:[%s11921_s3 + $0x170] sm:$0xff]  ;;  %v8491_v14 = vld [vmem:[%s11921_s3 + $0x168] sm:$0xff]  ;;  %v8490_v16 = vld [vmem:[%s11921_s3 + $0x160] sm:$0xff] }
  0x19   :  { %500 = vmatpush.bf16.msrb.mxu0 %v8464_v47  ;;  %519 = vmatpush.bf16.msrb.mxu1 %v8472_v48  ;;  %v8481_v18 = vld [vmem:[%s11921_s3 + $0x118] sm:$0xff]  ;;  %v8480_v22 = vld [vmem:[%s11921_s3 + $0x110] sm:$0xff]  ;;  %v8479_v24 = vld [vmem:[%s11921_s3 + $0x108] sm:$0xff] }
  0x1a   :  { %2531 = vperm.xlu1 %8937, %v2521_v32   ;;  %2546 = vperm.xlu0 %8936, %v2524_v33   ;;  %v8489_v19 = vld [vmem:[%s11921_s3 + $0x158] sm:$0xff]  ;;  %v8488_v23 = vld [vmem:[%s11921_s3 + $0x150] sm:$0xff]  ;;  %v8487_v25 = vld [vmem:[%s11921_s3 + $0x148] sm:$0xff] }
  0x1b   :  { %325 = vmatpush.bf16.msra.mxu2 %v8442_v53  ;;  %344 = vmatpush.bf16.msra.mxu3 %v8450_v54  ;;  %v8478_v33 = vld [vmem:[%s11921_s3 + $0x100] sm:$0xff]  ;;  %v8505_v42 = vld [vmem:[%s11921_s3 + $0x1b8] sm:$0xff]  ;;  %v8504_v45 = vld [vmem:[%s11921_s3 + $0x1b0] sm:$0xff] }
  0x1c   :  { %v8503_v46 = vld [vmem:[%s11921_s3 + $0x1a8] sm:$0xff]  ;;  %v8502_v54 = vld [vmem:[%s11921_s3 + $0x1a0] sm:$0xff] }
  0x1d   :  { %501 = vmatpush.bf16.msrb.mxu0 %v8463_v51  ;;  %520 = vmatpush.bf16.msrb.mxu1 %v8471_v52 }
  0x1f   :  { %326 = vmatpush.bf16.msra.mxu2 %v8441_v57  ;;  %345 = vmatpush.bf16.msra.mxu3 %v8449_v58 }
  0x21   :  { %502 = vmatpush.bf16.msrb.mxu0 %v8462_v55  ;;  %521 = vmatpush.bf16.msrb.mxu1 %v8470_v56 }
  0x22   :  { %2566 = vperm.xlu1 %8937, %v2528_v34   ;;  %2561 = vperm.xlu0 %8936, %v2527_v35   ;;  %v8486_v34 = vld [vmem:[%s11921_s3 + $0x140] sm:$0xff] }
  0x23   :  { %327 = vmatpush.bf16.msra.mxu2 %v8440_v61  ;;  %346 = vmatpush.bf16.msra.mxu3 %v8448_v62  ;;  %v8501_v61 = vld [vmem:[%s11921_s3 + $0x198] sm:$0xff]  ;;  %v8500_v62 = vld [vmem:[%s11921_s3 + $0x190] sm:$0xff] }
  0x24   :  { %5737 = vmatmul.msk.bf16.gmra.mxu0 %vm137_vm0, %v8429_v36  ;;  %5739 = vmatmul.msk.bf16.gmra.mxu1 %vm137_vm0, %v8429_v36 }
  0x25   :  { %503 = vmatpush.bf16.msrb.mxu0 %v8461_v59  ;;  %522 = vmatpush.bf16.msrb.mxu1 %v8469_v60 }
  0x27   :  { %328 = vmatpush.bf16.msra.mxu2 %v8439_v1  ;;  %347 = vmatpush.bf16.msra.mxu3 %v8447_v2  ;;  %v8525_v1 = vld [vmem:[%s11921_s3 + $0x238] sm:$0xff]  ;;  %v8524_v2 = vld [vmem:[%s11921_s3 + $0x230] sm:$0xff] }
  0x29   :  { %504 = vmatpush.bf16.msrb.mxu0 %v8460_v63  ;;  %523 = vmatpush.bf16.msrb.mxu1 %v8468_v0  ;;  %v8499_v63 = vld [vmem:[%s11921_s3 + $0x188] sm:$0xff]  ;;  %v8498_v0 = vld [vmem:[%s11921_s3 + $0x180] sm:$0xff] }
  0x2a   :  { %2440 = vperm.xlu1 %8937, %v2406_v37   ;;  %2556 = vperm.xlu0 %8936, %v2526_v38  }
  0x2b   :  { %329 = vmatpush.bf16.msra.mxu2 %v8438_v5  ;;  %348 = vmatpush.bf16.msra.mxu3 %v8446_v6  ;;  %v8521_v5 = vld [vmem:[%s11921_s3 + $0x218] sm:$0xff]  ;;  %v8520_v6 = vld [vmem:[%s11921_s3 + $0x210] sm:$0xff] }
  0x2d   :  { %505 = vmatpush.bf16.msrb.mxu0 %v8459_v3  ;;  %524 = vmatpush.bf16.msrb.mxu1 %v8467_v4  ;;  %v8523_v3 = vld [vmem:[%s11921_s3 + $0x228] sm:$0xff]  ;;  %v8522_v4 = vld [vmem:[%s11921_s3 + $0x220] sm:$0xff] }
  0x31   :  { %506 = vmatpush.bf16.msrb.mxu0 %v8458_v7  ;;  %525 = vmatpush.bf16.msrb.mxu1 %v8466_v8  ;;  %v8519_v7 = vld [vmem:[%s11921_s3 + $0x208] sm:$0xff]  ;;  %v8518_v8 = vld [vmem:[%s11921_s3 + $0x200] sm:$0xff] }
  0x32   :  { %2435 = vperm.xlu1 %8937, %v2405_v39   ;;  %2430 = vperm.xlu0 %8936, %v2404_v40  }
  0x35   :  { %800 = vmatpush.bf16.msra.mxu0 %v8485_v9  ;;  %819 = vmatpush.bf16.msra.mxu1 %v8493_v10  ;;  %v8545_v9 = vld [vmem:[%s11921_s3 + $0x2b8] sm:$0xff]  ;;  %v8544_v10 = vld [vmem:[%s11921_s3 + $0x2b0] sm:$0xff] }
  0x39   :  { %801 = vmatpush.bf16.msra.mxu0 %v8484_v11  ;;  %820 = vmatpush.bf16.msra.mxu1 %v8492_v12  ;;  %v8543_v11 = vld [vmem:[%s11921_s3 + $0x2a8] sm:$0xff]  ;;  %v8542_v12 = vld [vmem:[%s11921_s3 + $0x2a0] sm:$0xff] }
  0x3d   :  { %802 = vmatpush.bf16.msra.mxu0 %v8483_v13  ;;  %821 = vmatpush.bf16.msra.mxu1 %v8491_v14  ;;  %v8541_v13 = vld [vmem:[%s11921_s3 + $0x298] sm:$0xff]  ;;  %v8540_v14 = vld [vmem:[%s11921_s3 + $0x290] sm:$0xff] }
  0x41   :  { %803 = vmatpush.bf16.msra.mxu0 %v8482_v15  ;;  %822 = vmatpush.bf16.msra.mxu1 %v8490_v16  ;;  %v8539_v15 = vld [vmem:[%s11921_s3 + $0x288] sm:$0xff]  ;;  %v8538_v16 = vld [vmem:[%s11921_s3 + $0x280] sm:$0xff] }
  0x45   :  { %804 = vmatpush.bf16.msra.mxu0 %v8481_v18  ;;  %823 = vmatpush.bf16.msra.mxu1 %v8489_v19  ;;  %v8564_v18 = vld [vmem:[%s11921_s3 + $0x330] sm:$0xff]  ;;  %v8563_v19 = vld [vmem:[%s11921_s3 + $0x328] sm:$0xff] }
  0x49   :  { %805 = vmatpush.bf16.msra.mxu0 %v8480_v22  ;;  %824 = vmatpush.bf16.msra.mxu1 %v8488_v23  ;;  %v8560_v22 = vld [vmem:[%s11921_s3 + $0x310] sm:$0xff]  ;;  %v8559_v23 = vld [vmem:[%s11921_s3 + $0x308] sm:$0xff] }
  0x4d   :  { %806 = vmatpush.bf16.msra.mxu0 %v8479_v24  ;;  %825 = vmatpush.bf16.msra.mxu1 %v8487_v25  ;;  %v8558_v24 = vld [vmem:[%s11921_s3 + $0x300] sm:$0xff] }
  0x51   :  { %807 = vmatpush.bf16.msra.mxu0 %v8478_v33  ;;  %826 = vmatpush.bf16.msra.mxu1 %v8486_v34  ;;  %v8583_v33 = vld [vmem:[%s11921_s3 + $0x3a8] sm:$0xff] }
  0x74   :  { %v70_v17 = vpop.permute.xlu0 %69  ;;  %v80_v39 = vpop.permute.xlu1 %79 }
  0x7c   :  { %v75_v26 = vpop.permute.xlu0 %74  ;;  %v85_v47 = vpop.permute.xlu1 %84 }
  0x91   :  { %v153_v20 = vpop.f32.mrf.mxu0  ;;  %v172_v21 = vpop.f32.mrf.mxu1 }
  0x92   :  { %v154_v27 = vadd.f32 %v153_v20, %v70_v17  ;;  %v173_v28 = vadd.f32 %v172_v21, %v70_v17  ;;  %v8565_v17 = vld [vmem:[%s11921_s3 + $0x338] sm:$0xff]  ;;  %v8562_v20 = vld [vmem:[%s11921_s3 + $0x320] sm:$0xff] }
  0x93   :  { %v8561_v21 = vld [vmem:[%s11921_s3 + $0x318] sm:$0xff] }
  0x94   :  { %v182_v35 = vmax.f32 %v154_v27, 0.0  ;;  %v183_v36 = vmax.f32 %v173_v28, 0.0  ;;  %v8585_v27 = vld [vmem:[%s11921_s3 + $0x3b8] sm:$0xff] }
  0x99   :  { %v155_v29 = vpop.f32.mrf.mxu0  ;;  %v174_v30 = vpop.f32.mrf.mxu1 }
  0x9a   :  { %v156_v31 = vadd.f32 %v155_v29, %v75_v26  ;;  %v175_v32 = vadd.f32 %v174_v30, %v75_v26  ;;  %v8584_v30 = vld [vmem:[%s11921_s3 + $0x3b0] sm:$0xff] }
  0x9c   :  { %v184_v37 = vmax.f32 %v156_v31, 0.0  ;;  %v185_v38 = vmax.f32 %v175_v32, 0.0 }
  0x9e   :  { %v9274_v40 = vpack.c.bf16 %v184_v37, %v182_v35  ;;  %v9276_v41 = vpack.c.bf16 %v185_v38, %v183_v36  ;;  %v8582_v36 = vld [vmem:[%s11921_s3 + $0x3a0] sm:$0xff] }
  0xa0   :  { %330 = vmatmul.bf16.vlgmr.msra.gmra.mxu2 %v9274_v40  ;;  %349 = vmatmul.bf16.vlgmr.msra.gmra.mxu3 %v9276_v41 }
  0xa1   :  { %507 = vmatmul.bf16.vlgmr.msrb.gmra.mxu0 %v9274_v40  ;;  %526 = vmatmul.bf16.vlgmr.msrb.gmra.mxu1 %v9276_v41  ;;  %v158_v43 = vpop.f32.mrf.mxu0  ;;  %v177_v44 = vpop.f32.mrf.mxu1 }
  0xa2   :  { %1047 = vmatpush.bf16.msrb.mxu1 %v8505_v42  ;;  %v159_v48 = vadd.f32 %v158_v43, %v80_v39  ;;  %v178_v49 = vadd.f32 %v177_v44, %v80_v39  ;;  %v8581_v39 = vld [vmem:[%s11921_s3 + $0x398] sm:$0xff]  ;;  %v8580_v44 = vld [vmem:[%s11921_s3 + $0x390] sm:$0xff] }
  0xa4   :  { %v186_v55 = vmax.f32 %v159_v48, 0.0  ;;  %v187_v56 = vmax.f32 %v178_v49, 0.0  ;;  %v8579_v49 = vld [vmem:[%s11921_s3 + $0x388] sm:$0xff] }
  0xa6   :  { %1048 = vmatpush.bf16.msrb.mxu1 %v8504_v45 }
  0xa9   :  { %v160_v50 = vpop.f32.mrf.mxu0  ;;  %v179_v51 = vpop.f32.mrf.mxu1 }
  0xaa   :  { %v161_v52 = vadd.f32 %v160_v50, %v85_v47  ;;  %v180_v53 = vadd.f32 %v179_v51, %v85_v47  ;;  %1049 = vmatpush.bf16.msrb.mxu1 %v8503_v46 }
  0xac   :  { %v188_v57 = vmax.f32 %v161_v52, 0.0  ;;  %v189_v58 = vmax.f32 %v180_v53, 0.0 }
  0xae   :  { %v9294_v59 = vpack.c.bf16 %v188_v57, %v186_v55  ;;  %v9296_v60 = vpack.c.bf16 %v189_v58, %v187_v56  ;;  %1050 = vmatpush.bf16.msrb.mxu1 %v8502_v54  ;;  %v8578_v57 = vld [vmem:[%s11921_s3 + $0x380] sm:$0xff] }
  0xb0   :  { %335 = vmatmul.bf16.gmra.mxu2 %v9294_v59  ;;  %354 = vmatmul.bf16.gmra.mxu3 %v9296_v60 }
  0xb1   :  { %512 = vmatmul.bf16.gmra.mxu0 %v9294_v59  ;;  %531 = vmatmul.bf16.gmra.mxu1 %v9296_v60 }
  0xb2   :  { %1051 = vmatpush.bf16.msrb.mxu1 %v8501_v61 }
  0xb6   :  { %1052 = vmatpush.bf16.msrb.mxu1 %v8500_v62 }
  0xba   :  { %1053 = vmatpush.bf16.msrb.mxu1 %v8499_v63 }
  0xbe   :  { %1054 = vmatpush.bf16.msrb.mxu1 %v8498_v0 }
  0xc1   :  { %808 = vmatmul.bf16.vlgmr.msra.gmra.mxu0 %v9274_v40  ;;  %827 = vmatmul.bf16.vlgmr.msra.gmra.mxu1 %v9276_v41 }
  0xc2   :  { %1294 = vmatpush.bf16.msra.mxu1 %v8525_v1  ;;  %v8474_v1 = vld [vmem:[%s11922_s4 + $0x20] sm:$0xff] }
  0xc6   :  { %1295 = vmatpush.bf16.msra.mxu1 %v8524_v2 }
  0xca   :  { %1296 = vmatpush.bf16.msra.mxu1 %v8523_v3  ;;  %v8605_v3 = vld [vmem:[%s11921_s3 + $0x438] sm:$0xff] }
  0xce   :  { %1297 = vmatpush.bf16.msra.mxu1 %v8522_v4  ;;  %v8513_v4 = vld [vmem:[%s11921_s3 + $0x1f8] sm:$0xff] }
  0xd1   :  { %813 = vmatmul.bf16.gmra.mxu0 %v9294_v59  ;;  %832 = vmatmul.bf16.gmra.mxu1 %v9296_v60 }
  0xd2   :  { %1298 = vmatpush.bf16.msra.mxu1 %v8521_v5 }
  0xd6   :  { %1299 = vmatpush.bf16.msra.mxu1 %v8520_v6  ;;  %v8454_v6 = vld [vmem:[%s11922_s4] sm:$0xff] }
  0xda   :  { %1300 = vmatpush.bf16.msra.mxu1 %v8519_v7  ;;  %v8604_v7 = vld [vmem:[%s11921_s3 + $0x430] sm:$0xff] }
  0xde   :  { %1301 = vmatpush.bf16.msra.mxu1 %v8518_v8  ;;  %v8512_v8 = vld [vmem:[%s11921_s3 + $0x1f0] sm:$0xff] }
  0xe1   :  { %1055 = vmatmul.bf16.vlgmr.msrb.gmra.mxu1 %v9274_v40 }
  0xe2   :  { %1541 = vmatpush.bf16.msrb.mxu1 %v8545_v9 }
  0xe6   :  { %1542 = vmatpush.bf16.msrb.mxu1 %v8544_v10 }
  0xea   :  { %1543 = vmatpush.bf16.msrb.mxu1 %v8543_v11  ;;  %v8603_v11 = vld [vmem:[%s11921_s3 + $0x428] sm:$0xff] }
  0xee   :  { %1544 = vmatpush.bf16.msrb.mxu1 %v8542_v12  ;;  %v8511_v12 = vld [vmem:[%s11921_s3 + $0x1e8] sm:$0xff] }
  0xf1   :  { %1060 = vmatmul.bf16.gmra.mxu1 %v9294_v59 }
  0xf2   :  { %1545 = vmatpush.bf16.msrb.mxu1 %v8541_v13  ;;  %v8602_v13 = vld [vmem:[%s11921_s3 + $0x420] sm:$0xff] }
  0xf6   :  { %1546 = vmatpush.bf16.msrb.mxu1 %v8540_v14  ;;  %v8510_v14 = vld [vmem:[%s11921_s3 + $0x1e0] sm:$0xff] }
  0xfa   :  { %1547 = vmatpush.bf16.msrb.mxu1 %v8539_v15 }
  0xfe   :  { %1548 = vmatpush.bf16.msrb.mxu1 %v8538_v16 }
 0x101   :  { %1302 = vmatmul.bf16.vlgmr.msra.gmra.mxu1 %v9274_v40 }
 0x102   :  { %1788 = vmatpush.bf16.msra.mxu1 %v8565_v17  ;;  %v8475_v17 = vld [vmem:[%s11922_s4 + $0x28] sm:$0xff] }
 0x106   :  { %1789 = vmatpush.bf16.msra.mxu1 %v8564_v18  ;;  %v8601_v18 = vld [vmem:[%s11921_s3 + $0x418] sm:$0xff] }
 0x10a   :  { %1790 = vmatpush.bf16.msra.mxu1 %v8563_v19  ;;  %v8509_v19 = vld [vmem:[%s11921_s3 + $0x1d8] sm:$0xff] }
 0x10e   :  { %1791 = vmatpush.bf16.msra.mxu1 %v8562_v20  ;;  %v8455_v20 = vld [vmem:[%s11922_s4 + $0x8] sm:$0xff] }
 0x111   :  { %1307 = vmatmul.bf16.gmra.mxu1 %v9294_v59 }
 0x112   :  { %1792 = vmatpush.bf16.msra.mxu1 %v8561_v21  ;;  %v8600_v21 = vld [vmem:[%s11921_s3 + $0x410] sm:$0xff] }
 0x116   :  { %1793 = vmatpush.bf16.msra.mxu1 %v8560_v22  ;;  %v8508_v22 = vld [vmem:[%s11921_s3 + $0x1d0] sm:$0xff] }
 0x11a   :  { %1794 = vmatpush.bf16.msra.mxu1 %v8559_v23 }
 0x11e   :  { %v508_v25 = vpop.f32.mrf.mxu0  ;;  %v527_v26 = vpop.f32.mrf.mxu1  ;;  %1795 = vmatpush.bf16.msra.mxu1 %v8558_v24 }
 0x11f   :  { %v528_v52 = vadd.f32 %v527_v26, %v508_v25 }
 0x121   :  { %1549 = vmatmul.bf16.vlgmr.msrb.gmra.mxu1 %v9274_v40 }
 0x122   :  { %2035 = vmatpush.bf16.msrb.mxu1 %v8585_v27  ;;  %v8599_v27 = vld [vmem:[%s11921_s3 + $0x408] sm:$0xff] }
 0x123   :  { %v331_v28 = vpop.f32.mrf.mxu2  ;;  %v350_v29 = vpop.f32.mrf.mxu3 }
 0x124   :  { %v351_v2 = vadd.f32 %v350_v29, %v331_v28  ;;  %v8507_v28 = vld [vmem:[%s11921_s3 + $0x1c8] sm:$0xff] }
 0x126   :  { %v510_v31 = vpop.f32.mrf.mxu0  ;;  %v529_v32 = vpop.f32.mrf.mxu1  ;;  %2036 = vmatpush.bf16.msrb.mxu1 %v8584_v30 }
 0x127   :  { %v530_v50 = vadd.f32 %v529_v32, %v510_v31  ;;  %v8598_v32 = vld [vmem:[%s11921_s3 + $0x400] sm:$0xff] }
 0x129   :  { %v546_v58 = vpack.c.bf16 %v530_v50, %v528_v52  ;;  %v8526_v50 = vld [vmem:[%s11921_s3 + $0x240] sm:$0xff]  ;;  %v8553_v52 = vld [vmem:[%s11921_s3 + $0x2f8] sm:$0xff] }
 0x12a   :  { %2037 = vmatpush.bf16.msrb.mxu1 %v8583_v33 }
 0x12b   :  { %v333_v34 = vpop.f32.mrf.mxu2  ;;  %v352_v35 = vpop.f32.mrf.mxu3 }
 0x12c   :  { %v353_v61 = vadd.f32 %v352_v35, %v333_v34  ;;  %v8506_v34 = vld [vmem:[%s11921_s3 + $0x1c0] sm:$0xff]  ;;  %v8476_v35 = vld [vmem:[%s11922_s4 + $0x30] sm:$0xff] }
 0x12e   :  { %v513_v37 = vpop.f32.mrf.mxu0  ;;  %v532_v38 = vpop.f32.mrf.mxu1  ;;  %2038 = vmatpush.bf16.msrb.mxu1 %v8582_v36  ;;  %v368_v5 = vpack.c.bf16 %v353_v61, %v351_v2  ;;  %v8494_v36 = vld [vmem:[%s11922_s4 + $0x40] sm:$0xff]  ;;  %v8573_v61 = vld [vmem:[%s11921_s3 + $0x378] sm:$0xff]  ;;  %v8568_v2 = vld [vmem:[%s11921_s3 + $0x350] sm:$0xff] }
 0x12f   :  { %v533_v47 = vadd.f32 %v532_v38, %v513_v37  ;;  %v8533_v37 = vld [vmem:[%s11921_s3 + $0x278] sm:$0xff]  ;;  %v8456_v38 = vld [vmem:[%s11922_s4 + $0x10] sm:$0xff] }
 0x131   :  { %1554 = vmatmul.bf16.gmra.mxu1 %v9294_v59 }
 0x132   :  { %2039 = vmatpush.bf16.msrb.mxu1 %v8581_v39  ;;  %v8532_v39 = vld [vmem:[%s11921_s3 + $0x270] sm:$0xff] }
 0x133   :  { %v336_v42 = vpop.f32.mrf.mxu2  ;;  %v355_v43 = vpop.f32.mrf.mxu3 }
 0x134   :  { %v356_v55 = vadd.f32 %v355_v43, %v336_v42  ;;  %v8531_v42 = vld [vmem:[%s11921_s3 + $0x268] sm:$0xff]  ;;  %v8530_v43 = vld [vmem:[%s11921_s3 + $0x260] sm:$0xff] }
 0x136   :  { %v515_v45 = vpop.f32.mrf.mxu0  ;;  %v534_v46 = vpop.f32.mrf.mxu1  ;;  %2040 = vmatpush.bf16.msrb.mxu1 %v8580_v44  ;;  %v8477_v44 = vld [vmem:[%s11922_s4 + $0x38] sm:$0xff] }
 0x137   :  { %v535_v48 = vadd.f32 %v534_v46, %v515_v45  ;;  %v8495_v45 = vld [vmem:[%s11922_s4 + $0x48] sm:$0xff]  ;;  %v8529_v46 = vld [vmem:[%s11921_s3 + $0x258] sm:$0xff] }
 0x139   :  { %v547_v51 = vpack.c.bf16 %v535_v48, %v533_v47  ;;  %v8457_v47 = vld [vmem:[%s11922_s4 + $0x18] sm:$0xff]  ;;  %v8528_v48 = vld [vmem:[%s11921_s3 + $0x250] sm:$0xff] }
 0x13a   :  { %2041 = vmatpush.bf16.msrb.mxu1 %v8579_v49  ;;  %v8527_v49 = vld [vmem:[%s11921_s3 + $0x248] sm:$0xff] }
 0x13b   :  { %587 = vmatpush.bf16.msrb.mxu2 %v547_v51  ;;  %v338_v53 = vpop.f32.mrf.mxu2  ;;  %v357_v54 = vpop.f32.mrf.mxu3  ;;  %v8496_v51 = vld [vmem:[%s11922_s4 + $0x50] sm:$0xff] }
 0x13c   :  { %v358_v56 = vadd.f32 %v357_v54, %v338_v53  ;;  %v8552_v53 = vld [vmem:[%s11921_s3 + $0x2f0] sm:$0xff]  ;;  %v8551_v54 = vld [vmem:[%s11921_s3 + $0x2e8] sm:$0xff] }
 0x13e   :  { %v809_v62 = vpop.f32.mrf.mxu0  ;;  %v828_v63 = vpop.f32.mrf.mxu1  ;;  %v369_v0 = vpack.c.bf16 %v358_v56, %v356_v55  ;;  %2042 = vmatpush.bf16.msrb.mxu1 %v8578_v57  ;;  %v8497_v55 = vld [vmem:[%s11922_s4 + $0x58] sm:$0xff]  ;;  %v8548_v57 = vld [vmem:[%s11921_s3 + $0x2d0] sm:$0xff] }
 0x13f   :  { %588 = vmatpush.bf16.msrb.mxu2 %v546_v58  ;;  %v829_v31 = vadd.f32 %v828_v63, %v809_v62  ;;  %v8549_v56 = vld [vmem:[%s11921_s3 + $0x2d8] sm:$0xff]  ;;  %v8547_v58 = vld [vmem:[%s11921_s3 + $0x2c8] sm:$0xff]  ;;  %v8572_v62 = vld [vmem:[%s11921_s3 + $0x370] sm:$0xff] }
 0x140   :  { %648 = vmatpush.bf16.msrb.mxu3 %v369_v0  ;;  %v8571_v63 = vld [vmem:[%s11921_s3 + $0x368] sm:$0xff]  ;;  %v8570_v0 = vld [vmem:[%s11921_s3 + $0x360] sm:$0xff] }
 0x141   :  { %1796 = vmatmul.bf16.vlgmr.msra.gmra.mxu1 %v9274_v40 }
 0x142   :  { %5924 = vmatmul.msk.bf16.vlgmr.msrb.gmra.mxu2 %vm568_vm1, %v8474_v1  ;;  %2282 = vmatpush.bf16.msra.mxu1 %v8605_v3  ;;  %v8569_v1 = vld [vmem:[%s11921_s3 + $0x358] sm:$0xff]  ;;  %v8567_v3 = vld [vmem:[%s11921_s3 + $0x348] sm:$0xff] }
 0x143   :  { %1066 = vmatpush.bf16.msra.mxu2 %v8513_v4  ;;  %v8566_v4 = vld [vmem:[%s11921_s3 + $0x340] sm:$0xff] }
 0x144   :  { %649 = vmatpush.bf16.msrb.mxu3 %v368_v5  ;;  %v8593_v5 = vld [vmem:[%s11921_s3 + $0x3f8] sm:$0xff] }
 0x146   :  { %v811_v9 = vpop.f32.mrf.mxu0  ;;  %v830_v10 = vpop.f32.mrf.mxu1  ;;  %2283 = vmatpush.bf16.msra.mxu1 %v8604_v7  ;;  %v8592_v7 = vld [vmem:[%s11921_s3 + $0x3f0] sm:$0xff] }
 0x147   :  { %5944 = vmatmul.msk.bf16.vlgmr.msrb.gmra.mxu3 %vm568_vm1, %v8454_v6  ;;  %1067 = vmatpush.bf16.msra.mxu2 %v8512_v8  ;;  %v831_v29 = vadd.f32 %v830_v10, %v811_v9  ;;  %v8591_v8 = vld [vmem:[%s11921_s3 + $0x3e8] sm:$0xff] }
 0x149   :  { %v847_v33 = vpack.c.bf16 %v831_v29, %v829_v31  ;;  %v8612_v29 = vld [vmem:[%s11921_s3 + $0x470] sm:$0xff]  ;;  %v8611_v31 = vld [vmem:[%s11921_s3 + $0x468] sm:$0xff] }
 0x14a   :  { %2284 = vmatpush.bf16.msra.mxu1 %v8603_v11 }
 0x14b   :  { %1068 = vmatpush.bf16.msra.mxu2 %v8511_v12  ;;  %v8590_v12 = vld [vmem:[%s11921_s3 + $0x3e0] sm:$0xff] }
 0x14e   :  { %v814_v15 = vpop.f32.mrf.mxu0  ;;  %v833_v16 = vpop.f32.mrf.mxu1  ;;  %2285 = vmatpush.bf16.msra.mxu1 %v8602_v13  ;;  %v8589_v13 = vld [vmem:[%s11921_s3 + $0x3d8] sm:$0xff] }
 0x14f   :  { %1069 = vmatpush.bf16.msra.mxu2 %v8510_v14  ;;  %v834_v25 = vadd.f32 %v833_v16, %v814_v15  ;;  %v8588_v16 = vld [vmem:[%s11921_s3 + $0x3d0] sm:$0xff] }
 0x151   :  { %1801 = vmatmul.bf16.gmra.mxu1 %v9294_v59 }
 0x152   :  { %5925 = vmatmul.msk.bf16.gmra.mxu2 %vm568_vm1, %v8475_v17  ;;  %2286 = vmatpush.bf16.msra.mxu1 %v8601_v18  ;;  %v8587_v18 = vld [vmem:[%s11921_s3 + $0x3c8] sm:$0xff] }
 0x153   :  { %1070 = vmatpush.bf16.msra.mxu2 %v8509_v19 }
 0x156   :  { %v816_v23 = vpop.f32.mrf.mxu0  ;;  %v835_v24 = vpop.f32.mrf.mxu1  ;;  %2287 = vmatpush.bf16.msra.mxu1 %v8600_v21 }
 0x157   :  { %v836_v26 = vadd.f32 %v835_v24, %v816_v23  ;;  %5945 = vmatmul.msk.bf16.gmra.mxu3 %vm568_vm1, %v8455_v20  ;;  %1071 = vmatpush.bf16.msra.mxu2 %v8508_v22  ;;  %v8586_v22 = vld [vmem:[%s11921_s3 + $0x3c0] sm:$0xff] }
 0x159   :  { %v848_v30 = vpack.c.bf16 %v836_v26, %v834_v25  ;;  %v8613_v26 = vld [vmem:[%s11921_s3 + $0x478] sm:$0xff] }
 0x15a   :  { %2288 = vmatpush.bf16.msra.mxu1 %v8599_v27 }
 0x15b   :  { %887 = vmatpush.bf16.msrb.mxu0 %v848_v30  ;;  %1072 = vmatpush.bf16.msra.mxu2 %v8507_v28 }
 0x15e   :  { %2289 = vmatpush.bf16.msra.mxu1 %v8598_v32  ;;  %v9622_v17 = vpop.f32.mrf.mxu1 }
 0x15f   :  { %888 = vmatpush.bf16.msrb.mxu0 %v847_v33  ;;  %1073 = vmatpush.bf16.msra.mxu2 %v8506_v34 }
 0x161   :  { %2043 = vmatmul.bf16.vlgmr.msrb.gmra.mxu1 %v9274_v40 }
 0x162   :  { %5926 = vmatmul.msk.bf16.gmra.mxu2 %vm568_vm1, %v8476_v35  ;;  %6068 = vmatmul.msk.bf16.vlgmr.msrb.gmra.mxu0 %vm568_vm1, %v8494_v36  ;;  %v8610_v36 = vld [vmem:[%s11921_s3 + $0x460] sm:$0xff] }
 0x163   :  { %1313 = vmatpush.bf16.msrb.mxu2 %v8533_v37 }
 0x166   :  { %v1058_v25 = vpop.f32.mrf.mxu1 }
 0x167   :  { %5946 = vmatmul.msk.bf16.gmra.mxu3 %vm568_vm1, %v8456_v38  ;;  %1314 = vmatpush.bf16.msrb.mxu2 %v8532_v39  ;;  %v8609_v39 = vld [vmem:[%s11921_s3 + $0x458] sm:$0xff] }
 0x16b   :  { %1315 = vmatpush.bf16.msrb.mxu2 %v8531_v42 }
 0x16e   :  { %v1061_v33 = vpop.f32.mrf.mxu1 }
 0x16f   :  { %1316 = vmatpush.bf16.msrb.mxu2 %v8530_v43 }
 0x171   :  { %2048 = vmatmul.bf16.gmra.mxu1 %v9294_v59 }
 0x172   :  { %5927 = vmatmul.msk.bf16.gmra.mxu2 %vm568_vm1, %v8477_v44  ;;  %6069 = vmatmul.msk.bf16.gmra.mxu0 %vm568_vm1, %v8495_v45  ;;  %v8608_v45 = vld [vmem:[%s11921_s3 + $0x450] sm:$0xff] }
 0x173   :  { %1317 = vmatpush.bf16.msrb.mxu2 %v8529_v46 }
 0x176   :  { %v1063_v43 = vpop.f32.mrf.mxu1 }
 0x177   :  { %5947 = vmatmul.msk.bf16.gmra.mxu3 %vm568_vm1, %v8457_v47  ;;  %1318 = vmatpush.bf16.msrb.mxu2 %v8528_v48  ;;  %v8607_v47 = vld [vmem:[%s11921_s3 + $0x448] sm:$0xff] }
 0x17b   :  { %1319 = vmatpush.bf16.msrb.mxu2 %v8527_v49 }
 0x17f   :  { %1320 = vmatpush.bf16.msrb.mxu2 %v8526_v50 }
 0x181   :  { %2290 = vmatmul.bf16.vlgmr.msra.gmra.mxu1 %v9274_v40  ;;  %v8550_v40 = vld [vmem:[%s11921_s3 + $0x2e0] sm:$0xff] }
 0x182   :  { %6070 = vmatmul.msk.bf16.gmra.mxu0 %vm568_vm1, %v8496_v51  ;;  %1074 = vmatmul.bf16.vlgmr.msra.gmra.mxu2 %v9276_v41  ;;  %v8606_v51 = vld [vmem:[%s11921_s3 + $0x440] sm:$0xff] }
 0x183   :  { %1560 = vmatpush.bf16.msra.mxu2 %v8553_v52  ;;  %v1303_v52 = vpop.f32.mrf.mxu1 }
 0x187   :  { %1561 = vmatpush.bf16.msra.mxu2 %v8552_v53 }
 0x18b   :  { %1562 = vmatpush.bf16.msra.mxu2 %v8551_v54 }
 0x18f   :  { %1563 = vmatpush.bf16.msra.mxu2 %v8550_v40 }
 0x191   :  { %2295 = vmatmul.bf16.gmra.mxu1 %v9294_v59  ;;  %v8546_v59 = vld [vmem:[%s11921_s3 + $0x2c0] sm:$0xff] }
 0x192   :  { %6071 = vmatmul.msk.bf16.gmra.mxu0 %vm568_vm1, %v8497_v55  ;;  %1079 = vmatmul.bf16.gmra.mxu2 %v9296_v60 }
 0x193   :  { %1564 = vmatpush.bf16.msra.mxu2 %v8549_v56  ;;  %v1305_v56 = vpop.f32.mrf.mxu1 }
 0x197   :  { %1565 = vmatpush.bf16.msra.mxu2 %v8548_v57 }
 0x19b   :  { %1566 = vmatpush.bf16.msra.mxu2 %v8547_v58 }
 0x19f   :  { %1567 = vmatpush.bf16.msra.mxu2 %v8546_v59 }
 0x1a2   :  { %1321 = vmatmul.bf16.vlgmr.msrb.gmra.mxu2 %v9276_v41 }
 0x1a3   :  { %1807 = vmatpush.bf16.msrb.mxu2 %v8573_v61  ;;  %v1308_v61 = vpop.f32.mrf.mxu1 }
 0x1a7   :  { %1808 = vmatpush.bf16.msrb.mxu2 %v8572_v62 }
 0x1ab   :  { %1809 = vmatpush.bf16.msrb.mxu2 %v8571_v63  ;;  %v1310_v63 = vpop.f32.mrf.mxu1 }
 0x1af   :  { %1810 = vmatpush.bf16.msrb.mxu2 %v8570_v0 }
 0x1b2   :  { %1326 = vmatmul.bf16.gmra.mxu2 %v9296_v60 }
 0x1b3   :  { %1811 = vmatpush.bf16.msrb.mxu2 %v8569_v1 }
 0x1b7   :  { %1812 = vmatpush.bf16.msrb.mxu2 %v8568_v2 }
 0x1bb   :  { %1813 = vmatpush.bf16.msrb.mxu2 %v8567_v3 }
 0x1bf   :  { %1814 = vmatpush.bf16.msrb.mxu2 %v8566_v4 }
 0x1c2   :  { %1568 = vmatmul.bf16.vlgmr.msra.gmra.mxu2 %v9276_v41 }
 0x1c3   :  { %2054 = vmatpush.bf16.msra.mxu2 %v8593_v5 }
 0x1c5   :  { %v590_v6 = vpop.f32.mrf.mxu2 }
 0x1c7   :  { %2055 = vmatpush.bf16.msra.mxu2 %v8592_v7 }
 0x1ca   :  { %v651_v9 = vpop.f32.mrf.mxu3 }
 0x1cb   :  { %v652_v10 = vadd.f32 %v651_v9, %v590_v6  ;;  %2056 = vmatpush.bf16.msra.mxu2 %v8591_v8  ;;  %v8514_v8 = vld [vmem:[%s11922_s4 + $0x60] sm:$0xff]  ;;  %v1550_v9 = vpop.f32.mrf.mxu1 }
 0x1cd   :  { %v9608_v11 = vpop.f32.mrf.mxu2 }
 0x1cf   :  { %2057 = vmatpush.bf16.msra.mxu2 %v8590_v12 }
 0x1d2   :  { %1573 = vmatmul.bf16.gmra.mxu2 %v9296_v60  ;;  %v9617_v14 = vpop.f32.mrf.mxu3 }
 0x1d3   :  { %2058 = vmatpush.bf16.msra.mxu2 %v8589_v13  ;;  %v1552_v12 = vpop.f32.mrf.mxu1 }
 0x1d5   :  { %v595_v15 = vpop.f32.mrf.mxu2 }
 0x1d7   :  { %2059 = vmatpush.bf16.msra.mxu2 %v8588_v16 }
 0x1da   :  { %v656_v19 = vpop.f32.mrf.mxu3 }
 0x1db   :  { %v657_v20 = vadd.f32 %v656_v19, %v595_v15  ;;  %2060 = vmatpush.bf16.msra.mxu2 %v8587_v18  ;;  %v8515_v15 = vld [vmem:[%s11922_s4 + $0x68] sm:$0xff] }
 0x1dd   :  { %v9627_v21 = vpop.f32.mrf.mxu2 }
 0x1df   :  { %v890_v23 = vpop.f32.mrf.mxu0  ;;  %2061 = vmatpush.bf16.msra.mxu2 %v8586_v22 }
 0x1e0   :  { %v9632_v24 = vadd.f32 %v890_v23, %v652_v10 }
 0x1e2   :  { %1815 = vmatmul.bf16.vlgmr.msrb.gmra.mxu2 %v9276_v41  ;;  %v9638_v27 = vpop.f32.mrf.mxu3 }
 0x1e3   :  { %2301 = vmatpush.bf16.msrb.mxu2 %v8613_v26 }
 0x1e5   :  { %v600_v28 = vpop.f32.mrf.mxu2 }
 0x1e7   :  { %v9643_v30 = vpop.f32.mrf.mxu0  ;;  %2302 = vmatpush.bf16.msrb.mxu2 %v8612_v29 }
 0x1ea   :  { %v661_v32 = vpop.f32.mrf.mxu3 }
 0x1eb   :  { %v662_v34 = vadd.f32 %v661_v32, %v600_v28  ;;  %2303 = vmatpush.bf16.msrb.mxu2 %v8611_v31  ;;  %v8534_v28 = vld [vmem:[%s11922_s4 + $0x80] sm:$0xff] }
 0x1ed   :  { %v9648_v35 = vpop.f32.mrf.mxu2 }
 0x1ef   :  { %v895_v37 = vpop.f32.mrf.mxu0  ;;  %2304 = vmatpush.bf16.msrb.mxu2 %v8610_v36 }
 0x1f0   :  { %v9653_v38 = vadd.f32 %v895_v37, %v657_v20 }
 0x1f2   :  { %1820 = vmatmul.bf16.gmra.mxu2 %v9296_v60  ;;  %v9659_v42 = vpop.f32.mrf.mxu3 }
 0x1f3   :  { %2305 = vmatpush.bf16.msrb.mxu2 %v8609_v39 }
 0x1f5   :  { %v605_v44 = vpop.f32.mrf.mxu2 }
 0x1f7   :  { %v9664_v46 = vpop.f32.mrf.mxu0  ;;  %2306 = vmatpush.bf16.msrb.mxu2 %v8608_v45 }
 0x1fa   :  { %v666_v48 = vpop.f32.mrf.mxu3 }
 0x1fb   :  { %v667_v49 = vadd.f32 %v666_v48, %v605_v44  ;;  %2307 = vmatpush.bf16.msrb.mxu2 %v8607_v47 }
 0x1fd   :  { %v9669_v50 = vpop.f32.mrf.mxu2 }
 0x1ff   :  { %v900_v53 = vpop.f32.mrf.mxu0  ;;  %2308 = vmatpush.bf16.msrb.mxu2 %v8606_v51 }
 0x200   :  { %v9674_v54 = vadd.f32 %v900_v53, %v662_v34  ;;  %v8535_v34 = vld [vmem:[%s11922_s4 + $0x88] sm:$0xff]  ;;  %v8554_v53 = vld [vmem:[%s11922_s4 + $0xa0] sm:$0xff] }
 0x202   :  { %2062 = vmatmul.bf16.vlgmr.msra.gmra.mxu2 %v9276_v41 }
 0x205   :  { %v1075_v40 = vpop.f32.mrf.mxu2 }
 0x206   :  { %v1076_v5 = vadd.f32 %v1075_v40, %v9622_v17 }
 0x207   :  { %v9677_v55 = vpop.f32.mrf.mxu0 }
 0x20d   :  { %v1077_v57 = vpop.f32.mrf.mxu2 }
 0x20e   :  { %v1078_v3 = vadd.f32 %v1077_v57, %v1058_v25 }
 0x20f   :  { %v905_v58 = vpop.f32.mrf.mxu0 }
 0x210   :  { %v9679_v59 = vadd.f32 %v905_v58, %v667_v49  ;;  %v1094_v6 = vpack.c.bf16 %v1078_v3, %v1076_v5  ;;  %v8537_v58 = vld [vmem:[%s11922_s4 + $0x98] sm:$0xff] }
 0x212   :  { %2067 = vmatmul.bf16.gmra.mxu2 %v9296_v60 }
 0x215   :  { %v1080_v62 = vpop.f32.mrf.mxu2 }
 0x216   :  { %v1081_v1 = vadd.f32 %v1080_v62, %v1061_v33  ;;  %v8517_v33 = vld [vmem:[%s11922_s4 + $0x78] sm:$0xff] }
 0x21d   :  { %v1082_v0 = vpop.f32.mrf.mxu2 }
 0x21e   :  { %v1083_v2 = vadd.f32 %v1082_v0, %v1063_v43 }
 0x220   :  { %v1095_v4 = vpack.c.bf16 %v1083_v2, %v1081_v1 }
 0x222   :  { %1134 = vmatpush.bf16.msra.mxu3 %v1095_v4  ;;  %2309 = vmatmul.bf16.vlgmr.msrb.gmra.mxu2 %v9276_v41  ;;  %v1555_v41 = vpop.f32.mrf.mxu1 }
 0x225   :  { %v1322_v7 = vpop.f32.mrf.mxu2 }
 0x226   :  { %1135 = vmatpush.bf16.msra.mxu3 %v1094_v6  ;;  %v1323_v22 = vadd.f32 %v1322_v7, %v1303_v52  ;;  %v8536_v52 = vld [vmem:[%s11922_s4 + $0x90] sm:$0xff] }
 0x229   :  { %6192 = vmatmul.msk.bf16.vlgmr.msra.gmra.mxu3 %vm568_vm1, %v8514_v8  ;;  %v8556_v8 = vld [vmem:[%s11922_s4 + $0xb0] sm:$0xff] }
 0x22a   :  { %v1557_v25 = vpop.f32.mrf.mxu1 }
 0x22d   :  { %v1324_v10 = vpop.f32.mrf.mxu2 }
 0x22e   :  { %v1325_v19 = vadd.f32 %v1324_v10, %v1305_v56 }
 0x230   :  { %v1341_v23 = vpack.c.bf16 %v1325_v19, %v1323_v22 }
 0x232   :  { %2314 = vmatmul.bf16.gmra.mxu2 %v9296_v60  ;;  %v8516_v60 = vld [vmem:[%s11922_s4 + $0x70] sm:$0xff]  ;;  %v1797_v31 = vpop.f32.mrf.mxu1 }
 0x235   :  { %v1327_v13 = vpop.f32.mrf.mxu2 }
 0x236   :  { %v1328_v17 = vadd.f32 %v1327_v13, %v1308_v61  ;;  %v8555_v61 = vld [vmem:[%s11922_s4 + $0xa8] sm:$0xff] }
 0x239   :  { %6193 = vmatmul.msk.bf16.gmra.mxu3 %vm568_vm1, %v8515_v15 }
 0x23a   :  { %v1799_v36 = vpop.f32.mrf.mxu1 }
 0x23d   :  { %v1329_v16 = vpop.f32.mrf.mxu2 }
 0x23e   :  { %v1330_v18 = vadd.f32 %v1329_v16, %v1310_v63  ;;  %v8575_v16 = vld [vmem:[%s11922_s4 + $0xc8] sm:$0xff] }
 0x240   :  { %v1342_v20 = vpack.c.bf16 %v1330_v18, %v1328_v17 }
 0x242   :  { %1381 = vmatpush.bf16.msra.mxu0 %v1342_v20  ;;  %v1802_v48 = vpop.f32.mrf.mxu1 }
 0x245   :  { %v1569_v26 = vpop.f32.mrf.mxu2 }
 0x246   :  { %1382 = vmatpush.bf16.msra.mxu0 %v1341_v23  ;;  %v1570_v47 = vadd.f32 %v1569_v26, %v1550_v9  ;;  %v8574_v9 = vld [vmem:[%s11922_s4 + $0xc0] sm:$0xff]  ;;  %v9741_v26 = vpop.f32.mrf.mxu3 }
 0x249   :  { %6194 = vmatmul.msk.bf16.gmra.mxu3 %vm568_vm1, %v8516_v60  ;;  %6316 = vmatmul.msk.bf16.vlgmr.msra.gmra.mxu0 %vm568_vm1, %v8534_v28 }
 0x24a   :  { %v1804_v40 = vpop.f32.mrf.mxu1 }
 0x24d   :  { %v1571_v29 = vpop.f32.mrf.mxu2 }
 0x24e   :  { %v1572_v44 = vadd.f32 %v1571_v29, %v1552_v12  ;;  %v8576_v29 = vld [vmem:[%s11922_s4 + $0xd0] sm:$0xff] }
 0x250   :  { %v1588_v49 = vpack.c.bf16 %v1572_v44, %v1570_v47  ;;  %v8577_v47 = vld [vmem:[%s11922_s4 + $0xd8] sm:$0xff] }
 0x252   :  { %v2044_v62 = vpop.f32.mrf.mxu1 }
 0x255   :  { %v1574_v32 = vpop.f32.mrf.mxu2 }
 0x256   :  { %v1575_v39 = vadd.f32 %v1574_v32, %v1555_v41  ;;  %v8557_v41 = vld [vmem:[%s11922_s4 + $0xb8] sm:$0xff]  ;;  %v2400_v32 = vld [vmem:[%s11918_s5] sm:$0xff] }
 0x257   :  { %2410 = vperm.xlu2 %8938, %v2400_v32  }
 0x259   :  { %6195 = vmatmul.msk.bf16.gmra.mxu3 %vm568_vm1, %v8517_v33  ;;  %6317 = vmatmul.msk.bf16.gmra.mxu0 %vm568_vm1, %v8535_v34 }
 0x25a   :  { %v2046_v4 = vpop.f32.mrf.mxu1 }
 0x25d   :  { %v1576_v37 = vpop.f32.mrf.mxu2 }
 0x25e   :  { %v1577_v43 = vadd.f32 %v1576_v37, %v1557_v25 }
 0x260   :  { %v1589_v45 = vpack.c.bf16 %v1577_v43, %v1575_v39  ;;  %v2401_v39 = vld [vmem:[%s11918_s5 + $0x8] sm:$0xff] }
 0x261   :  { %2415 = vperm.xlu2 %8938, %v2401_v39  }
 0x262   :  { %1628 = vmatpush.bf16.msrb.mxu3 %v1589_v45  ;;  %v2049_v10 = vpop.f32.mrf.mxu1 }
 0x265   :  { %v1816_v51 = vpop.f32.mrf.mxu2 }
 0x266   :  { %1629 = vmatpush.bf16.msrb.mxu3 %v1588_v49  ;;  %v1817_v5 = vadd.f32 %v1816_v51, %v1797_v31  ;;  %v8594_v31 = vld [vmem:[%s11922_s4 + $0xe0] sm:$0xff] }
 0x269   :  { %6318 = vmatmul.msk.bf16.gmra.mxu0 %vm568_vm1, %v8536_v52  ;;  %6440 = vmatmul.msk.bf16.vlgmr.msrb.gmra.mxu3 %vm568_vm1, %v8554_v53 }
 0x26a   :  { %v2051_v13 = vpop.f32.mrf.mxu1 }
 0x26d   :  { %v1818_v56 = vpop.f32.mrf.mxu2 }
 0x26e   :  { %v1819_v2 = vadd.f32 %v1818_v56, %v1799_v36  ;;  %v9775_v56 = vpop.f32.mrf.mxu0 }
 0x270   :  { %v1835_v6 = vpack.c.bf16 %v1819_v2, %v1817_v5  ;;  %v8614_v2 = vld [vmem:[%s11922_s4 + $0x100] sm:$0xff] }
 0x272   :  { %v2291_v20 = vpop.f32.mrf.mxu1 }
 0x275   :  { %v1821_v57 = vpop.f32.mrf.mxu2 }
 0x276   :  { %v1822_v0 = vadd.f32 %v1821_v57, %v1802_v48  ;;  %v8595_v48 = vld [vmem:[%s11922_s4 + $0xe8] sm:$0xff] }
 0x279   :  { %6319 = vmatmul.msk.bf16.gmra.mxu0 %vm568_vm1, %v8537_v58  ;;  %6441 = vmatmul.msk.bf16.gmra.mxu3 %vm568_vm1, %v8555_v61 }
 0x27a   :  { %v2293_v33 = vpop.f32.mrf.mxu1 }
 0x27d   :  { %v1823_v63 = vpop.f32.mrf.mxu2 }
 0x27e   :  { %v1824_v1 = vadd.f32 %v1823_v63, %v1804_v40  ;;  %v2522_v40 = vld [vmem:[%s11920_s8 + $0x8] sm:$0xff] }
 0x280   :  { %v1836_v3 = vpack.c.bf16 %v1824_v1, %v1822_v0 }
 0x282   :  { %1875 = vmatpush.bf16.msrb.mxu0 %v1836_v3  ;;  %v2296_v43 = vpop.f32.mrf.mxu1  ;;  %v2525_v3 = vld [vmem:[%s11920_s8 + $0x20] sm:$0xff] }
 0x285   :  { %v2063_v7 = vpop.f32.mrf.mxu2 }
 0x286   :  { %1876 = vmatpush.bf16.msrb.mxu0 %v1835_v6  ;;  %v2064_v25 = vadd.f32 %v2063_v7, %v2044_v62 }
 0x289   :  { %6442 = vmatmul.msk.bf16.gmra.mxu3 %vm568_vm1, %v8556_v8  ;;  %6564 = vmatmul.msk.bf16.vlgmr.msrb.gmra.mxu0 %vm568_vm1, %v8574_v9  ;;  %v2407_v8 = vld [vmem:[%s11918_s5 + $0x38] sm:$0xff] }
 0x28a   :  { %v2298_v51 = vpop.f32.mrf.mxu1 }
 0x28d   :  { %v2065_v12 = vpop.f32.mrf.mxu2 }
 0x28e   :  { %v2066_v22 = vadd.f32 %v2065_v12, %v2046_v4  ;;  %v8597_v12 = vld [vmem:[%s11922_s4 + $0xf8] sm:$0xff] }
 0x290   :  { %v2082_v60 = vpack.c.bf16 %v2066_v22, %v2064_v25 }
 0x295   :  { %v2068_v15 = vpop.f32.mrf.mxu2 }
 0x296   :  { %v2069_v18 = vadd.f32 %v2068_v15, %v2049_v10 }
 0x299   :  { %6443 = vmatmul.msk.bf16.gmra.mxu3 %vm568_vm1, %v8557_v41  ;;  %6565 = vmatmul.msk.bf16.gmra.mxu0 %vm568_vm1, %v8575_v16 }
 0x29d   :  { %v2070_v17 = vpop.f32.mrf.mxu2 }
 0x29e   :  { %v2071_v19 = vadd.f32 %v2070_v17, %v2051_v13  ;;  %v8615_v13 = vld [vmem:[%s11922_s4 + $0x108] sm:$0xff] }
 0x2a0   :  { %v2083_v23 = vpack.c.bf16 %v2071_v19, %v2069_v18  ;;  %v8616_v19 = vld [vmem:[%s11922_s4 + $0x110] sm:$0xff] }
 0x2a2   :  { %2122 = vmatpush.bf16.msra.mxu3 %v2083_v23 }
 0x2a5   :  { %v2310_v28 = vpop.f32.mrf.mxu2 }
 0x2a6   :  { %2123 = vmatpush.bf16.msra.mxu3 %v2082_v60  ;;  %v2311_v63 = vadd.f32 %v2310_v28, %v2291_v20 }
 0x2a9   :  { %6566 = vmatmul.msk.bf16.gmra.mxu0 %vm568_vm1, %v8576_v29  ;;  %6688 = vmatmul.msk.bf16.vlgmr.msra.gmra.mxu3 %vm568_vm1, %v8594_v31 }
 0x2ac   :  { %v1137_v34 = vpop.f32.mrf.mxu3 }
 0x2ad   :  { %v1157_v36 = vadd.f32 %v1137_v34, %v9632_v24  ;;  %v2312_v37 = vpop.f32.mrf.mxu2  ;;  %v2523_v24 = vld [vmem:[%s11920_s8 + $0x10] sm:$0xff] }
 0x2ae   :  { %2541 = vperm.xlu2 %8938, %v2523_v24   ;;  %v2313_v61 = vadd.f32 %v2312_v37, %v2293_v33  ;;  %v2471_v24 = vld [vmem:[%s11923_s6 + $0x38] sm:$0xff] }
 0x2af   :  { %2492 = vmatpush.msrb.mxu1 %v2471_v24 }
 0x2b0   :  { %v2329_v0 = vpack.c.bf16 %v2313_v61, %v2311_v63  ;;  %v2466_v61 = vld [vmem:[%s11923_s6 + $0x10] sm:$0xff]  ;;  %v2464_v63 = vld [vmem:[%s11923_s6] sm:$0xff] }
 0x2b4   :  { %v9758_v44 = vpop.f32.mrf.mxu3 }
 0x2b5   :  { %v2315_v45 = vpop.f32.mrf.mxu2 }
 0x2b6   :  { %v2316_v57 = vadd.f32 %v2315_v45, %v2296_v43  ;;  %2536 = vperm.xlu2 %8938, %v2522_v40   ;;  %v2467_v40 = vld [vmem:[%s11923_s6 + $0x18] sm:$0xff] }
 0x2b9   :  { %6567 = vmatmul.msk.bf16.gmra.mxu0 %vm568_vm1, %v8577_v47  ;;  %6689 = vmatmul.msk.bf16.gmra.mxu3 %vm568_vm1, %v8595_v48 }
 0x2bc   :  { %v1142_v49 = vpop.f32.mrf.mxu3 }
 0x2bd   :  { %v1159_v52 = vadd.f32 %v1142_v49, %v9653_v38  ;;  %v2317_v53 = vpop.f32.mrf.mxu2  ;;  %v8596_v38 = vld [vmem:[%s11922_s4 + $0xf0] sm:$0xff] }
 0x2be   :  { %v2318_v58 = vadd.f32 %v2317_v53, %v2298_v51  ;;  %2551 = vperm.xlu2 %8938, %v2525_v3   ;;  %v2470_v51 = vld [vmem:[%s11923_s6 + $0x30] sm:$0xff]  ;;  %v2468_v53 = vld [vmem:[%s11923_s6 + $0x20] sm:$0xff] }
 0x2bf   :  { %2493 = vmatpush.msrb.mxu1 %v2470_v51 }
 0x2c0   :  { %v2330_v62 = vpack.c.bf16 %v2318_v58, %v2316_v57 }
 0x2c2   :  { %2369 = vmatpush.bf16.msra.mxu0 %v2330_v62  ;;  %v2465_v62 = vld [vmem:[%s11923_s6 + $0x8] sm:$0xff] }
 0x2c4   :  { %v9777_v1 = vpop.f32.mrf.mxu3 }
 0x2c6   :  { %v1384_v4 = vpop.f32.mrf.mxu0  ;;  %2370 = vmatpush.bf16.msra.mxu0 %v2329_v0  ;;  %2445 = vperm.xlu2 %8938, %v2407_v8  }
 0x2c7   :  { %v9788_v5 = vadd.f32 %v1384_v4, %v1157_v36 }
 0x2c9   :  { %6690 = vmatmul.msk.bf16.gmra.mxu3 %vm568_vm1, %v8596_v38  ;;  %6812 = vmatmul.msk.bf16.vlgmr.msra.gmra.mxu0 %vm568_vm1, %v8614_v2 }
 0x2cc   :  { %v1147_v6 = vpop.f32.mrf.mxu3 }
 0x2cd   :  { %v1161_v7 = vadd.f32 %v1147_v6, %v9674_v54 }
 0x2ce   :  { %v9796_v9 = vpop.f32.mrf.mxu0 }
 0x2d4   :  { %v9798_v10 = vpop.f32.mrf.mxu3 }
 0x2d6   :  { %v1389_v15 = vpop.f32.mrf.mxu0 }
 0x2d7   :  { %v9806_v41 = vadd.f32 %v1389_v15, %v1159_v52  ;;  %v2469_v52 = vld [vmem:[%s11923_s6 + $0x28] sm:$0xff] }
 0x2d8   :  { %2494 = vmatpush.msrb.mxu1 %v2469_v52 }
 0x2d9   :  { %6691 = vmatmul.msk.bf16.gmra.mxu3 %vm568_vm1, %v8597_v12  ;;  %6813 = vmatmul.msk.bf16.gmra.mxu0 %vm568_vm1, %v8615_v13 }
 0x2da   :  { %2495 = vmatpush.msrb.mxu1 %v2468_v53 }
 0x2dc   :  { %v1152_v54 = vpop.f32.mrf.mxu3  ;;  %2496 = vmatpush.msrb.mxu1 %v2467_v40  ;;  %v2421_v40 = vpop.permute.xlu0 %2420 }
 0x2dd   :  { %v1163_v16 = vadd.f32 %v1152_v54, %v9679_v59  ;;  %v8617_v59 = vld [vmem:[%s11922_s4 + $0x118] sm:$0xff] }
 0x2de   :  { %v9811_v17 = vpop.f32.mrf.mxu0  ;;  %2497 = vmatpush.msrb.mxu1 %v2466_v61 }
 0x2e0   :  { %2498 = vmatpush.msrb.mxu1 %v2465_v62 }
 0x2e2   :  { %2499 = vmatpush.msrb.mxu1 %v2464_v63 }
 0x2e4   :  { %v9813_v18 = vpop.f32.mrf.mxu3 }
 0x2e6   :  { %v1394_v20 = vpop.f32.mrf.mxu0 }
 0x2e7   :  { %v1408_v22 = vadd.f32 %v1394_v20, %v1161_v7  ;;  %v654_v7 = vadd.f32 %v9617_v14, %v9608_v11 }
 0x2e9   :  { %6814 = vmatmul.msk.bf16.gmra.mxu0 %vm568_vm1, %v8616_v19  ;;  %v911_v12 = vadd.f32 %v9643_v30, %v654_v7 }
 0x2eb   :  { %v1158_v15 = vadd.f32 %v9758_v44, %v911_v12  ;;  %v659_v44 = vadd.f32 %v9638_v27, %v9627_v21  ;;  %v2516_v12 = vld [vmem:[%s11924_s7 + $0x18] sm:$0xff] }
 0x2ec   :  { %v1631_v23 = vpop.f32.mrf.mxu3 }
 0x2ed   :  { %v1651_v8 = vadd.f32 %v1631_v23, %v9788_v5 }
 0x2ee   :  { %v9819_v25 = vpop.f32.mrf.mxu0 }
 0x2f4   :  { %v1633_v60 = vpop.f32.mrf.mxu3 }
 0x2f6   :  { %v1399_v28 = vpop.f32.mrf.mxu0 }
 0x2f7   :  { %v1410_v29 = vadd.f32 %v1399_v28, %v1163_v16  ;;  %v2411_v16 = vpop.permute.xlu2 %2410 }
 0x2f9   :  { %6815 = vmatmul.msk.bf16.gmra.mxu0 %vm568_vm1, %v8617_v59 }
 0x2fc   :  { %v1636_v31 = vpop.f32.mrf.mxu3 }
 0x2fd   :  { %v1653_v23 = vadd.f32 %v1636_v31, %v9806_v41 }
 0x2fe   :  { %v9825_v32 = vpop.f32.mrf.mxu0 }
 0x2ff   :  { %v2416_v5 = vpop.permute.xlu2 %2415 }
 0x304   :  { %v9827_v33 = vpop.f32.mrf.mxu3 }
 0x306   :  { %v1878_v34 = vpop.f32.mrf.mxu0 }
 0x307   :  { %v1898_v13 = vadd.f32 %v1878_v34, %v1651_v8  ;;  %v2515_v8 = vld [vmem:[%s11924_s7 + $0x10] sm:$0xff] }
 0x30c   :  { %v1641_v36 = vpop.f32.mrf.mxu3 }
 0x30d   :  { %v1655_v37 = vadd.f32 %v1641_v36, %v1408_v22  ;;  %v1405_v22 = vadd.f32 %v9796_v9, %v1158_v15  ;;  %v913_v9 = vadd.f32 %v9664_v46, %v659_v44  ;;  %v2518_v15 = vld [vmem:[%s11924_s7 + $0x28] sm:$0xff] }
 0x30e   :  { %v1880_v39 = vpop.f32.mrf.mxu0 }
 0x30f   :  { %v1652_v28 = vadd.f32 %v1633_v60, %v1405_v22 }
 0x311   :  { %v1899_v36 = vadd.f32 %v1880_v39, %v1652_v28  ;;  %v1160_v39 = vadd.f32 %v9777_v1, %v913_v9  ;;  %v2426_v1 = vpop.permute.xlu1 %2425 }
 0x313   :  { %v1407_v52 = vadd.f32 %v9811_v17, %v1160_v39  ;;  %v3244_v39 = vld [vmem:[%s11925_s11] sm:$0xff] }
 0x314   :  { %v9829_v43 = vpop.f32.mrf.mxu3 }
 0x316   :  { %v1883_v45 = vpop.f32.mrf.mxu0 }
 0x31c   :  { %v1646_v47 = vpop.f32.mrf.mxu3 }
 0x31d   :  { %v1657_v48 = vadd.f32 %v1646_v47, %v1410_v29 }
 0x31e   :  { %v1885_v49 = vpop.f32.mrf.mxu0 }
 0x324   :  { %v9859_v38 = vpop.f32.mrf.mxu3 }
 0x326   :  { %v1888_v57 = vpop.f32.mrf.mxu0 }
 0x327   :  { %v9846_v58 = vadd.f32 %v1888_v57, %v1655_v37  ;;  %v1654_v57 = vadd.f32 %v9827_v33, %v1407_v52  ;;  %v2513_v33 = vld [vmem:[%s11924_s7] sm:$0xff] }
 0x329   :  { %v1901_v41 = vadd.f32 %v1885_v49, %v1654_v57  ;;  %v2514_v49 = vld [vmem:[%s11924_s7 + $0x8] sm:$0xff] }
 0x32c   :  { %v2125_v4 = vpop.f32.mrf.mxu3 }
 0x32d   :  { %v2145_v54 = vadd.f32 %v2125_v4, %v1898_v13  ;;  %v2517_v13 = vld [vmem:[%s11924_s7 + $0x20] sm:$0xff] }
 0x32e   :  { %v9857_v0 = vpop.f32.mrf.mxu0 }
 0x334   :  { %v2127_v19 = vpop.f32.mrf.mxu3 }
 0x335   :  { %v2146_v47 = vadd.f32 %v2127_v19, %v1899_v36  ;;  %v2532_v19 = vpop.permute.xlu1 %2531 }
 0x336   :  { %v1893_v2 = vpop.f32.mrf.mxu0 }
 0x337   :  { %v9861_v3 = vadd.f32 %v1893_v2, %v1657_v48  ;;  %v1900_v48 = vadd.f32 %v1883_v45, %v1653_v23 }
 0x33c   :  { %v2130_v30 = vpop.f32.mrf.mxu3 }
 0x33d   :  { %v2147_v24 = vadd.f32 %v2130_v30, %v1900_v48 }
 0x33e   :  { %v9863_v6 = vpop.f32.mrf.mxu0 }
 0x344   :  { %v2132_v27 = vpop.f32.mrf.mxu3 }
 0x345   :  { %v2148_v61 = vadd.f32 %v2132_v27, %v1901_v41 }
 0x346   :  { %v2372_v20 = vpop.f32.mrf.mxu0 }
 0x347   :  { %v2392_v59 = vadd.f32 %v2372_v20, %v2145_v54  ;;  %v2519_v54 = vld [vmem:[%s11924_s7 + $0x30] sm:$0xff] }
 0x349   :  { %v2448_v29 = vadd.f32 %v2411_v16, %v2392_v59  ;;  %v2520_v16 = vld [vmem:[%s11924_s7 + $0x38] sm:$0xff] }
 0x34b   :  { %v2456_v37 = vmax.f32 %v2448_v29, 0.0  ;;  %v2542_v29 = vpop.permute.xlu2 %2541 }
 0x34d   :  { %6816 = vmatmul.msk.f32.vlgmr.msrb.gmra.mxu1 %vm137_vm0, %v2456_v37 }
 0x34e   :  { %v2374_v11 = vpop.f32.mrf.mxu0 }
 0x34f   :  { %v2393_v14 = vadd.f32 %v2374_v11, %v2146_v47  ;;  %v2547_v11 = vpop.permute.xlu0 %2546 }
 0x351   :  { %v2449_v34 = vadd.f32 %v2416_v5, %v2393_v14 }
 0x353   :  { %v2457_v60 = vmax.f32 %v2449_v34, 0.0 }
 0x355   :  { %6817 = vmatmul.msk.f32.gmra.mxu1 %vm137_vm0, %v2457_v60 }
 0x356   :  { %v2377_v51 = vpop.f32.mrf.mxu0 }
 0x357   :  { %v2394_v53 = vadd.f32 %v2377_v51, %v2147_v24  ;;  %v2562_v44 = vpop.permute.xlu0 %2561  ;;  %v2537_v51 = vpop.permute.xlu2 %2536 }
 0x359   :  { %v2450_v21 = vadd.f32 %v2421_v40, %v2394_v53  ;;  %v2567_v53 = vpop.permute.xlu1 %2566 }
 0x35b   :  { %v2458_v31 = vmax.f32 %v2450_v21, 0.0 }
 0x35d   :  { %6818 = vmatmul.msk.f32.gmra.mxu1 %vm137_vm0, %v2458_v31  ;;  %v2135_v31 = vpop.f32.mrf.mxu3 }
 0x35e   :  { %v2379_v46 = vpop.f32.mrf.mxu0 }
 0x35f   :  { %v2395_v45 = vadd.f32 %v2379_v46, %v2148_v61  ;;  %v2557_v34 = vpop.permute.xlu0 %2556  ;;  %v2552_v27 = vpop.permute.xlu2 %2551 }
 0x361   :  { %v2451_v62 = vadd.f32 %v2426_v1, %v2395_v45 }
 0x363   :  { %v2459_v63 = vmax.f32 %v2451_v62, 0.0  ;;  %v669_v62 = vadd.f32 %v9741_v26, %v9669_v50 }
 0x365   :  { %6819 = vmatmul.msk.f32.gmra.mxu1 %vm137_vm0, %v2459_v63  ;;  %v2137_v46 = vpop.f32.mrf.mxu3 }
 0x366   :  { %v2382_v61 = vpop.f32.mrf.mxu0 }
 0x36d   :  { %v2140_v1 = vpop.f32.mrf.mxu3 }
 0x36e   :  { %v2384_v45 = vpop.f32.mrf.mxu0 }
 0x376   :  { %v2387_v63 = vpop.f32.mrf.mxu0 }
 0x3ca   :  { %v2501_v2 = vpop.f32.mrf.mxu1 }
 0x3d2   :  { %v2504_v17 = vpop.f32.mrf.mxu1 }
 0x3da   :  { %v2507_v4 = vpop.f32.mrf.mxu1 }
 0x3e2   :  { %v2510_v7 = vpop.f32.mrf.mxu1 }
 0x3e3   :  { %2605 = vmatpush.msra.mxu2 %v2510_v7 }
 0x3e5   :  { %2606 = vmatpush.msra.mxu2 %v2507_v4  ;;  %v2431_v4 = vpop.permute.xlu0 %2430 }
 0x3e7   :  { %2607 = vmatpush.msra.mxu2 %v2504_v17 }
 0x3e9   :  { %2608 = vmatpush.msra.mxu2 %v2501_v2  ;;  %v917_v2 = vadd.f32 %v9775_v56, %v669_v62 }
 0x3ea   :  { %6820 = vmatmul.msk.f32.vlgmr.msra.gmra.mxu2 %vm568_vm1, %v2513_v33  ;;  %v2446_v33 = vpop.permute.xlu2 %2445 }
 0x3eb   :  { %v1164_v17 = vadd.f32 %v9813_v18, %v917_v2  ;;  %v2151_v18 = vadd.f32 %v2140_v1, %v9861_v3  ;;  %v8620_v1 = vld [vmem:[%s11927_s9 + $0x8] sm:$0xff] }
 0x3ec   :  { %v8621_v2 = vld [vmem:[%s11928_s10 + $0x8] sm:$0xff] }
 0x3ed   :  { %v1411_v7 = vadd.f32 %v9825_v32, %v1164_v17  ;;  %v8622_v17 = vld [vmem:[%s11927_s9 + $0x10] sm:$0xff] }
 0x3f2   :  { %6821 = vmatmul.msk.f32.gmra.mxu2 %vm568_vm1, %v2514_v49  ;;  %v1658_v49 = vadd.f32 %v9859_v38, %v1411_v7 }
 0x3fa   :  { %6822 = vmatmul.msk.f32.gmra.mxu2 %vm568_vm1, %v2515_v8  ;;  %v2441_v8 = vpop.permute.xlu1 %2440 }
 0x402   :  { %6823 = vmatmul.msk.f32.gmra.mxu2 %vm568_vm1, %v2516_v12  ;;  %v2142_v12 = vpop.f32.mrf.mxu3 }
 0x40a   :  { %6824 = vmatmul.msk.f32.gmra.mxu2 %vm568_vm1, %v2517_v13  ;;  %v1905_v13 = vadd.f32 %v9863_v6, %v1658_v49 }
 0x40c   :  { %v2152_v50 = vadd.f32 %v2142_v12, %v1905_v13 }
 0x412   :  { %6825 = vmatmul.msk.f32.gmra.mxu2 %vm568_vm1, %v2518_v15  ;;  %v2389_v15 = vpop.f32.mrf.mxu0 }
 0x41a   :  { %6826 = vmatmul.msk.f32.gmra.mxu2 %vm568_vm1, %v2519_v54  ;;  %v664_v54 = vadd.f32 %v9659_v42, %v9648_v35  ;;  %v2149_v42 = vadd.f32 %v2135_v31, %v9846_v58  ;;  %v8626_v31 = vld [vmem:[%s11927_s9 + $0x28] sm:$0xff] }
 0x41b   :  { %2862 = vmatpush.bf16.msrb.mxu0 %v8626_v31 }
 0x41c   :  { %v915_v56 = vadd.f32 %v9677_v55, %v664_v54  ;;  %v8627_v54 = vld [vmem:[%s11928_s10 + $0x18] sm:$0xff] }
 0x41e   :  { %v1162_v32 = vadd.f32 %v9798_v10, %v915_v56  ;;  %v8633_v56 = vld [vmem:[%s11928_s10 + $0x28] sm:$0xff] }
 0x420   :  { %v1409_v38 = vadd.f32 %v9819_v25, %v1162_v32 }
 0x422   :  { %6827 = vmatmul.msk.f32.gmra.mxu2 %vm568_vm1, %v2520_v16  ;;  %v2399_v16 = vadd.f32 %v2389_v15, %v2152_v50  ;;  %v1656_v6 = vadd.f32 %v9829_v43, %v1409_v38  ;;  %v8624_v15 = vld [vmem:[%s11928_s10 + $0x10] sm:$0xff]  ;;  %v8629_v50 = vld [vmem:[%s11927_s9 + $0x38] sm:$0xff] }
 0x423   :  { %v8639_v38 = vld [vmem:[%s11928_s10 + $0x38] sm:$0xff] }
 0x424   :  { %v1903_v35 = vadd.f32 %v9857_v0, %v1656_v6 }
 0x426   :  { %v2150_v3 = vadd.f32 %v2137_v46, %v1903_v35 }
 0x428   :  { %v2397_v10 = vadd.f32 %v2384_v45, %v2150_v3  ;;  %v8623_v45 = vld [vmem:[%s11927_s9 + $0x18] sm:$0xff] }
 0x46d   :  { %v2610_v20 = vpop.f32.mrf.mxu2 }
 0x46e   :  { %v2611_v22 = vadd.f32 %v2610_v20, %v2532_v19  ;;  %v2398_v20 = vadd.f32 %v2387_v63, %v2151_v18  ;;  %v8618_v63 = vld [vmem:[%s11928_s10] sm:$0xff] }
 0x470   :  { %v2634_v59 = vadd.f32 1.0, %v2611_v22  ;;  %v2455_v22 = vadd.f32 %v2446_v33, %v2399_v16 }
 0x472   :  { %2642 = vrot.lane.b32.xlu0 %v2634_v59, %s8948_s30  ;;  %v2436_v59 = vpop.permute.xlu1 %2435  ;;  %v2463_v55 = vmax.f32 %v2455_v22, 0.0 }
 0x475   :  { %v2613_v28 = vpop.f32.mrf.mxu2 }
 0x476   :  { %v2614_v52 = vadd.f32 %v2613_v28, %v2537_v51  ;;  %v2454_v28 = vadd.f32 %v2441_v8, %v2398_v20 }
 0x478   :  { %v2635_v57 = vadd.f32 1.0, %v2614_v52 }
 0x47d   :  { %v2616_v36 = vpop.f32.mrf.mxu2 }
 0x47e   :  { %v2617_v37 = vadd.f32 %v2616_v36, %v2542_v29 }
 0x480   :  { %v2636_v47 = vadd.f32 1.0, %v2617_v37  ;;  %v2396_v37 = vadd.f32 %v2382_v61, %v2149_v42  ;;  %v8625_v61 = vld [vmem:[%s11927_s9 + $0x20] sm:$0xff] }
 0x481   :  { %2863 = vmatpush.bf16.msrb.mxu0 %v8625_v61  ;;  %v8630_v42 = vld [vmem:[%s11928_s10 + $0x20] sm:$0xff] }
 0x482   :  { %2646 = vrot.lane.b32.xlu2 %v2636_v47, %s8948_s30  ;;  %v2462_v47 = vmax.f32 %v2454_v28, 0.0 }
 0x485   :  { %v2619_v14 = vpop.f32.mrf.mxu2 }
 0x486   :  { %v2620_v30 = vadd.f32 %v2619_v14, %v2547_v11 }
 0x488   :  { %v2637_v5 = vadd.f32 1.0, %v2620_v30 }
 0x48a   :  { %2648 = vrot.lane.b32.xlu0 %v2637_v5, %s8948_s30  ;;  %v2452_v5 = vadd.f32 %v2431_v4, %v2396_v37  ;;  %v8619_v4 = vld [vmem:[%s11927_s9] sm:$0xff]  ;;  %v8635_v37 = vld [vmem:[%s11927_s9 + $0x58] sm:$0xff] }
 0x48d   :  { %v2622_v23 = vpop.f32.mrf.mxu2 }
 0x48e   :  { %v2623_v41 = vadd.f32 %v2622_v23, %v2552_v27 }
 0x495   :  { %v2625_v9 = vpop.f32.mrf.mxu2 }
 0x496   :  { %v2626_v48 = vadd.f32 %v2625_v9, %v2557_v34  ;;  %v2453_v34 = vadd.f32 %v2436_v59, %v2397_v10  ;;  %v2460_v9 = vmax.f32 %v2452_v5, 0.0  ;;  %v8641_v5 = vld [vmem:[%s11927_s9 + $0x78] sm:$0xff] }
 0x498   :  { %2664 = vrot.lane.b32.xlu0 %v2626_v48, %s8948_s30  ;;  %v2461_v58 = vmax.f32 %v2453_v34, 0.0 }
 0x49d   :  { %v2628_v60 = vpop.f32.mrf.mxu2 }
 0x49e   :  { %v2629_v24 = vadd.f32 %v2628_v60, %v2562_v44 }
 0x4a0   :  { %2666 = vrot.lane.b32.xlu1 %v2629_v24, %s8948_s30  ;;  %3248 = vperm.xlu0 %8936, %v3244_v39  }
 0x4a5   :  { %v2631_v40 = vpop.f32.mrf.mxu2 }
 0x4a6   :  { %v2632_v21 = vadd.f32 %v2631_v40, %v2567_v53  ;;  %v3245_v40 = vld [vmem:[%s11925_s11 + $0x8] sm:$0xff] }
 0x4a8   :  { %2668 = vrot.lane.b32.xlu2 %v2632_v21, %s8948_s30  ;;  %2644 = vrot.lane.b32.xlu1 %v2635_v57, %s8948_s30 }
 0x4b0   :  { %2662 = vrot.lane.b32.xlu2 %v2623_v41, %s8948_s30  ;;  %v5664_v41 = vld [vmem:[%s11926_s14] sm:$0x7] }
 0x4dc   :  { %v2647_v19 = vpop.permute.xlu2 %2646 }
 0x4dd   :  { %v2656_v14 = vmul.f32 %v2647_v19, %v2462_v47  ;;  %v8634_v47 = vld [vmem:[%s11927_s9 + $0x50] sm:$0xff] }
 0x4e4   :  { %v2643_v26 = vpop.permute.xlu0 %2642 }
 0x4e5   :  { %v2654_v60 = vmul.f32 %v2643_v26, %v2460_v9  ;;  %v8628_v26 = vld [vmem:[%s11927_s9 + $0x30] sm:$0xff] }
 0x4fc   :  { %v2649_v29 = vpop.permute.xlu0 %2648 }
 0x4fd   :  { %v2657_v11 = vmul.f32 %v2649_v29, %v2463_v55  ;;  %v8636_v55 = vld [vmem:[%s11928_s10 + $0x30] sm:$0xff] }
 0x502   :  { %v2669_v36 = vpop.permute.xlu2 %2668 }
 0x503   :  { %v2677_v30 = vadd.f32 %v2669_v36, %v2657_v11  ;;  %v8642_v36 = vld [vmem:[%s11928_s10 + $0x40] sm:$0xff]  ;;  %v8632_v11 = vld [vmem:[%s11927_s9 + $0x48] sm:$0xff] }
 0x505   :  { %v2681_v23 = vmax.f32 %v2677_v30, 0.0  ;;  %v8631_v30 = vld [vmem:[%s11927_s9 + $0x40] sm:$0xff] }
 0x50a   :  { %v2663_v0 = vpop.permute.xlu2 %2662  ;;  %v2665_v52 = vpop.permute.xlu0 %2664 }
 0x50b   :  { %v2674_v24 = vadd.f32 %v2663_v0, %v2654_v60  ;;  %v8637_v0 = vld [vmem:[%s11927_s9 + $0x60] sm:$0xff] }
 0x50d   :  { %v2678_v57 = vmax.f32 %v2674_v24, 0.0  ;;  %v8644_v24 = vld [vmem:[%s11927_s9 + $0x88] sm:$0xff] }
 0x512   :  { %v2667_v25 = vpop.permute.xlu1 %2666 }
 0x513   :  { %v2676_v44 = vadd.f32 %v2667_v25, %v2656_v14 }
 0x515   :  { %v2680_v43 = vmax.f32 %v2676_v44, 0.0  ;;  %v8640_v44 = vld [vmem:[%s11927_s9 + $0x70] sm:$0xff] }
 0x517   :  { %v2683_v48 = vpack.c.bf16 %v2681_v23, %v2680_v43  ;;  %v8638_v43 = vld [vmem:[%s11927_s9 + $0x68] sm:$0xff] }
 0x519   :  { %2695 = vrot.lane.b32.xlu1 %v2683_v48, %s8949_s1 }
 0x51a   :  { %v2645_v39 = vpop.permute.xlu1 %2644 }
 0x51b   :  { %v2655_v51 = vmul.f32 %v2645_v39, %v2461_v58 }
 0x51d   :  { %v2675_v53 = vadd.f32 %v2665_v52, %v2655_v51  ;;  %v8643_v52 = vld [vmem:[%s11927_s9 + $0x80] sm:$0xff] }
 0x51f   :  { %v2679_v21 = vmax.f32 %v2675_v53, 0.0 }
 0x521   :  { %3253 = vperm.xlu1 %8937, %v3245_v40   ;;  %v2682_v27 = vpack.c.bf16 %v2679_v21, %v2678_v57 }
 0x523   :  { %2693 = vrot.lane.b32.xlu2 %v2682_v27, %s8949_s1 }
 0x52b   :  { %5667 = vperm.xlu2 %8938, %v5664_v41  }
 0x57d   :  { %v2694_v62 = vpop.permute.xlu2 %2693 }
 0x58b   :  { %v9953_v46 = vpop.permute.xlu1 %2695 }
 0x58c   :  { %2708 = vmatpush.bf16.msrb.mxu3 %v9953_v46  ;;  %2738 = vmatpush.bf16.msra.mxu1 %v9953_v46 }
 0x58d   :  { %2951 = vmatpush.bf16.msra.mxu0 %v9953_v46  ;;  %3013 = vmatpush.bf16.msrb.mxu2 %v9953_v46 }
 0x590   :  { %2709 = vmatpush.bf16.msrb.mxu3 %v2694_v62  ;;  %2739 = vmatpush.bf16.msra.mxu1 %v2694_v62 }
 0x591   :  { %2952 = vmatpush.bf16.msra.mxu0 %v2694_v62  ;;  %3014 = vmatpush.bf16.msrb.mxu2 %v2694_v62 }
 0x593   :  { %6832 = vmatmul.msk.bf16.vlgmr.msrb.gmra.mxu3 %vm568_vm1, %v8618_v63  ;;  %6839 = vmatmul.msk.bf16.vlgmr.msra.gmra.mxu1 %vm568_vm1, %v8621_v2  ;;  %v7151_v2 = vld [vmem:[%s11929_s12 + $0x1e0] sm:$0xf] }
 0x594   :  { %2773 = vmatpush.bf16.msra.mxu3 %v8623_v45  ;;  %2802 = vmatpush.bf16.msrb.mxu1 %v8620_v1 }
 0x595   :  { %3137 = vmatpush.bf16.msra.mxu2 %v9953_v46 }
 0x596   :  { %6928 = vmatmul.msk.bf16.vlgmr.msrb.gmra.mxu2 %vm568_vm1, %v8633_v56 }
 0x598   :  { %2774 = vmatpush.bf16.msra.mxu3 %v8622_v17  ;;  %2803 = vmatpush.bf16.msrb.mxu1 %v8619_v4  ;;  %v8707_v17 = vld [vmem:[%s11929_s12 + $0x1ec] sm:$0xf0] }
 0x599   :  { %3138 = vmatpush.bf16.msra.mxu2 %v2694_v62  ;;  %v7152_v4 = vor.u32 %v8707_v17, %v7151_v2  ;;  %v7039_v17 = vld [vmem:[%s11929_s12 + $0x100] sm:$0xf] }
 0x59c   :  { %2827 = vmatpush.bf16.msrb.mxu3 %v9953_v46  ;;  %2889 = vmatpush.bf16.msra.mxu1 %v9953_v46 }
 0x5a0   :  { %2828 = vmatpush.bf16.msrb.mxu3 %v2694_v62  ;;  %2890 = vmatpush.bf16.msra.mxu1 %v2694_v62 }
 0x5a6   :  { %6968 = vmatmul.msk.bf16.vlgmr.msra.gmra.mxu2 %vm568_vm1, %v8639_v38 }
 0x610   :  { %v2741_v7 = vpop.f32.mrf.mxu1 }
 0x616   :  { %v2711_v33 = vpop.f32.mrf.mxu3 }
 0x618   :  { %v2743_v49 = vpop.f32.mrf.mxu1 }
 0x619   :  { %v2746_v8 = vpack.c.bf16 %v2743_v49, %v2741_v7  ;;  %v3016_v3 = vpop.f32.mrf.mxu2  ;;  %v8705_v7 = vld [vmem:[%s11929_s12 + $0x1e4] sm:$0xf]  ;;  %v7135_v49 = vld [vmem:[%s11929_s12 + $0x1c0] sm:$0xf] }
 0x61b   :  { %6852 = vmatmul.msk.bf16.vlgmr.msra.gmra.mxu3 %vm568_vm1, %v2746_v8 }
 0x61c   :  { %2924 = vmatpush.bf16.msra.mxu3 %v8629_v50 }
 0x61e   :  { %v2713_v12 = vpop.f32.mrf.mxu3 }
 0x61f   :  { %v2716_v13 = vpack.c.bf16 %v2713_v12, %v2711_v33  ;;  %v7153_v33 = vld [vmem:[%s11929_s12 + $0x1f0] sm:$0xf0]  ;;  %v8703_v12 = vld [vmem:[%s11929_s12 + $0x1cc] sm:$0xf0] }
 0x620   :  { %2925 = vmatpush.bf16.msra.mxu3 %v8628_v26  ;;  %v7156_v8 = vor.u32 %v8705_v7, %v7153_v33  ;;  %v7136_v26 = vor.u32 %v8703_v12, %v7135_v49  ;;  %v8677_v49 = vld [vmem:[%s11929_s12 + $0x104] sm:$0xf]  ;;  %v7279_v12 = vld [vmem:[%s11929_s12 + $0xe0] sm:$0xf] }
 0x621   :  { %6861 = vmatmul.msk.bf16.vlgmr.msrb.gmra.mxu1 %vm568_vm1, %v2716_v13  ;;  %v3018_v10 = vpop.f32.mrf.mxu2  ;;  %v8701_v13 = vld [vmem:[%s11929_s12 + $0x1c4] sm:$0xf] }
 0x622   :  { %2986 = vmatpush.bf16.msrb.mxu1 %v8632_v11  ;;  %v3021_v14 = vpack.c.bf16 %v3018_v10, %v3016_v3  ;;  %v8693_v3 = vld [vmem:[%s11929_s12 + $0x184] sm:$0xf] }
 0x626   :  { %2987 = vmatpush.bf16.msrb.mxu1 %v8631_v30  ;;  %v7087_v30 = vld [vmem:[%s11929_s12 + $0x160] sm:$0xf] }
 0x629   :  { %v3140_v25 = vpop.f32.mrf.mxu2 }
 0x62b   :  { %6868 = vmatmul.msk.bf16.vlgmr.msrb.gmra.mxu3 %vm568_vm1, %v8624_v15  ;;  %v7137_v15 = vld [vmem:[%s11929_s12 + $0x1d0] sm:$0xf0] }
 0x62c   :  { %3048 = vmatpush.bf16.msrb.mxu3 %v8635_v37  ;;  %v7105_v37 = vld [vmem:[%s11929_s12 + $0x190] sm:$0xf0] }
 0x630   :  { %3049 = vmatpush.bf16.msrb.mxu3 %v8634_v47 }
 0x631   :  { %6888 = vmatmul.msk.bf16.vlgmr.msra.gmra.mxu1 %vm568_vm1, %v8627_v54  ;;  %v3142_v9 = vpop.f32.mrf.mxu2 }
 0x632   :  { %3110 = vmatpush.bf16.msra.mxu1 %v8638_v43  ;;  %v3145_v48 = vpack.c.bf16 %v3142_v9, %v3140_v25  ;;  %v8691_v25 = vld [vmem:[%s11929_s12 + $0x16c] sm:$0xf0] }
 0x633   :  { %v7088_v9 = vor.u32 %v8691_v25, %v7087_v30  ;;  %v7215_v25 = vld [vmem:[%s11929_s12 + $0x60] sm:$0xf] }
 0x636   :  { %3111 = vmatpush.bf16.msra.mxu1 %v8637_v0  ;;  %v7071_v0 = vld [vmem:[%s11929_s12 + $0x140] sm:$0xf] }
 0x69e   :  { %v2805_v18 = vpop.f32.mrf.mxu1  ;;  %v2776_v16 = vpop.f32.mrf.mxu3 }
 0x69f   :  { %v2806_v19 = vadd.f32 %v2805_v18, %v2776_v16  ;;  %v7140_v18 = vor.u32 %v8701_v13, %v7137_v15  ;;  %v7119_v16 = vld [vmem:[%s11929_s12 + $0x1a0] sm:$0xf]  ;;  %v8675_v13 = vld [vmem:[%s11929_s12 + $0xec] sm:$0xf0] }
 0x6a6   :  { %v10002_v32 = vpop.f32.mrf.mxu1  ;;  %v10004_v20 = vpop.f32.mrf.mxu3 }
 0x6a7   :  { %v2808_v54 = vadd.f32 %v10002_v32, %v10004_v20  ;;  %v8697_v32 = vld [vmem:[%s11929_s12 + $0x1a4] sm:$0xf]  ;;  %v7121_v20 = vld [vmem:[%s11929_s12 + $0x1b0] sm:$0xf0] }
 0x6ae   :  { %v2892_v22 = vpop.f32.mrf.mxu1  ;;  %v2830_v59 = vpop.f32.mrf.mxu3 }
 0x6b6   :  { %v2894_v6 = vpop.f32.mrf.mxu1  ;;  %v2832_v28 = vpop.f32.mrf.mxu3 }
 0x6b7   :  { %v2897_v29 = vpack.c.bf16 %v2894_v6, %v2892_v22  ;;  %v2835_v35 = vpack.c.bf16 %v2832_v28, %v2830_v59 }
 0x6b9   :  { %6901 = vmatmul.msk.bf16.vlgmr.msra.gmra.mxu3 %vm568_vm1, %v2897_v29  ;;  %6881 = vmatmul.msk.bf16.vlgmr.msrb.gmra.mxu0 %vm568_vm1, %v2835_v35  ;;  %v7124_v29 = vor.u32 %v8697_v32, %v7121_v20  ;;  %v7103_v35 = vld [vmem:[%s11929_s12 + $0x180] sm:$0xf]  ;;  %v8671_v32 = vld [vmem:[%s11929_s12 + $0xcc] sm:$0xf0]  ;;  %v8669_v20 = vld [vmem:[%s11929_s12 + $0xc4] sm:$0xf] }
 0x6ba   :  { %3075 = vmatpush.bf16.msrb.mxu0 %v9953_v46  ;;  %3172 = vmatpush.bf16.msra.mxu3 %v8641_v5 }
 0x6be   :  { %3076 = vmatpush.bf16.msrb.mxu0 %v2694_v62  ;;  %3173 = vmatpush.bf16.msra.mxu3 %v8640_v44  ;;  %v8689_v44 = vld [vmem:[%s11929_s12 + $0x164] sm:$0xf] }
 0x6c9   :  { %6908 = vmatmul.msk.bf16.vlgmr.msra.gmra.mxu0 %vm568_vm1, %v8630_v42  ;;  %6941 = vmatmul.msk.bf16.vlgmr.msrb.gmra.mxu3 %vm568_vm1, %v3021_v14  ;;  %v8695_v42 = vld [vmem:[%s11929_s12 + $0x18c] sm:$0xf0]  ;;  %v7108_v14 = vor.u32 %v8693_v3, %v7105_v37  ;;  %v7231_v37 = vld [vmem:[%s11929_s12 + $0x80] sm:$0xf] }
 0x6ca   :  { %3199 = vmatpush.bf16.msra.mxu0 %v9953_v46  ;;  %v7104_v11 = vor.u32 %v8695_v42, %v7103_v35  ;;  %v8667_v35 = vld [vmem:[%s11929_s12 + $0xac] sm:$0xf0]  ;;  %v8665_v42 = vld [vmem:[%s11929_s12 + $0xa4] sm:$0xf] }
 0x6ce   :  { %3200 = vmatpush.bf16.msra.mxu0 %v2694_v62 }
 0x6d9   :  { %6948 = vmatmul.msk.bf16.vlgmr.msrb.gmra.mxu0 %vm568_vm1, %v8636_v55  ;;  %6981 = vmatmul.msk.bf16.vlgmr.msra.gmra.mxu3 %vm568_vm1, %v3145_v48 }
 0x6da   :  { %3524 = vmatpush.bf16.msrb.mxu0 %v7152_v4  ;;  %v8679_v4 = vld [vmem:[%s11929_s12 + $0x10c] sm:$0xf0] }
 0x6de   :  { %3525 = vmatpush.bf16.msrb.mxu0 %v7136_v26  ;;  %v7281_v26 = vld [vmem:[%s11929_s12 + $0xf0] sm:$0xf0] }
 0x6e9   :  { %6988 = vmatmul.msk.bf16.vlgmr.msra.gmra.mxu0 %vm568_vm1, %v8642_v36 }
 0x736   :  { %v2865_v23 = vpop.f32.mrf.mxu0 }
 0x737   :  { %v2870_v34 = vadd.f32 %v2865_v23, %v2806_v19  ;;  %v8699_v19 = vld [vmem:[%s11929_s12 + $0x1ac] sm:$0xf0]  ;;  %v7089_v23 = vld [vmem:[%s11929_s12 + $0x170] sm:$0xf0] }
 0x738   :  { %v7120_v6 = vor.u32 %v8699_v19, %v7119_v16  ;;  %v7092_v48 = vor.u32 %v8689_v44, %v7089_v23  ;;  %v7280_v19 = vor.u32 %v8675_v13, %v7279_v12  ;;  %v8657_v44 = vld [vmem:[%s11929_s12 + $0x64] sm:$0xf]  ;;  %v7217_v23 = vld [vmem:[%s11929_s12 + $0x70] sm:$0xf0]  ;;  %v7111_v13 = vld [vmem:[%s11929_s12 + $0x188] sm:$0xf] }
 0x73a   :  { %3526 = vmatpush.bf16.msrb.mxu0 %v7120_v6 }
 0x73c   :  { %v2927_v31 = vpop.f32.mrf.mxu3 }
 0x73d   :  { %v2932_v50 = vadd.f32 %v2927_v31, %v2870_v34 }
 0x73e   :  { %v2867_v60 = vpop.f32.mrf.mxu0  ;;  %3527 = vmatpush.bf16.msrb.mxu0 %v7104_v11  ;;  %v8661_v11 = vld [vmem:[%s11929_s12 + $0x84] sm:$0xf] }
 0x73f   :  { %v2871_v38 = vadd.f32 %v2867_v60, %v2808_v54  ;;  %v8687_v60 = vld [vmem:[%s11929_s12 + $0x14c] sm:$0xf0]  ;;  %v7040_v54 = vor.u32 %v8679_v4, %v7039_v17  ;;  %v7127_v4 = vld [vmem:[%s11929_s12 + $0x1a8] sm:$0xf] }
 0x742   :  { %3528 = vmatpush.bf16.msrb.mxu0 %v7088_v9  ;;  %v7199_v9 = vld [vmem:[%s11929_s12 + $0x40] sm:$0xf] }
 0x744   :  { %v2929_v61 = vpop.f32.mrf.mxu3 }
 0x745   :  { %v2933_v59 = vadd.f32 %v2929_v61, %v2871_v38 }
 0x746   :  { %v2954_v58 = vpop.f32.mrf.mxu0 }
 0x74c   :  { %v3051_v45 = vpop.f32.mrf.mxu3 }
 0x74e   :  { %v2956_v39 = vpop.f32.mrf.mxu0 }
 0x74f   :  { %v2959_v51 = vpack.c.bf16 %v2956_v39, %v2954_v58  ;;  %v8685_v39 = vld [vmem:[%s11929_s12 + $0x144] sm:$0xf] }
 0x751   :  { %6921 = vmatmul.msk.bf16.vlgmr.msrb.gmra.mxu1 %vm568_vm1, %v2959_v51 }
 0x752   :  { %3234 = vmatpush.bf16.msrb.mxu1 %v8644_v24  ;;  %v7073_v24 = vld [vmem:[%s11929_s12 + $0x150] sm:$0xf0] }
 0x754   :  { %v3053_v63 = vpop.f32.mrf.mxu3 }
 0x756   :  { %v3078_v53 = vpop.f32.mrf.mxu0  ;;  %3235 = vmatpush.bf16.msrb.mxu1 %v8643_v52 }
 0x75c   :  { %v3175_v28 = vpop.f32.mrf.mxu3 }
 0x75e   :  { %v3080_v40 = vpop.f32.mrf.mxu0 }
 0x75f   :  { %v3083_v57 = vpack.c.bf16 %v3080_v40, %v3078_v53  ;;  %v7072_v53 = vor.u32 %v8687_v60, %v7071_v0  ;;  %v3249_v40 = vpop.permute.xlu0 %3248  ;;  %v8653_v0 = vld [vmem:[%s11929_s12 + $0x44] sm:$0xf]  ;;  %v7201_v60 = vld [vmem:[%s11929_s12 + $0x50] sm:$0xf0] }
 0x761   :  { %6961 = vmatmul.msk.bf16.vlgmr.msra.gmra.mxu1 %vm568_vm1, %v3083_v57  ;;  %3529 = vmatpush.bf16.msrb.mxu0 %v7072_v53  ;;  %v7185_v53 = vld [vmem:[%s11929_s12 + $0x30] sm:$0xf0] }
 0x762   :  { %3537 = vmatpush.bf16.msra.mxu1 %v7156_v8  ;;  %v7041_v8 = vld [vmem:[%s11929_s12 + $0x110] sm:$0xf0] }
 0x763   :  { %v7044_v16 = vor.u32 %v8677_v49, %v7041_v8  ;;  %v7129_v8 = vld [vmem:[%s11929_s12 + $0x1b8] sm:$0xf0] }
 0x764   :  { %v3177_v51 = vpop.f32.mrf.mxu3 }
 0x766   :  { %v3202_v21 = vpop.f32.mrf.mxu0  ;;  %3538 = vmatpush.bf16.msra.mxu1 %v7140_v18  ;;  %v3261_v18 = vld [vmem:[%s11930_s13] sm:$0x3] }
 0x76a   :  { %3539 = vmatpush.bf16.msra.mxu1 %v7124_v29  ;;  %v7247_v29 = vld [vmem:[%s11929_s12 + $0xa0] sm:$0xf] }
 0x76e   :  { %v3204_v27 = vpop.f32.mrf.mxu0  ;;  %3540 = vmatpush.bf16.msra.mxu1 %v7108_v14 }
 0x76f   :  { %v3207_v41 = vpack.c.bf16 %v3204_v27, %v3202_v21  ;;  %v7076_v21 = vor.u32 %v8685_v39, %v7073_v24  ;;  %v7055_v27 = vld [vmem:[%s11929_s12 + $0x120] sm:$0xf]  ;;  %v7204_v39 = vor.u32 %v8653_v0, %v7201_v60  ;;  %v7271_v60 = vld [vmem:[%s11929_s12 + $0xc8] sm:$0xf] }
 0x770   :  { %v7183_v24 = vld [vmem:[%s11929_s12 + $0x20] sm:$0xf] }
 0x771   :  { %7001 = vmatmul.msk.bf16.vlgmr.msrb.gmra.mxu1 %vm568_vm1, %v3207_v41  ;;  %v8683_v41 = vld [vmem:[%s11929_s12 + $0x12c] sm:$0xf0] }
 0x772   :  { %3541 = vmatpush.bf16.msra.mxu1 %v7092_v48  ;;  %v8655_v48 = vld [vmem:[%s11929_s12 + $0x4c] sm:$0xf0] }
 0x776   :  { %3542 = vmatpush.bf16.msra.mxu1 %v7076_v21  ;;  %v7159_v21 = vld [vmem:[%s11929_s12 + $0x1e8] sm:$0xf] }
 0x7ce   :  { %v2989_v46 = vpop.f32.mrf.mxu1 }
 0x7cf   :  { %v2994_v22 = vadd.f32 %v2989_v46, %v2932_v50  ;;  %v8681_v46 = vld [vmem:[%s11929_s12 + $0x124] sm:$0xf] }
 0x7d0   :  { %v8673_v50 = vld [vmem:[%s11929_s12 + $0xe4] sm:$0xf] }
 0x7d1   :  { %v3056_v55 = vadd.f32 %v3051_v45, %v2994_v22  ;;  %v7057_v45 = vld [vmem:[%s11929_s12 + $0x130] sm:$0xf0]  ;;  %v7284_v38 = vor.u32 %v8673_v50, %v7281_v26  ;;  %v7263_v22 = vld [vmem:[%s11929_s12 + $0xc0] sm:$0xf]  ;;  %v8694_v50 = vld [vmem:[%s11929_s12 + $0x18c] sm:$0xf] }
 0x7d2   :  { %v7060_v2 = vor.u32 %v8681_v46, %v7057_v45  ;;  %v7264_v6 = vor.u32 %v8671_v32, %v7263_v22  ;;  %v7143_v45 = vld [vmem:[%s11929_s12 + $0x1c8] sm:$0xf]  ;;  %v7097_v32 = vld [vmem:[%s11929_s12 + $0x178] sm:$0xf0] }
 0x7d4   :  { %3543 = vmatpush.bf16.msra.mxu1 %v7060_v2  ;;  %v7145_v2 = vld [vmem:[%s11929_s12 + $0x1d8] sm:$0xf0] }
 0x7d6   :  { %v2991_v1 = vpop.f32.mrf.mxu1 }
 0x7d7   :  { %v2995_v36 = vadd.f32 %v2991_v1, %v2933_v59  ;;  %v3254_v1 = vpop.permute.xlu1 %3253  ;;  %v7265_v59 = vld [vmem:[%s11929_s12 + $0xd0] sm:$0xf0] }
 0x7d8   :  { %3544 = vmatpush.bf16.msra.mxu1 %v7044_v16  ;;  %v7095_v16 = vld [vmem:[%s11929_s12 + $0x168] sm:$0xf] }
 0x7d9   :  { %v3057_v5 = vadd.f32 %v3053_v63, %v2995_v36  ;;  %v7056_v63 = vor.u32 %v8683_v41, %v7055_v27  ;;  %v7248_v36 = vor.u32 %v8667_v35, %v7247_v29  ;;  %v8708_v27 = vld [vmem:[%s11929_s12 + $0x1f4] sm:$0xf0]  ;;  %v8706_v41 = vld [vmem:[%s11929_s12 + $0x1ec] sm:$0xf]  ;;  %v7081_v35 = vld [vmem:[%s11929_s12 + $0x158] sm:$0xf0] }
 0x7db   :  { %3530 = vmatpush.bf16.msrb.mxu0 %v7056_v63 }
 0x7dc   :  { %3749 = vmatpush.bf16.msrb.mxu1 %v7284_v38  ;;  %v8690_v38 = vld [vmem:[%s11929_s12 + $0x16c] sm:$0xf] }
 0x7de   :  { %v3113_v62 = vpop.f32.mrf.mxu1 }
 0x7df   :  { %v3118_v47 = vadd.f32 %v3113_v62, %v3056_v55  ;;  %3531 = vmatpush.bf16.msrb.mxu0 %v7040_v54  ;;  %v7249_v55 = vld [vmem:[%s11929_s12 + $0xb0] sm:$0xf0]  ;;  %v8696_v54 = vld [vmem:[%s11929_s12 + $0x194] sm:$0xf0] }
 0x7e0   :  { %v7252_v3 = vor.u32 %v8665_v42, %v7249_v55  ;;  %v7112_v26 = vor.u32 %v8696_v54, %v7111_v13  ;;  %v7063_v55 = vld [vmem:[%s11929_s12 + $0x128] sm:$0xf]  ;;  %v7225_v54 = vld [vmem:[%s11929_s12 + $0x78] sm:$0xf0] }
 0x7e1   :  { %v3180_v43 = vadd.f32 %v3175_v28, %v3118_v47  ;;  %v7268_v28 = vor.u32 %v8669_v20, %v7265_v59  ;;  %v8663_v47 = vld [vmem:[%s11929_s12 + $0x8c] sm:$0xf0]  ;;  %v7100_v20 = vor.u32 %v8690_v38, %v7097_v32  ;;  %v7079_v59 = vld [vmem:[%s11929_s12 + $0x148] sm:$0xf]  ;;  %v8652_v32 = vld [vmem:[%s11929_s12 + $0x34] sm:$0xf0] }
 0x7e2   :  { %v7232_v14 = vor.u32 %v8663_v47, %v7231_v37  ;;  %v7065_v47 = vld [vmem:[%s11929_s12 + $0x138] sm:$0xf0] }
 0x7e3   :  { %3736 = vmatpush.bf16.msra.mxu0 %v7280_v19  ;;  %3750 = vmatpush.bf16.msrb.mxu1 %v7268_v28  ;;  %v8692_v19 = vld [vmem:[%s11929_s12 + $0x174] sm:$0xf0]  ;;  %v8686_v28 = vld [vmem:[%s11929_s12 + $0x14c] sm:$0xf] }
 0x7e4   :  { %v7096_v22 = vor.u32 %v8692_v19, %v7095_v16  ;;  %v7084_v42 = vor.u32 %v8686_v28, %v7081_v35  ;;  %v7209_v19 = vld [vmem:[%s11929_s12 + $0x58] sm:$0xf0]  ;;  %v8648_v35 = vld [vmem:[%s11929_s12 + $0x14] sm:$0xf0] }
 0x7e6   :  { %v3115_v56 = vpop.f32.mrf.mxu1 }
 0x7e7   :  { %v3119_v34 = vadd.f32 %v3115_v56, %v3057_v5  ;;  %v7003_v56 = vld [vmem:[%s11930_s13 + $0x2] sm:$0x3]  ;;  %3737 = vmatpush.bf16.msra.mxu0 %v7264_v6  ;;  %3751 = vmatpush.bf16.msrb.mxu1 %v7252_v3  ;;  %v8659_v5 = vld [vmem:[%s11929_s12 + $0x6c] sm:$0xf0]  ;;  %v8688_v6 = vld [vmem:[%s11929_s12 + $0x154] sm:$0xf0] }
 0x7e8   :  { %v7080_v29 = vor.u32 %v8688_v6, %v7079_v59  ;;  %v8682_v3 = vld [vmem:[%s11929_s12 + $0x12c] sm:$0xf]  ;;  %v7193_v6 = vld [vmem:[%s11929_s12 + $0x38] sm:$0xf0] }
 0x7e9   :  { %v3181_v52 = vadd.f32 %v3177_v51, %v3119_v34  ;;  %v7220_v34 = vor.u32 %v8657_v44, %v7217_v23  ;;  %v8651_v51 = vld [vmem:[%s11929_s12 + $0x2c] sm:$0xf0]  ;;  %v7287_v44 = vld [vmem:[%s11929_s12 + $0xe8] sm:$0xf]  ;;  %v8676_v23 = vld [vmem:[%s11929_s12 + $0xf4] sm:$0xf0] }
 0x7eb   :  { %3738 = vmatpush.bf16.msra.mxu0 %v7248_v36  ;;  %v8684_v36 = vld [vmem:[%s11929_s12 + $0x134] sm:$0xf0] }
 0x7ec   :  { %v7064_v37 = vor.u32 %v8684_v36, %v7063_v55  ;;  %v7177_v36 = vld [vmem:[%s11929_s12 + $0x18] sm:$0xf0] }
 0x7ee   :  { %v3237_v10 = vpop.f32.mrf.mxu1 }
 0x7ef   :  { %v3242_v58 = vadd.f32 %v3237_v10, %v3180_v43  ;;  %v7233_v10 = vld [vmem:[%s11929_s12 + $0x90] sm:$0xf0]  ;;  %3739 = vmatpush.bf16.msra.mxu0 %v7232_v14  ;;  %v7216_v43 = vor.u32 %v8659_v5, %v7215_v25  ;;  %v8680_v14 = vld [vmem:[%s11929_s12 + $0x114] sm:$0xf0]  ;;  %v7049_v5 = vld [vmem:[%s11929_s12 + $0x118] sm:$0xf0] }
 0x7f0   :  { %v7236_v30 = vor.u32 %v8661_v11, %v7233_v10  ;;  %v7068_v11 = vor.u32 %v8682_v3, %v7065_v47  ;;  %v7047_v10 = vld [vmem:[%s11929_s12 + $0x108] sm:$0xf]  ;;  %v8739_v47 = vld [vmem:[%s11929_s12 + $0x2ec] sm:$0xf0] }
 0x7f1   :  { %v3256_v31 = vadd.f32 %v3249_v40, %v3242_v58  ;;  %v7200_v58 = vor.u32 %v8655_v48, %v7199_v9  ;;  %v7184_v40 = vor.u32 %v8651_v51, %v7183_v24  ;;  %v7048_v25 = vor.u32 %v8680_v14, %v7047_v10  ;;  %v8674_v9 = vld [vmem:[%s11929_s12 + $0xec] sm:$0xf]  ;;  %v7289_v48 = vld [vmem:[%s11929_s12 + $0xf8] sm:$0xf0] }
 0x7f2   :  { %3752 = vmatpush.bf16.msrb.mxu1 %v7236_v30  ;;  %v8678_v30 = vld [vmem:[%s11929_s12 + $0x10c] sm:$0xf]  ;;  %v7292_v0 = vor.u32 %v8674_v9, %v7289_v48  ;;  %v7273_v51 = vld [vmem:[%s11929_s12 + $0xd8] sm:$0xf0]  ;;  %v7427_v48 = vld [vmem:[%s11929_s12 + $0x2d0] sm:$0xf0] }
 0x7f3   :  { %v3258_v7 = vmax.f32 %v3256_v31, 0.0  ;;  %3740 = vmatpush.bf16.msra.mxu0 %v7216_v43  ;;  %v7160_v31 = vor.u32 %v8708_v27, %v7159_v21  ;;  %v7052_v43 = vor.u32 %v8678_v30, %v7049_v5  ;;  %v7257_v27 = vld [vmem:[%s11929_s12 + $0xb8] sm:$0xf0]  ;;  %v8735_v5 = vld [vmem:[%s11929_s12 + $0x2cc] sm:$0xf0] }
 0x7f6   :  { %v3239_v57 = vpop.f32.mrf.mxu1  ;;  %3753 = vmatpush.bf16.msrb.mxu1 %v7220_v34  ;;  %v7288_v34 = vor.u32 %v8676_v23, %v7287_v44  ;;  %v8737_v44 = vld [vmem:[%s11929_s12 + $0x2e4] sm:$0xf]  ;;  %v7443_v23 = vld [vmem:[%s11929_s12 + $0x2f0] sm:$0xf0] }
 0x7f7   :  { %v3243_v61 = vadd.f32 %v3239_v57, %v3181_v52  ;;  %v8649_v52 = vld [vmem:[%s11929_s12 + $0x24] sm:$0xf]  ;;  %3741 = vmatpush.bf16.msra.mxu0 %v7200_v58  ;;  %v8672_v58 = vld [vmem:[%s11929_s12 + $0xd4] sm:$0xf0]  ;;  %v7446_v9 = vor.u32 %v8737_v44, %v7443_v23 }
 0x7f8   :  { %v7188_v57 = vor.u32 %v8649_v52, %v7185_v53  ;;  %v7272_v24 = vor.u32 %v8672_v58, %v7271_v60  ;;  %v7255_v53 = vld [vmem:[%s11929_s12 + $0xa8] sm:$0xf]  ;;  %v8731_v60 = vld [vmem:[%s11929_s12 + $0x2ac] sm:$0xf0] }
 0x7f9   :  { %v3257_v62 = vadd.f32 %v3254_v1, %v3243_v61  ;;  %v7161_v61 = vld [vmem:[%s11929_s12 + $0x1f8] sm:$0xf0]  ;;  %v8704_v1 = vld [vmem:[%s11929_s12 + $0x1d4] sm:$0xf0] }
 0x7fa   :  { %3754 = vmatpush.bf16.msrb.mxu1 %v7204_v39  ;;  %v7164_v46 = vor.u32 %v8706_v41, %v7161_v61  ;;  %v7144_v63 = vor.u32 %v8704_v1, %v7143_v45  ;;  %v8670_v39 = vld [vmem:[%s11929_s12 + $0xcc] sm:$0xf]  ;;  %v8664_v61 = vld [vmem:[%s11929_s12 + $0x94] sm:$0xf0]  ;;  %v7241_v1 = vld [vmem:[%s11929_s12 + $0x98] sm:$0xf0] }
 0x7fb   :  { %v3259_v33 = vmax.f32 %v3257_v62, 0.0  ;;  %3742 = vmatpush.bf16.msra.mxu0 %v7184_v40  ;;  %v8702_v62 = vld [vmem:[%s11929_s12 + $0x1cc] sm:$0xf]  ;;  %v7276_v52 = vor.u32 %v8670_v39, %v7273_v51  ;;  %v8668_v40 = vld [vmem:[%s11929_s12 + $0xb4] sm:$0xf0] }
 0x7fc   :  { %v7148_v17 = vor.u32 %v8702_v62, %v7145_v2  ;;  %v7256_v21 = vor.u32 %v8668_v40, %v7255_v53  ;;  %v7167_v62 = vld [vmem:[%s11929_s12] sm:$0xf]  ;;  %v8645_v2 = vld [vmem:[%s11929_s12 + $0x4] sm:$0xf] }
 0x7fd   :  { %v10165_v15 = vpack.c.bf16 %v3259_v33, %v3258_v7  ;;  %v8700_v7 = vld [vmem:[%s11929_s12 + $0x1b4] sm:$0xf0]  ;;  %v8698_v33 = vld [vmem:[%s11929_s12 + $0x1ac] sm:$0xf]  ;;  %v8729_v39 = vld [vmem:[%s11929_s12 + $0x2a4] sm:$0xf] }
 0x7fe   :  { %3755 = vmatpush.bf16.msrb.mxu1 %v7188_v57  ;;  %v7128_v49 = vor.u32 %v8700_v7, %v7127_v4  ;;  %v7132_v12 = vor.u32 %v8698_v33, %v7129_v8  ;;  %v8666_v57 = vld [vmem:[%s11929_s12 + $0xac] sm:$0xf]  ;;  %v7169_v7 = vld [vmem:[%s11929_s12 + $0x10] sm:$0xf0]  ;;  %v8660_v8 = vld [vmem:[%s11929_s12 + $0x74] sm:$0xf0] }
 0x7ff   :  { %3273 = vmatpush.bf16.msrb.mxu2 %v10165_v15  ;;  %3324 = vmatpush.bf16.msrb.mxu3 %v10165_v15  ;;  %v7260_v41 = vor.u32 %v8666_v57, %v7257_v27  ;;  %v7172_v33 = vor.u32 %v8645_v2, %v7169_v7  ;;  %v7393_v40 = vld [vmem:[%s11929_s12 + $0x280] sm:$0xf]  ;;  %v8727_v57 = vld [vmem:[%s11929_s12 + $0x28c] sm:$0xf0]  ;;  %v8725_v27 = vld [vmem:[%s11929_s12 + $0x284] sm:$0xf] }
 0x802   :  { %7004 = vmatmul.msk.bf16.vlgmr.msrb.gmra.mxu3 %vm3262_vm2, %v7003_v56  ;;  %7002 = vmatmul.msk.bf16.vlgmr.msrb.gmra.mxu2 %vm3262_vm2, %v3261_v18  ;;  %v7113_v56 = vld [vmem:[%s11929_s12 + $0x198] sm:$0xf0] }
 0x803   :  { %3550 = vmatpush.bf16.msra.mxu2 %v7160_v31  ;;  %3563 = vmatpush.bf16.msra.mxu3 %v7164_v46  ;;  %v7116_v18 = vor.u32 %v8694_v50, %v7113_v56  ;;  %v7239_v31 = vld [vmem:[%s11929_s12 + $0x88] sm:$0xf]  ;;  %v8662_v46 = vld [vmem:[%s11929_s12 + $0x8c] sm:$0xf]  ;;  %v8656_v56 = vld [vmem:[%s11929_s12 + $0x54] sm:$0xf0] }
 0x804   :  { %v7240_v45 = vor.u32 %v8664_v61, %v7239_v31  ;;  %3756 = vmatpush.bf16.msrb.mxu1 %v7172_v33  ;;  %v7394_v31 = vor.u32 %v8727_v57, %v7393_v40  ;;  %v7377_v61 = vld [vmem:[%s11929_s12 + $0x260] sm:$0xf]  ;;  %v8717_v33 = vld [vmem:[%s11929_s12 + $0x244] sm:$0xf]  ;;  %v7403_v57 = vld [vmem:[%s11929_s12 + $0x298] sm:$0xf0] }
 0x807   :  { %3551 = vmatpush.bf16.msra.mxu2 %v7144_v63  ;;  %3564 = vmatpush.bf16.msra.mxu3 %v7148_v17  ;;  %v8647_v63 = vld [vmem:[%s11929_s12 + $0xc] sm:$0xf0]  ;;  %v7244_v17 = vor.u32 %v8662_v46, %v7241_v1 }
 0x808   :  { %v7168_v4 = vor.u32 %v8647_v63, %v7167_v62  ;;  %v8723_v46 = vld [vmem:[%s11929_s12 + $0x26c] sm:$0xf0]  ;;  %v8721_v62 = vld [vmem:[%s11929_s12 + $0x264] sm:$0xf]  ;;  %v7379_v63 = vld [vmem:[%s11929_s12 + $0x270] sm:$0xf0] }
 0x809   :  { %v7378_v2 = vor.u32 %v8723_v46, %v7377_v61  ;;  %v7382_v7 = vor.u32 %v8721_v62, %v7379_v63  ;;  %v8724_v46 = vld [vmem:[%s11929_s12 + $0x274] sm:$0xf0] }
 0x80a   :  { %3743 = vmatpush.bf16.msra.mxu0 %v7168_v4  ;;  %v8719_v4 = vld [vmem:[%s11929_s12 + $0x24c] sm:$0xf0] }
 0x80b   :  { %3552 = vmatpush.bf16.msra.mxu2 %v7128_v49  ;;  %3565 = vmatpush.bf16.msra.mxu3 %v7132_v12  ;;  %v7223_v49 = vld [vmem:[%s11929_s12 + $0x68] sm:$0xf]  ;;  %v8658_v12 = vld [vmem:[%s11929_s12 + $0x6c] sm:$0xf] }
 0x80c   :  { %v7224_v13 = vor.u32 %v8660_v8, %v7223_v49  ;;  %v7228_v50 = vor.u32 %v8658_v12, %v7225_v54  ;;  %v7363_v49 = vld [vmem:[%s11929_s12 + $0x250] sm:$0xf0]  ;;  %v7345_v12 = vld [vmem:[%s11929_s12 + $0x220] sm:$0xf] }
 0x80d   :  { %v7366_v54 = vor.u32 %v8717_v33, %v7363_v49  ;;  %v8720_v33 = vld [vmem:[%s11929_s12 + $0x254] sm:$0xf0]  ;;  %v8718_v49 = vld [vmem:[%s11929_s12 + $0x24c] sm:$0xf] }
 0x80f   :  { %3553 = vmatpush.bf16.msra.mxu2 %v7112_v26  ;;  %3566 = vmatpush.bf16.msra.mxu3 %v7116_v18  ;;  %v7207_v26 = vld [vmem:[%s11929_s12 + $0x48] sm:$0xf]  ;;  %v8654_v18 = vld [vmem:[%s11929_s12 + $0x4c] sm:$0xf] }
 0x810   :  { %v7208_v16 = vor.u32 %v8656_v56, %v7207_v26  ;;  %v7212_v38 = vor.u32 %v8654_v18, %v7209_v19  ;;  %v7329_v26 = vld [vmem:[%s11929_s12 + $0x200] sm:$0xf]  ;;  %v8711_v56 = vld [vmem:[%s11929_s12 + $0x20c] sm:$0xf0]  ;;  %v8713_v19 = vld [vmem:[%s11929_s12 + $0x224] sm:$0xf] }
 0x811   :  { %v7330_v18 = vor.u32 %v8711_v56, %v7329_v26  ;;  %v7353_v56 = vld [vmem:[%s11929_s12 + $0x228] sm:$0xf] }
 0x813   :  { %3554 = vmatpush.bf16.msra.mxu2 %v7096_v22  ;;  %3567 = vmatpush.bf16.msra.mxu3 %v7100_v20  ;;  %v7191_v22 = vld [vmem:[%s11929_s12 + $0x28] sm:$0xf]  ;;  %v8650_v20 = vld [vmem:[%s11929_s12 + $0x2c] sm:$0xf] }
 0x814   :  { %v7192_v59 = vor.u32 %v8652_v32, %v7191_v22  ;;  %v7196_v28 = vor.u32 %v8650_v20, %v7193_v6  ;;  %v7449_v22 = vld [vmem:[%s11929_s12 + $0x2e8] sm:$0xf]  ;;  %v8740_v20 = vld [vmem:[%s11929_s12 + $0x2f4] sm:$0xf0]  ;;  %v7451_v6 = vld [vmem:[%s11929_s12 + $0x2f8] sm:$0xf0] }
 0x817   :  { %3555 = vmatpush.bf16.msra.mxu2 %v7080_v29  ;;  %3568 = vmatpush.bf16.msra.mxu3 %v7084_v42  ;;  %v7175_v29 = vld [vmem:[%s11929_s12 + $0x8] sm:$0xf]  ;;  %v8646_v42 = vld [vmem:[%s11929_s12 + $0xc] sm:$0xf] }
 0x818   :  { %v7176_v55 = vor.u32 %v8648_v35, %v7175_v29  ;;  %v7180_v3 = vor.u32 %v8646_v42, %v7177_v36  ;;  %v8709_v35 = vld [vmem:[%s11929_s12 + $0x204] sm:$0xf]  ;;  %v7331_v42 = vld [vmem:[%s11929_s12 + $0x210] sm:$0xf0] }
 0x819   :  { %v7334_v36 = vor.u32 %v8709_v35, %v7331_v42 }
 0x81b   :  { %3556 = vmatpush.bf16.msra.mxu2 %v7064_v37  ;;  %3569 = vmatpush.bf16.msra.mxu3 %v7068_v11  ;;  %v7441_v37 = vld [vmem:[%s11929_s12 + $0x2e0] sm:$0xf] }
 0x81c   :  { %v7442_v10 = vor.u32 %v8739_v47, %v7441_v37  ;;  %v7433_v47 = vld [vmem:[%s11929_s12 + $0x2c8] sm:$0xf] }
 0x81f   :  { %3557 = vmatpush.bf16.msra.mxu2 %v7048_v25  ;;  %3570 = vmatpush.bf16.msra.mxu3 %v7052_v43  ;;  %v7425_v25 = vld [vmem:[%s11929_s12 + $0x2c0] sm:$0xf]  ;;  %v8733_v43 = vld [vmem:[%s11929_s12 + $0x2c4] sm:$0xf] }
 0x820   :  { %v7430_v58 = vor.u32 %v8733_v43, %v7427_v48  ;;  %v7417_v43 = vld [vmem:[%s11929_s12 + $0x2a8] sm:$0xf] }
 0x823   :  { %3762 = vmatpush.bf16.msrb.mxu2 %v7288_v34  ;;  %3775 = vmatpush.bf16.msrb.mxu3 %v7292_v0  ;;  %v7426_v34 = vor.u32 %v8735_v5, %v7425_v25  ;;  %v7409_v0 = vld [vmem:[%s11929_s12 + $0x2a0] sm:$0xf]  ;;  %v8767_v5 = vld [vmem:[%s11929_s12 + $0x3cc] sm:$0xf0] }
 0x824   :  { %v7410_v51 = vor.u32 %v8731_v60, %v7409_v0  ;;  %v7587_v25 = vld [vmem:[%s11929_s12 + $0x3c0] sm:$0xf]  ;;  %v7419_v0 = vld [vmem:[%s11929_s12 + $0x2b8] sm:$0xf0] }
 0x825   :  { %v7588_v23 = vor.u32 %v8767_v5, %v7587_v25  ;;  %v7571_v60 = vld [vmem:[%s11929_s12 + $0x3a0] sm:$0xf] }
 0x827   :  { %3763 = vmatpush.bf16.msrb.mxu2 %v7272_v24  ;;  %3776 = vmatpush.bf16.msrb.mxu3 %v7276_v52  ;;  %v7411_v24 = vld [vmem:[%s11929_s12 + $0x2b0] sm:$0xf0] }
 0x82b   :  { %3764 = vmatpush.bf16.msrb.mxu2 %v7256_v21  ;;  %3777 = vmatpush.bf16.msrb.mxu3 %v7260_v41  ;;  %v7414_v21 = vor.u32 %v8729_v39, %v7411_v24  ;;  %v7395_v41 = vld [vmem:[%s11929_s12 + $0x290] sm:$0xf0] }
 0x82f   :  { %3765 = vmatpush.bf16.msrb.mxu2 %v7240_v45  ;;  %3778 = vmatpush.bf16.msrb.mxu3 %v7244_v17  ;;  %v7398_v45 = vor.u32 %v8725_v27, %v7395_v41  ;;  %v7361_v17 = vld [vmem:[%s11929_s12 + $0x240] sm:$0xf]  ;;  %v8759_v41 = vld [vmem:[%s11929_s12 + $0x38c] sm:$0xf0] }
 0x830   :  { %v7362_v8 = vor.u32 %v8719_v4, %v7361_v17  ;;  %v7555_v27 = vld [vmem:[%s11929_s12 + $0x380] sm:$0xf]  ;;  %v8755_v17 = vld [vmem:[%s11929_s12 + $0x36c] sm:$0xf0] }
 0x831   :  { %v7556_v61 = vor.u32 %v8759_v41, %v7555_v27 }
 0x833   :  { %3766 = vmatpush.bf16.msrb.mxu2 %v7224_v13  ;;  %3779 = vmatpush.bf16.msrb.mxu3 %v7228_v50  ;;  %v8715_v13 = vld [vmem:[%s11929_s12 + $0x22c] sm:$0xf0] }
 0x834   :  { %v7346_v50 = vor.u32 %v8715_v13, %v7345_v12  ;;  %v7371_v12 = vld [vmem:[%s11929_s12 + $0x258] sm:$0xf0]  ;;  %v7523_v13 = vld [vmem:[%s11929_s12 + $0x340] sm:$0xf] }
 0x837   :  { %3767 = vmatpush.bf16.msrb.mxu2 %v7208_v16  ;;  %3780 = vmatpush.bf16.msrb.mxu3 %v7212_v38  ;;  %v7293_v16 = vld [vmem:[%s11930_s13 + $0x4] sm:$0x3]  ;;  %v7347_v38 = vld [vmem:[%s11929_s12 + $0x230] sm:$0xf0] }
 0x838   :  { %v7350_v32 = vor.u32 %v8713_v19, %v7347_v38  ;;  %v7355_v38 = vld [vmem:[%s11929_s12 + $0x238] sm:$0xf0] }
 0x83b   :  { %3768 = vmatpush.bf16.msrb.mxu2 %v7192_v59  ;;  %3781 = vmatpush.bf16.msrb.mxu3 %v7196_v28  ;;  %v8738_v59 = vld [vmem:[%s11929_s12 + $0x2ec] sm:$0xf]  ;;  %v7450_v28 = vor.u32 %v8740_v20, %v7449_v22  ;;  %v7507_v22 = vld [vmem:[%s11929_s12 + $0x320] sm:$0xf] }
 0x83c   :  { %v7454_v29 = vor.u32 %v8738_v59, %v7451_v6  ;;  %v7337_v6 = vld [vmem:[%s11929_s12 + $0x208] sm:$0xf] }
 0x83f   :  { %3769 = vmatpush.bf16.msrb.mxu2 %v7176_v55  ;;  %3782 = vmatpush.bf16.msrb.mxu3 %v7180_v3  ;;  %v7603_v55 = vld [vmem:[%s11929_s12 + $0x3e0] sm:$0xf]  ;;  %v8771_v3 = vld [vmem:[%s11929_s12 + $0x3ec] sm:$0xf0] }
 0x840   :  { %v7604_v37 = vor.u32 %v8771_v3, %v7603_v55  ;;  %v7339_v55 = vld [vmem:[%s11929_s12 + $0x218] sm:$0xf0] }
 0x885   :  { %v3326_v11 = vpop.f32.mrf.mxu3  ;;  %v3275_v14 = vpop.f32.mrf.mxu2 }
 0x886   :  { %v3330_v30 = vpack.c.bf16 %v3326_v11, %v3326_v11  ;;  %v3279_v1 = vpack.c.bf16 %v3275_v14, %v3275_v14  ;;  %v8736_v11 = vld [vmem:[%s11929_s12 + $0x2d4] sm:$0xf0] }
 0x887   :  { %v7434_v14 = vor.u32 %v8736_v11, %v7433_v47  ;;  %v8743_v47 = vld [vmem:[%s11929_s12 + $0x30c] sm:$0xf0] }
 0x888   :  { %3532 = vmatmul.bf16.vlgmr.msrb.gmra.mxu0 %v3330_v30  ;;  %3545 = vmatmul.bf16.vlgmr.msra.gmra.mxu1 %v3330_v30 }
 0x889   :  { %3800 = vmatpush.bf16.msrb.mxu0 %v10165_v15  ;;  %4000 = vmatpush.bf16.msra.mxu1 %v7442_v10  ;;  %v8734_v10 = vld [vmem:[%s11929_s12 + $0x2cc] sm:$0xf] }
 0x88a   :  { %3558 = vmatmul.bf16.vlgmr.msra.gmra.mxu2 %v3330_v30  ;;  %3571 = vmatmul.bf16.vlgmr.msra.gmra.mxu3 %v3330_v30  ;;  %v7435_v30 = vld [vmem:[%s11929_s12 + $0x2d8] sm:$0xf0] }
 0x88b   :  { %4013 = vmatpush.bf16.msra.mxu2 %v7446_v9  ;;  %4026 = vmatpush.bf16.msra.mxu3 %v7450_v28  ;;  %v7438_v44 = vor.u32 %v8734_v10, %v7435_v30  ;;  %v8730_v9 = vld [vmem:[%s11929_s12 + $0x2ac] sm:$0xf]  ;;  %v8712_v28 = vld [vmem:[%s11929_s12 + $0x214] sm:$0xf0] }
 0x88c   :  { %v7422_v39 = vor.u32 %v8730_v9, %v7419_v0  ;;  %v7338_v42 = vor.u32 %v8712_v28, %v7337_v6  ;;  %v7605_v0 = vld [vmem:[%s11929_s12 + $0x3f0] sm:$0xf0]  ;;  %v8762_v28 = vld [vmem:[%s11929_s12 + $0x3ac] sm:$0xf] }
 0x88d   :  { %4001 = vmatpush.bf16.msra.mxu1 %v7426_v34  ;;  %v3328_v52 = vpop.f32.mrf.mxu3  ;;  %v3277_v53 = vpop.f32.mrf.mxu2  ;;  %v8732_v34 = vld [vmem:[%s11929_s12 + $0x2b4] sm:$0xf0] }
 0x88e   :  { %v7418_v48 = vor.u32 %v8732_v34, %v7417_v43  ;;  %v8728_v52 = vld [vmem:[%s11929_s12 + $0x294] sm:$0xf0]  ;;  %v8726_v53 = vld [vmem:[%s11929_s12 + $0x28c] sm:$0xf] }
 0x88f   :  { %4014 = vmatpush.bf16.msra.mxu2 %v7430_v58  ;;  %4027 = vmatpush.bf16.msra.mxu3 %v7434_v14  ;;  %v8763_v58 = vld [vmem:[%s11929_s12 + $0x3ac] sm:$0xf0] }
 0x890   :  { %v7572_v24 = vor.u32 %v8763_v58, %v7571_v60  ;;  %v8765_v60 = vld [vmem:[%s11929_s12 + $0x3c4] sm:$0xf] }
 0x891   :  { %4002 = vmatpush.bf16.msra.mxu1 %v7410_v51  ;;  %v7401_v51 = vld [vmem:[%s11929_s12 + $0x288] sm:$0xf] }
 0x892   :  { %v7402_v40 = vor.u32 %v8728_v52, %v7401_v51  ;;  %v8761_v51 = vld [vmem:[%s11929_s12 + $0x3a4] sm:$0xf]  ;;  %v7573_v52 = vld [vmem:[%s11929_s12 + $0x3b0] sm:$0xf0] }
 0x893   :  { %4015 = vmatpush.bf16.msra.mxu2 %v7414_v21  ;;  %4028 = vmatpush.bf16.msra.mxu3 %v7418_v48  ;;  %v7406_v21 = vor.u32 %v8726_v53, %v7403_v57  ;;  %v8769_v48 = vld [vmem:[%s11929_s12 + $0x3e4] sm:$0xf]  ;;  %v7611_v53 = vld [vmem:[%s11929_s12 + $0x3e8] sm:$0xf] }
 0x894   :  { %v7608_v58 = vor.u32 %v8769_v48, %v7605_v0  ;;  %v8795_v48 = vld [vmem:[%s11929_s12 + $0x4ac] sm:$0xf0] }
 0x895   :  { %4003 = vmatpush.bf16.msra.mxu1 %v7394_v31  ;;  %v7385_v31 = vld [vmem:[%s11929_s12 + $0x268] sm:$0xf] }
 0x896   :  { %v7386_v62 = vor.u32 %v8724_v46, %v7385_v31 }
 0x897   :  { %4016 = vmatpush.bf16.msra.mxu2 %v7398_v45  ;;  %4029 = vmatpush.bf16.msra.mxu3 %v7402_v40  ;;  %v8722_v45 = vld [vmem:[%s11929_s12 + $0x26c] sm:$0xf] }
 0x898   :  { %3744 = vmatmul.bf16.vlgmr.msra.gmra.mxu0 %v3279_v1  ;;  %3757 = vmatmul.bf16.vlgmr.msrb.gmra.mxu1 %v3279_v1 }
 0x899   :  { %4004 = vmatpush.bf16.msra.mxu1 %v7378_v2  ;;  %4039 = vmatpush.bf16.msra.mxu0 %v7454_v29  ;;  %v7539_v2 = vld [vmem:[%s11929_s12 + $0x360] sm:$0xf]  ;;  %v8710_v29 = vld [vmem:[%s11929_s12 + $0x20c] sm:$0xf] }
 0x89a   :  { %3770 = vmatmul.bf16.vlgmr.msrb.gmra.mxu2 %v3279_v1  ;;  %3783 = vmatmul.bf16.vlgmr.msrb.gmra.mxu3 %v3279_v1  ;;  %v7387_v1 = vld [vmem:[%s11929_s12 + $0x278] sm:$0xf0]  ;;  %v7540_v4 = vor.u32 %v8755_v17, %v7539_v2  ;;  %v7342_v3 = vor.u32 %v8710_v29, %v7339_v55  ;;  %v7557_v2 = vld [vmem:[%s11929_s12 + $0x390] sm:$0xf0] }
 0x89b   :  { %4017 = vmatpush.bf16.msra.mxu2 %v7382_v7  ;;  %v7390_v63 = vor.u32 %v8722_v45, %v7387_v1  ;;  %4030 = vmatpush.bf16.msra.mxu3 %v7386_v62  ;;  %v7369_v7 = vld [vmem:[%s11929_s12 + $0x248] sm:$0xf]  ;;  %v7576_v45 = vor.u32 %v8761_v51, %v7573_v52  ;;  %v8768_v62 = vld [vmem:[%s11929_s12 + $0x3d4] sm:$0xf0]  ;;  %v7581_v29 = vld [vmem:[%s11929_s12 + $0x3b8] sm:$0xf0] }
 0x89c   :  { %v7595_v1 = vld [vmem:[%s11929_s12 + $0x3c8] sm:$0xf]  ;;  %v7565_v51 = vld [vmem:[%s11929_s12 + $0x398] sm:$0xf0] }
 0x89d   :  { %4005 = vmatpush.bf16.msra.mxu1 %v7362_v8  ;;  %4040 = vmatpush.bf16.msra.mxu0 %v7438_v44  ;;  %v7370_v8 = vor.u32 %v8720_v33, %v7369_v7  ;;  %v7596_v17 = vor.u32 %v8768_v62, %v7595_v1  ;;  %v8753_v7 = vld [vmem:[%s11929_s12 + $0x364] sm:$0xf]  ;;  %v8770_v33 = vld [vmem:[%s11929_s12 + $0x3ec] sm:$0xf]  ;;  %v7701_v62 = vld [vmem:[%s11929_s12 + $0x460] sm:$0xf] }
 0x89f   :  { %4018 = vmatpush.bf16.msra.mxu2 %v7366_v54  ;;  %v8751_v54 = vld [vmem:[%s11929_s12 + $0x34c] sm:$0xf0]  ;;  %4031 = vmatpush.bf16.msra.mxu3 %v7370_v8  ;;  %v7541_v8 = vld [vmem:[%s11929_s12 + $0x370] sm:$0xf0] }
 0x8a0   :  { %v7524_v26 = vor.u32 %v8751_v54, %v7523_v13  ;;  %v8764_v13 = vld [vmem:[%s11929_s12 + $0x3b4] sm:$0xf0] }
 0x8a1   :  { %4006 = vmatpush.bf16.msra.mxu1 %v7346_v50  ;;  %4041 = vmatpush.bf16.msra.mxu0 %v7422_v39  ;;  %v7374_v50 = vor.u32 %v8718_v49, %v7371_v12  ;;  %v7589_v39 = vld [vmem:[%s11929_s12 + $0x3d0] sm:$0xf0]  ;;  %v7613_v49 = vld [vmem:[%s11929_s12 + $0x3f8] sm:$0xf0]  ;;  %v7579_v12 = vld [vmem:[%s11929_s12 + $0x3a8] sm:$0xf] }
 0x8a3   :  { %4019 = vmatpush.bf16.msra.mxu2 %v7350_v32  ;;  %v8747_v32 = vld [vmem:[%s11929_s12 + $0x32c] sm:$0xf0] }
 0x8a4   :  { %v7508_v59 = vor.u32 %v8747_v32, %v7507_v22  ;;  %v7580_v22 = vor.u32 %v8764_v13, %v7579_v12  ;;  %v8749_v32 = vld [vmem:[%s11929_s12 + $0x344] sm:$0xf]  ;;  %v8783_v12 = vld [vmem:[%s11929_s12 + $0x44c] sm:$0xf0] }
 0x8a5   :  { %4007 = vmatpush.bf16.msra.mxu1 %v7330_v18  ;;  %4042 = vmatpush.bf16.msra.mxu0 %v7406_v21  ;;  %v8716_v18 = vld [vmem:[%s11929_s12 + $0x234] sm:$0xf0] }
 0x8a6   :  { %v7354_v19 = vor.u32 %v8716_v18, %v7353_v56  ;;  %v8772_v21 = vld [vmem:[%s11929_s12 + $0x3f4] sm:$0xf0]  ;;  %v7616_v18 = vor.u32 %v8770_v33, %v7613_v49  ;;  %v7533_v49 = vld [vmem:[%s11929_s12 + $0x358] sm:$0xf0] }
 0x8a7   :  { %4020 = vmatpush.bf16.msra.mxu2 %v7334_v36 }
 0x8a8   :  { %7294 = vmatmul.msk.bf16.vlgmr.msrb.gmra.mxu0 %vm3262_vm2, %v7293_v16  ;;  %v8714_v16 = vld [vmem:[%s11929_s12 + $0x22c] sm:$0xf]  ;;  %4032 = vmatpush.bf16.msra.mxu3 %v7354_v19 }
 0x8a9   :  { %4068 = vmatpush.bf16.msrb.mxu1 %v10165_v15  ;;  %4043 = vmatpush.bf16.msra.mxu0 %v7390_v63  ;;  %v7358_v20 = vor.u32 %v8714_v16, %v7355_v38  ;;  %v8757_v63 = vld [vmem:[%s11929_s12 + $0x384] sm:$0xf]  ;;  %v7544_v16 = vor.u32 %v8753_v7, %v7541_v8  ;;  %v8766_v19 = vld [vmem:[%s11929_s12 + $0x3cc] sm:$0xf]  ;;  %v7597_v38 = vld [vmem:[%s11929_s12 + $0x3d8] sm:$0xf0] }
 0x8aa   :  { %v8750_v7 = vld [vmem:[%s11929_s12 + $0x34c] sm:$0xf]  ;;  %v7685_v8 = vld [vmem:[%s11929_s12 + $0x440] sm:$0xf] }
 0x8ab   :  { %4268 = vmatpush.bf16.msrb.mxu2 %v7604_v37  ;;  %v7491_v37 = vld [vmem:[%s11929_s12 + $0x300] sm:$0xf]  ;;  %v7536_v13 = vor.u32 %v8750_v7, %v7533_v49  ;;  %v8798_v7 = vld [vmem:[%s11929_s12 + $0x4cc] sm:$0xf]  ;;  %v8781_v49 = vld [vmem:[%s11929_s12 + $0x444] sm:$0xf] }
 0x8ac   :  { %4033 = vmatpush.bf16.msra.mxu3 %v7338_v42  ;;  %v7492_v11 = vor.u32 %v8743_v47, %v7491_v37  ;;  %v7509_v42 = vld [vmem:[%s11929_s12 + $0x330] sm:$0xf0]  ;;  %v8741_v37 = vld [vmem:[%s11929_s12 + $0x304] sm:$0xf] }
 0x8ad   :  { %4044 = vmatpush.bf16.msra.mxu0 %v7374_v50  ;;  %v7493_v47 = vld [vmem:[%s11929_s12 + $0x310] sm:$0xf0] }
 0x8af   :  { %4269 = vmatpush.bf16.msrb.mxu2 %v7588_v23 }
 0x8b0   :  { %4281 = vmatpush.bf16.msrb.mxu3 %v7608_v58  ;;  %v8760_v58 = vld [vmem:[%s11929_s12 + $0x394] sm:$0xf0] }
 0x8b1   :  { %4045 = vmatpush.bf16.msra.mxu0 %v7358_v20  ;;  %v7525_v20 = vld [vmem:[%s11929_s12 + $0x350] sm:$0xf0] }
 0x8b2   :  { %v7528_v6 = vor.u32 %v8749_v32, %v7525_v20  ;;  %v7499_v20 = vld [vmem:[%s11929_s12 + $0x308] sm:$0xf] }
 0x8b3   :  { %4270 = vmatpush.bf16.msrb.mxu2 %v7572_v24  ;;  %v7592_v24 = vor.u32 %v8765_v60, %v7589_v39  ;;  %v7563_v60 = vld [vmem:[%s11929_s12 + $0x388] sm:$0xf]  ;;  %v8758_v39 = vld [vmem:[%s11929_s12 + $0x38c] sm:$0xf] }
 0x8b4   :  { %v7568_v52 = vor.u32 %v8758_v39, %v7565_v51 }
 0x8b5   :  { %4046 = vmatpush.bf16.msra.mxu0 %v7342_v3  ;;  %4282 = vmatpush.bf16.msrb.mxu3 %v7592_v24  ;;  %v7564_v24 = vor.u32 %v8760_v58, %v7563_v60 }
 0x8b7   :  { %4271 = vmatpush.bf16.msrb.mxu2 %v7556_v61  ;;  %v7612_v61 = vor.u32 %v8772_v21, %v7611_v53  ;;  %v7717_v53 = vld [vmem:[%s11929_s12 + $0x480] sm:$0xf] }
 0x8b9   :  { %4294 = vmatpush.bf16.msrb.mxu0 %v7612_v61  ;;  %4283 = vmatpush.bf16.msrb.mxu3 %v7576_v45  ;;  %v7549_v61 = vld [vmem:[%s11929_s12 + $0x378] sm:$0xf0] }
 0x8bb   :  { %4272 = vmatpush.bf16.msrb.mxu2 %v7540_v4  ;;  %v7560_v4 = vor.u32 %v8757_v63, %v7557_v2  ;;  %v8787_v63 = vld [vmem:[%s11929_s12 + $0x46c] sm:$0xf0] }
 0x8bc   :  { %v7702_v2 = vor.u32 %v8787_v63, %v7701_v62  ;;  %v7703_v62 = vld [vmem:[%s11929_s12 + $0x470] sm:$0xf0] }
 0x8bd   :  { %4295 = vmatpush.bf16.msrb.mxu0 %v7596_v17  ;;  %4284 = vmatpush.bf16.msrb.mxu3 %v7560_v4  ;;  %v7531_v17 = vld [vmem:[%s11929_s12 + $0x348] sm:$0xf]  ;;  %v8752_v4 = vld [vmem:[%s11929_s12 + $0x354] sm:$0xf0] }
 0x8be   :  { %v7532_v33 = vor.u32 %v8752_v4, %v7531_v17 }
 0x8bf   :  { %4273 = vmatpush.bf16.msrb.mxu2 %v7524_v26 }
 0x8c1   :  { %4285 = vmatpush.bf16.msrb.mxu3 %v7544_v16  ;;  %4296 = vmatpush.bf16.msrb.mxu0 %v7580_v22  ;;  %v7517_v16 = vld [vmem:[%s11929_s12 + $0x338] sm:$0xf0] }
 0x8c3   :  { %4274 = vmatpush.bf16.msrb.mxu2 %v7508_v59  ;;  %v7600_v59 = vor.u32 %v8766_v19, %v7597_v38  ;;  %v7669_v19 = vld [vmem:[%s11929_s12 + $0x420] sm:$0xf]  ;;  %v8779_v38 = vld [vmem:[%s11929_s12 + $0x42c] sm:$0xf0] }
 0x8c4   :  { %v7670_v32 = vor.u32 %v8779_v38, %v7669_v19  ;;  %v7927_v19 = vld [vmem:[%s11929_s12 + $0x5e0] sm:$0xf]  ;;  %v8835_v38 = vld [vmem:[%s11929_s12 + $0x5ec] sm:$0xf0] }
 0x8c5   :  { %4286 = vmatpush.bf16.msrb.mxu3 %v7528_v6  ;;  %4297 = vmatpush.bf16.msrb.mxu0 %v7564_v24  ;;  %v8742_v6 = vld [vmem:[%s11929_s12 + $0x30c] sm:$0xf] }
 0x8c7   :  { %4275 = vmatpush.bf16.msrb.mxu2 %v7492_v11  ;;  %v7765_v11 = vld [vmem:[%s11929_s12 + $0x4e0] sm:$0xf] }
 0x905   :  { %v3533_v35 = vpop.f32.mrf.mxu0  ;;  %v3546_v36 = vpop.f32.mrf.mxu1 }
 0x90d   :  { %v3535_v10 = vpop.f32.mrf.mxu0  ;;  %v3559_v14 = vpop.f32.mrf.mxu2 }
 0x90e   :  { %v3572_v30 = vpop.f32.mrf.mxu3  ;;  %v3548_v25 = vpop.f32.mrf.mxu1  ;;  %v8803_v10 = vld [vmem:[%s11929_s12 + $0x4ec] sm:$0xf0] }
 0x90f   :  { %v7455_v25 = vld [vmem:[%s11930_s13 + $0x6] sm:$0x3] }
 0x915   :  { %v3745_v5 = vpop.f32.mrf.mxu0  ;;  %v3561_v44 = vpop.f32.mrf.mxu2 }
 0x916   :  { %v10705_v23 = vadd.f32 %v3745_v5, %v3533_v35  ;;  %v3574_v43 = vpop.f32.mrf.mxu3  ;;  %v3758_v34 = vpop.f32.mrf.mxu1  ;;  %v8745_v35 = vld [vmem:[%s11929_s12 + $0x324] sm:$0xf]  ;;  %v7749_v5 = vld [vmem:[%s11929_s12 + $0x4c0] sm:$0xf]  ;;  %v8799_v44 = vld [vmem:[%s11929_s12 + $0x4cc] sm:$0xf0] }
 0x917   :  { %v10707_v9 = vadd.f32 %v3758_v34, %v3546_v36  ;;  %v7584_v36 = vor.u32 %v8762_v28, %v7581_v29  ;;  %v7512_v3 = vor.u32 %v8745_v35, %v7509_v42  ;;  %v7750_v43 = vor.u32 %v8799_v44, %v7749_v5  ;;  %v7733_v34 = vld [vmem:[%s11929_s12 + $0x4a0] sm:$0xf]  ;;  %v7501_v29 = vld [vmem:[%s11929_s12 + $0x318] sm:$0xf0]  ;;  %v8775_v42 = vld [vmem:[%s11929_s12 + $0x40c] sm:$0xf0] }
 0x918   :  { %v7734_v0 = vor.u32 %v8795_v48, %v7733_v34  ;;  %v7653_v35 = vld [vmem:[%s11929_s12 + $0x400] sm:$0xf]  ;;  %v8793_v34 = vld [vmem:[%s11929_s12 + $0x4a4] sm:$0xf]  ;;  %v7735_v48 = vld [vmem:[%s11929_s12 + $0x4b0] sm:$0xf0] }
 0x919   :  { %4287 = vmatpush.bf16.msrb.mxu3 %v7512_v3  ;;  %v7738_v51 = vor.u32 %v8793_v34, %v7735_v48  ;;  %v8823_v34 = vld [vmem:[%s11929_s12 + $0x58c] sm:$0xf0] }
 0x91d   :  { %v3747_v40 = vpop.f32.mrf.mxu0  ;;  %v3771_v57 = vpop.f32.mrf.mxu2 }
 0x91e   :  { %v10733_v27 = vadd.f32 %v3771_v57, %v3559_v14  ;;  %v3784_v41 = vpop.f32.mrf.mxu3  ;;  %v3760_v31 = vpop.f32.mrf.mxu1  ;;  %v7496_v14 = vor.u32 %v8741_v37, %v7493_v47  ;;  %v8791_v40 = vld [vmem:[%s11929_s12 + $0x48c] sm:$0xf0]  ;;  %v7547_v57 = vld [vmem:[%s11929_s12 + $0x368] sm:$0xf] }
 0x91f   :  { %v10735_v46 = vadd.f32 %v3784_v41, %v3572_v30  ;;  %v7766_v30 = vor.u32 %v8803_v10, %v7765_v11  ;;  %v7718_v21 = vor.u32 %v8791_v40, %v7717_v53  ;;  %v8756_v41 = vld [vmem:[%s11929_s12 + $0x374] sm:$0xf0]  ;;  %v8754_v31 = vld [vmem:[%s11929_s12 + $0x36c] sm:$0xf]  ;;  %v8801_v10 = vld [vmem:[%s11929_s12 + $0x4e4] sm:$0xf] }
 0x920   :  { %4288 = vmatpush.bf16.msrb.mxu3 %v7496_v14  ;;  %v7548_v45 = vor.u32 %v8756_v41, %v7547_v57  ;;  %v7552_v1 = vor.u32 %v8754_v31, %v7549_v61  ;;  %v7767_v14 = vld [vmem:[%s11929_s12 + $0x4f0] sm:$0xf0]  ;;  %v8800_v53 = vld [vmem:[%s11929_s12 + $0x4d4] sm:$0xf0]  ;;  %v8802_v31 = vld [vmem:[%s11929_s12 + $0x4ec] sm:$0xf] }
 0x921   :  { %v7719_v40 = vld [vmem:[%s11929_s12 + $0x490] sm:$0xf0]  ;;  %v7775_v61 = vld [vmem:[%s11929_s12 + $0x4f8] sm:$0xf0] }
 0x922   :  { %4298 = vmatpush.bf16.msrb.mxu0 %v7548_v45  ;;  %v7778_v17 = vor.u32 %v8802_v31, %v7775_v61  ;;  %v7695_v61 = vld [vmem:[%s11929_s12 + $0x458] sm:$0xf0] }
 0x925   :  { %v3802_v54 = vpop.f32.mrf.mxu0  ;;  %v3773_v50 = vpop.f32.mrf.mxu2 }
 0x926   :  { %v3806_v26 = vpack.c.bf16 %v3802_v54, %v3802_v54  ;;  %v3786_v56 = vpop.f32.mrf.mxu3  ;;  %v7686_v54 = vor.u32 %v8783_v12, %v7685_v8  ;;  %v7515_v50 = vld [vmem:[%s11929_s12 + $0x328] sm:$0xf]  ;;  %4299 = vmatpush.bf16.msrb.mxu0 %v7532_v33  ;;  %v7759_v33 = vld [vmem:[%s11929_s12 + $0x4d8] sm:$0xf0]  ;;  %v7687_v8 = vld [vmem:[%s11929_s12 + $0x450] sm:$0xf0] }
 0x927   :  { %v8746_v56 = vld [vmem:[%s11929_s12 + $0x32c] sm:$0xf]  ;;  %v7762_v12 = vor.u32 %v8798_v7, %v7759_v33  ;;  %v7679_v33 = vld [vmem:[%s11929_s12 + $0x438] sm:$0xf0] }
 0x928   :  { %4008 = vmatmul.bf16.vlgmr.msra.gmra.mxu1 %v3806_v26  ;;  %4021 = vmatmul.bf16.vlgmr.msra.gmra.mxu2 %v3806_v26  ;;  %v7520_v22 = vor.u32 %v8746_v56, %v7517_v16  ;;  %v7655_v16 = vld [vmem:[%s11929_s12 + $0x410] sm:$0xf0] }
 0x929   :  { %4034 = vmatmul.bf16.vlgmr.msra.gmra.mxu3 %v3806_v26  ;;  %4047 = vmatmul.bf16.vlgmr.msra.gmra.mxu0 %v3806_v26  ;;  %v8748_v26 = vld [vmem:[%s11929_s12 + $0x334] sm:$0xf0] }
 0x92a   :  { %4336 = vmatpush.bf16.msra.mxu2 %v10165_v15  ;;  %4307 = vmatpush.bf16.msra.mxu1 %v7616_v18  ;;  %v7516_v18 = vor.u32 %v8748_v26, %v7515_v50  ;;  %v7671_v50 = vld [vmem:[%s11929_s12 + $0x430] sm:$0xf0] }
 0x92b   :  { %4536 = vmatpush.bf16.msra.mxu3 %v7766_v30  ;;  %v8797_v30 = vld [vmem:[%s11929_s12 + $0x4c4] sm:$0xf] }
 0x92c   :  { %4300 = vmatpush.bf16.msrb.mxu0 %v7516_v18  ;;  %v8773_v18 = vld [vmem:[%s11929_s12 + $0x404] sm:$0xf] }
 0x92d   :  { %v3804_v55 = vpop.f32.mrf.mxu0 }
 0x92e   :  { %4308 = vmatpush.bf16.msra.mxu1 %v7600_v59  ;;  %v8744_v59 = vld [vmem:[%s11929_s12 + $0x314] sm:$0xf0]  ;;  %v7504_v55 = vor.u32 %v8742_v6, %v7501_v29  ;;  %v8831_v6 = vld [vmem:[%s11929_s12 + $0x5cc] sm:$0xf0]  ;;  %v7741_v29 = vld [vmem:[%s11929_s12 + $0x4a8] sm:$0xf] }
 0x92f   :  { %4537 = vmatpush.bf16.msra.mxu3 %v7750_v43  ;;  %v7500_v28 = vor.u32 %v8744_v59, %v7499_v20  ;;  %v7617_v20 = vld [vmem:[%s11930_s13 + $0x8] sm:$0x3]  ;;  %v7911_v59 = vld [vmem:[%s11929_s12 + $0x5c0] sm:$0xf] }
 0x931   :  { %4301 = vmatpush.bf16.msrb.mxu0 %v7500_v28  ;;  %v7912_v28 = vor.u32 %v8831_v6, %v7911_v59 }
 0x932   :  { %4309 = vmatpush.bf16.msra.mxu1 %v7584_v36  ;;  %v7654_v36 = vor.u32 %v8775_v42, %v7653_v35  ;;  %v8796_v35 = vld [vmem:[%s11929_s12 + $0x4b4] sm:$0xf0]  ;;  %v8794_v42 = vld [vmem:[%s11929_s12 + $0x4ac] sm:$0xf] }
 0x933   :  { %4538 = vmatpush.bf16.msra.mxu3 %v7734_v0  ;;  %v7773_v0 = vld [vmem:[%s11929_s12 + $0x4e8] sm:$0xf] }
 0x936   :  { %4310 = vmatpush.bf16.msra.mxu1 %v7568_v52  ;;  %v7757_v52 = vld [vmem:[%s11929_s12 + $0x4c8] sm:$0xf] }
 0x937   :  { %4539 = vmatpush.bf16.msra.mxu3 %v7718_v21  ;;  %v7758_v57 = vor.u32 %v8800_v53, %v7757_v52  ;;  %v7863_v52 = vld [vmem:[%s11929_s12 + $0x560] sm:$0xf]  ;;  %v8819_v53 = vld [vmem:[%s11929_s12 + $0x56c] sm:$0xf0] }
 0x938   :  { %7456 = vmatmul.msk.bf16.vlgmr.msrb.gmra.mxu1 %vm3262_vm2, %v7455_v25  ;;  %v7770_v25 = vor.u32 %v8801_v10, %v7767_v14 }
 0x93a   :  { %4311 = vmatpush.bf16.msra.mxu1 %v7552_v1  ;;  %4549 = vmatpush.bf16.msra.mxu0 %v7770_v25  ;;  %v8785_v1 = vld [vmem:[%s11929_s12 + $0x464] sm:$0xf]  ;;  %v8792_v25 = vld [vmem:[%s11929_s12 + $0x494] sm:$0xf0] }
 0x93b   :  { %4540 = vmatpush.bf16.msra.mxu3 %v7702_v2  ;;  %v7706_v4 = vor.u32 %v8785_v1, %v7703_v62  ;;  %v8815_v1 = vld [vmem:[%s11929_s12 + $0x54c] sm:$0xf0] }
 0x93e   :  { %4312 = vmatpush.bf16.msra.mxu1 %v7536_v13  ;;  %v7690_v13 = vor.u32 %v8781_v49, %v7687_v8  ;;  %v7831_v49 = vld [vmem:[%s11929_s12 + $0x520] sm:$0xf]  ;;  %v8811_v8 = vld [vmem:[%s11929_s12 + $0x52c] sm:$0xf0] }
 0x93f   :  { %4541 = vmatpush.bf16.msra.mxu3 %v7686_v54  ;;  %v8777_v54 = vld [vmem:[%s11929_s12 + $0x424] sm:$0xf] }
 0x940   :  { %v7674_v56 = vor.u32 %v8777_v54, %v7671_v50  ;;  %v7661_v54 = vld [vmem:[%s11929_s12 + $0x408] sm:$0xf]  ;;  %v8776_v50 = vld [vmem:[%s11929_s12 + $0x414] sm:$0xf0] }
 0x942   :  { %4313 = vmatpush.bf16.msra.mxu1 %v7520_v22  ;;  %v7658_v22 = vor.u32 %v8773_v18, %v7655_v16  ;;  %v7663_v18 = vld [vmem:[%s11929_s12 + $0x418] sm:$0xf0]  ;;  %v7815_v16 = vld [vmem:[%s11929_s12 + $0x500] sm:$0xf] }
 0x943   :  { %4542 = vmatpush.bf16.msra.mxu3 %v7670_v32  ;;  %v7928_v32 = vor.u32 %v8835_v38, %v7927_v19  ;;  %v8807_v19 = vld [vmem:[%s11929_s12 + $0x50c] sm:$0xf0] }
 0x946   :  { %4314 = vmatpush.bf16.msra.mxu1 %v7504_v55  ;;  %v7742_v55 = vor.u32 %v8796_v35, %v7741_v29 }
 0x947   :  { %4543 = vmatpush.bf16.msra.mxu3 %v7654_v36  ;;  %v7743_v36 = vld [vmem:[%s11929_s12 + $0x4b8] sm:$0xf0] }
 0x948   :  { %v7746_v10 = vor.u32 %v8794_v42, %v7743_v36 }
 0x9a5   :  { %v4009_v3 = vpop.f32.mrf.mxu1 }
 0x9a6   :  { %v10911_v37 = vadd.f32 %v4009_v3, %v10705_v23  ;;  %v4048_v47 = vpop.f32.mrf.mxu0  ;;  %v7751_v23 = vld [vmem:[%s11929_s12 + $0x4d0] sm:$0xf0]  ;;  %v7895_v3 = vld [vmem:[%s11929_s12 + $0x5a0] sm:$0xf] }
 0x9a7   :  { %v10914_v11 = vadd.f32 %v4048_v47, %v10735_v46  ;;  %v7754_v46 = vor.u32 %v8797_v30, %v7751_v23  ;;  %v8827_v47 = vld [vmem:[%s11929_s12 + $0x5ac] sm:$0xf0]  ;;  %v7725_v30 = vld [vmem:[%s11929_s12 + $0x488] sm:$0xf]  ;;  %v8790_v23 = vld [vmem:[%s11929_s12 + $0x48c] sm:$0xf] }
 0x9a8   :  { %v7896_v14 = vor.u32 %v8827_v47, %v7895_v3  ;;  %v8833_v3 = vld [vmem:[%s11929_s12 + $0x5e4] sm:$0xf] }
 0x9a9   :  { %4550 = vmatpush.bf16.msra.mxu0 %v7754_v46  ;;  %v7727_v46 = vld [vmem:[%s11929_s12 + $0x498] sm:$0xf0] }
 0x9aa   :  { %v7730_v48 = vor.u32 %v8790_v23, %v7727_v46 }
 0x9ab   :  { %v4022_v5 = vpop.f32.mrf.mxu2 }
 0x9ac   :  { %v10929_v44 = vadd.f32 %v4022_v5, %v10707_v9  ;;  %v4035_v43 = vpop.f32.mrf.mxu3  ;;  %v8804_v9 = vld [vmem:[%s11929_s12 + $0x4f4] sm:$0xf0]  ;;  %v7726_v5 = vor.u32 %v8792_v25, %v7725_v30  ;;  %v7935_v30 = vld [vmem:[%s11929_s12 + $0x5e8] sm:$0xf] }
 0x9ad   :  { %v10941_v60 = vadd.f32 %v4035_v43, %v10733_v27  ;;  %v4011_v58 = vpop.f32.mrf.mxu1  ;;  %v7774_v24 = vor.u32 %v8804_v9, %v7773_v0  ;;  %v8789_v27 = vld [vmem:[%s11929_s12 + $0x484] sm:$0xf]  ;;  %4551 = vmatpush.bf16.msra.mxu0 %v7738_v51  ;;  %v7879_v43 = vld [vmem:[%s11929_s12 + $0x580] sm:$0xf]  ;;  %v8788_v9 = vld [vmem:[%s11929_s12 + $0x474] sm:$0xf0] }
 0x9ae   :  { %v4050_v39 = vpop.f32.mrf.mxu0  ;;  %v7722_v41 = vor.u32 %v8789_v27, %v7719_v40  ;;  %v7880_v0 = vor.u32 %v8823_v34, %v7879_v43  ;;  %v7709_v58 = vld [vmem:[%s11929_s12 + $0x468] sm:$0xf]  ;;  %v7711_v51 = vld [vmem:[%s11929_s12 + $0x478] sm:$0xf0]  ;;  %v7864_v40 = vor.u32 %v8819_v53, %v7863_v52  ;;  %v8817_v52 = vld [vmem:[%s11929_s12 + $0x564] sm:$0xf] }
 0x9af   :  { %4562 = vmatpush.bf16.msrb.mxu1 %v7774_v24  ;;  %v8786_v39 = vld [vmem:[%s11929_s12 + $0x46c] sm:$0xf]  ;;  %v7710_v24 = vor.u32 %v8788_v9, %v7709_v58  ;;  %v7919_v34 = vld [vmem:[%s11929_s12 + $0x5c8] sm:$0xf]  ;;  %v7881_v58 = vld [vmem:[%s11929_s12 + $0x590] sm:$0xf0] }
 0x9b0   :  { %v7714_v27 = vor.u32 %v8786_v39, %v7711_v51  ;;  %v7937_v51 = vld [vmem:[%s11929_s12 + $0x5f8] sm:$0xf0]  ;;  %v7865_v53 = vld [vmem:[%s11929_s12 + $0x570] sm:$0xf0] }
 0x9b1   :  { %4552 = vmatpush.bf16.msra.mxu0 %v7722_v41  ;;  %v8782_v41 = vld [vmem:[%s11929_s12 + $0x44c] sm:$0xf] }
 0x9b2   :  { %v7698_v62 = vor.u32 %v8782_v41, %v7695_v61  ;;  %v8830_v41 = vld [vmem:[%s11929_s12 + $0x5cc] sm:$0xf]  ;;  %v8813_v61 = vld [vmem:[%s11929_s12 + $0x544] sm:$0xf] }
 0x9b3   :  { %v4024_v21 = vpop.f32.mrf.mxu2  ;;  %4563 = vmatpush.bf16.msrb.mxu1 %v7758_v57  ;;  %v7693_v57 = vld [vmem:[%s11929_s12 + $0x448] sm:$0xf] }
 0x9b4   :  { %v4037_v45 = vpop.f32.mrf.mxu3  ;;  %v8784_v21 = vld [vmem:[%s11929_s12 + $0x454] sm:$0xf0] }
 0x9b5   :  { %v4070_v63 = vpop.f32.mrf.mxu1  ;;  %4553 = vmatpush.bf16.msra.mxu0 %v7706_v4  ;;  %v7694_v31 = vor.u32 %v8784_v21, %v7693_v57  ;;  %v7847_v45 = vld [vmem:[%s11929_s12 + $0x540] sm:$0xf]  ;;  %v8778_v4 = vld [vmem:[%s11929_s12 + $0x42c] sm:$0xf]  ;;  %v7868_v21 = vor.u32 %v8817_v52, %v7865_v53  ;;  %v8847_v52 = vld [vmem:[%s11929_s12 + $0x64c] sm:$0xf0] }
 0x9b6   :  { %v4074_v2 = vpack.c.bf16 %v4070_v63, %v4070_v63  ;;  %v7848_v63 = vor.u32 %v8815_v1, %v7847_v45  ;;  %v7849_v45 = vld [vmem:[%s11929_s12 + $0x550] sm:$0xf0] }
 0x9b7   :  { %4564 = vmatpush.bf16.msrb.mxu1 %v7742_v55 }
 0x9b8   :  { %4276 = vmatmul.bf16.vlgmr.msrb.gmra.mxu2 %v4074_v2  ;;  %4289 = vmatmul.bf16.vlgmr.msrb.gmra.mxu3 %v4074_v2 }
 0x9b9   :  { %4302 = vmatmul.bf16.vlgmr.msrb.gmra.mxu0 %v4074_v2  ;;  %4315 = vmatmul.bf16.vlgmr.msra.gmra.mxu1 %v4074_v2  ;;  %v7677_v2 = vld [vmem:[%s11929_s12 + $0x428] sm:$0xf] }
 0x9ba   :  { %4604 = vmatpush.bf16.msrb.mxu3 %v10165_v15  ;;  %4575 = vmatpush.bf16.msrb.mxu2 %v7778_v17  ;;  %v8780_v17 = vld [vmem:[%s11929_s12 + $0x434] sm:$0xf0] }
 0x9bb   :  { %4554 = vmatpush.bf16.msra.mxu0 %v7690_v13  ;;  %4565 = vmatpush.bf16.msrb.mxu1 %v7726_v5  ;;  %v7678_v7 = vor.u32 %v8780_v17, %v7677_v2  ;;  %v7832_v13 = vor.u32 %v8811_v8, %v7831_v49  ;;  %v8836_v5 = vld [vmem:[%s11929_s12 + $0x5f4] sm:$0xf0]  ;;  %v7833_v2 = vld [vmem:[%s11929_s12 + $0x530] sm:$0xf0]  ;;  %v8089_v49 = vld [vmem:[%s11929_s12 + $0x6e0] sm:$0xf] }
 0x9bc   :  { %v7936_v46 = vor.u32 %v8836_v5, %v7935_v30  ;;  %v8867_v8 = vld [vmem:[%s11929_s12 + $0x6ec] sm:$0xf0]  ;;  %v8820_v30 = vld [vmem:[%s11929_s12 + $0x574] sm:$0xf0] }
 0x9bd   :  { %v4072_v26 = vpop.f32.mrf.mxu1 }
 0x9be   :  { %4576 = vmatpush.bf16.msrb.mxu2 %v7762_v12  ;;  %v7682_v12 = vor.u32 %v8778_v4, %v7679_v33  ;;  %v8774_v26 = vld [vmem:[%s11929_s12 + $0x40c] sm:$0xf]  ;;  %v7817_v33 = vld [vmem:[%s11929_s12 + $0x510] sm:$0xf0] }
 0x9bf   :  { %4555 = vmatpush.bf16.msra.mxu0 %v7674_v56  ;;  %4566 = vmatpush.bf16.msrb.mxu1 %v7710_v24  ;;  %v7662_v56 = vor.u32 %v8776_v50, %v7661_v54  ;;  %v7666_v38 = vor.u32 %v8774_v26, %v7663_v18  ;;  %v8834_v24 = vld [vmem:[%s11929_s12 + $0x5ec] sm:$0xf]  ;;  %v7779_v54 = vld [vmem:[%s11930_s13 + $0xa] sm:$0x3]  ;;  %v8073_v50 = vld [vmem:[%s11929_s12 + $0x6c0] sm:$0xf] }
 0x9c0   :  { %v7940_v57 = vor.u32 %v8834_v24, %v7937_v51  ;;  %v8863_v26 = vld [vmem:[%s11929_s12 + $0x6cc] sm:$0xf0]  ;;  %v7903_v18 = vld [vmem:[%s11929_s12 + $0x5a8] sm:$0xf]  ;;  %v7857_v24 = vld [vmem:[%s11929_s12 + $0x558] sm:$0xf0] }
 0x9c1   :  { %v8009_v51 = vld [vmem:[%s11929_s12 + $0x640] sm:$0xf] }
 0x9c2   :  { %4577 = vmatpush.bf16.msrb.mxu2 %v7746_v10  ;;  %v8825_v10 = vld [vmem:[%s11929_s12 + $0x5a4] sm:$0xf] }
 0x9c3   :  { %4556 = vmatpush.bf16.msra.mxu0 %v7658_v22  ;;  %4567 = vmatpush.bf16.msrb.mxu1 %v7694_v31  ;;  %v7816_v22 = vor.u32 %v8807_v19, %v7815_v16  ;;  %v7921_v31 = vld [vmem:[%s11929_s12 + $0x5d8] sm:$0xf0]  ;;  %v8828_v16 = vld [vmem:[%s11929_s12 + $0x5b4] sm:$0xf0]  ;;  %v8826_v19 = vld [vmem:[%s11929_s12 + $0x5ac] sm:$0xf] }
 0x9c4   :  { %v7924_v1 = vor.u32 %v8830_v41, %v7921_v31  ;;  %v7841_v31 = vld [vmem:[%s11929_s12 + $0x538] sm:$0xf0] }
 0x9c6   :  { %4578 = vmatpush.bf16.msrb.mxu2 %v7730_v48  ;;  %v8832_v48 = vld [vmem:[%s11929_s12 + $0x5d4] sm:$0xf0] }
 0x9c7   :  { %4804 = vmatpush.bf16.msrb.mxu0 %v7928_v32  ;;  %4568 = vmatpush.bf16.msrb.mxu1 %v7678_v7  ;;  %v7920_v9 = vor.u32 %v8832_v48, %v7919_v34  ;;  %v8805_v7 = vld [vmem:[%s11929_s12 + $0x504] sm:$0xf]  ;;  %v8851_v34 = vld [vmem:[%s11929_s12 + $0x66c] sm:$0xf0] }
 0x9c8   :  { %7618 = vmatmul.msk.bf16.vlgmr.msra.gmra.mxu2 %vm3262_vm2, %v7617_v20 }
 0x9ca   :  { %4579 = vmatpush.bf16.msrb.mxu2 %v7714_v27 }
 0x9cb   :  { %4805 = vmatpush.bf16.msrb.mxu0 %v7912_v28  ;;  %4569 = vmatpush.bf16.msrb.mxu1 %v7662_v56  ;;  %v8074_v56 = vor.u32 %v8863_v26, %v8073_v50 }
 0x9ce   :  { %4580 = vmatpush.bf16.msrb.mxu2 %v7698_v62  ;;  %v7852_v62 = vor.u32 %v8813_v61, %v7849_v45  ;;  %v7993_v61 = vld [vmem:[%s11929_s12 + $0x620] sm:$0xf]  ;;  %v8843_v45 = vld [vmem:[%s11929_s12 + $0x62c] sm:$0xf0] }
 0x9cf   :  { %4806 = vmatpush.bf16.msrb.mxu0 %v7896_v14  ;;  %v7897_v14 = vld [vmem:[%s11929_s12 + $0x5b0] sm:$0xf0] }
 0x9d0   :  { %v7900_v43 = vor.u32 %v8825_v10, %v7897_v14  ;;  %v7871_v10 = vld [vmem:[%s11929_s12 + $0x568] sm:$0xf] }
 0x9d1   :  { %v7872_v5 = vor.u32 %v8820_v30, %v7871_v10  ;;  %v8853_v10 = vld [vmem:[%s11929_s12 + $0x684] sm:$0xf] }
 0x9d2   :  { %4581 = vmatpush.bf16.msrb.mxu2 %v7682_v12  ;;  %v7820_v12 = vor.u32 %v8805_v7, %v7817_v33  ;;  %v7825_v7 = vld [vmem:[%s11929_s12 + $0x518] sm:$0xf0]  ;;  %v7977_v33 = vld [vmem:[%s11929_s12 + $0x600] sm:$0xf] }
 0x9d3   :  { %4807 = vmatpush.bf16.msrb.mxu0 %v7880_v0  ;;  %v8821_v0 = vld [vmem:[%s11929_s12 + $0x584] sm:$0xf] }
 0x9d4   :  { %v7884_v39 = vor.u32 %v8821_v0, %v7881_v58  ;;  %v7855_v0 = vld [vmem:[%s11929_s12 + $0x548] sm:$0xf]  ;;  %v8816_v58 = vld [vmem:[%s11929_s12 + $0x554] sm:$0xf0] }
 0x9d6   :  { %4582 = vmatpush.bf16.msrb.mxu2 %v7666_v38  ;;  %v7904_v38 = vor.u32 %v8828_v16, %v7903_v18 }
 0x9d7   :  { %4808 = vmatpush.bf16.msrb.mxu0 %v7864_v40 }
 0x9da   :  { %4830 = vmatpush.bf16.msra.mxu2 %v7936_v46 }
 0x9db   :  { %4809 = vmatpush.bf16.msrb.mxu0 %v7848_v63  ;;  %v8809_v63 = vld [vmem:[%s11929_s12 + $0x524] sm:$0xf] }
 0x9dc   :  { %v7836_v4 = vor.u32 %v8809_v63, %v7833_v2  ;;  %v7823_v63 = vld [vmem:[%s11929_s12 + $0x508] sm:$0xf]  ;;  %v8808_v2 = vld [vmem:[%s11929_s12 + $0x514] sm:$0xf0] }
 0x9de   :  { %4831 = vmatpush.bf16.msra.mxu2 %v7920_v9  ;;  %v8814_v9 = vld [vmem:[%s11929_s12 + $0x54c] sm:$0xf] }
 0x9df   :  { %4810 = vmatpush.bf16.msrb.mxu0 %v7832_v13  ;;  %v8090_v13 = vor.u32 %v8867_v8, %v8089_v49  ;;  %v7860_v53 = vor.u32 %v8814_v9, %v7857_v24  ;;  %v8839_v49 = vld [vmem:[%s11929_s12 + $0x60c] sm:$0xf0]  ;;  %v8862_v24 = vld [vmem:[%s11929_s12 + $0x6cc] sm:$0xf] }
 0x9e2   :  { %4832 = vmatpush.bf16.msra.mxu2 %v7904_v38 }
 0x9e3   :  { %4811 = vmatpush.bf16.msrb.mxu0 %v7816_v22  ;;  %v7905_v22 = vld [vmem:[%s11929_s12 + $0x5b8] sm:$0xf0] }
 0xa36   :  { %v4303_v32 = vpop.f32.mrf.mxu0  ;;  %v4316_v20 = vpop.f32.mrf.mxu1 }
 0xa37   :  { %v11120_v59 = vadd.f32 %v4303_v32, %v10941_v60  ;;  %v11123_v6 = vadd.f32 %v4316_v20, %v10914_v11  ;;  %v7929_v60 = vld [vmem:[%s11929_s12 + $0x5f0] sm:$0xf0]  ;;  %v8829_v11 = vld [vmem:[%s11929_s12 + $0x5c4] sm:$0xf]  ;;  %v8057_v32 = vld [vmem:[%s11929_s12 + $0x6a0] sm:$0xf] }
 0xa38   :  { %v7932_v47 = vor.u32 %v8833_v3, %v7929_v60  ;;  %v8859_v20 = vld [vmem:[%s11929_s12 + $0x6ac] sm:$0xf0]  ;;  %v8822_v3 = vld [vmem:[%s11929_s12 + $0x58c] sm:$0xf] }
 0xa3a   :  { %4817 = vmatpush.bf16.msra.mxu1 %v7932_v47 }
 0xa3b   :  { %v4277_v28 = vpop.f32.mrf.mxu2  ;;  %v4290_v29 = vpop.f32.mrf.mxu3 }
 0xa3c   :  { %v11126_v35 = vadd.f32 %v4277_v28, %v10911_v37  ;;  %v11129_v42 = vadd.f32 %v4290_v29, %v10929_v44  ;;  %v7913_v37 = vld [vmem:[%s11929_s12 + $0x5d0] sm:$0xf0]  ;;  %v7908_v28 = vor.u32 %v8826_v19, %v7905_v22  ;;  %v8058_v29 = vor.u32 %v8859_v20, %v8057_v32  ;;  %v8865_v32 = vld [vmem:[%s11929_s12 + $0x6e4] sm:$0xf] }
 0xa3d   :  { %v7916_v44 = vor.u32 %v8829_v11, %v7913_v37  ;;  %v7889_v11 = vld [vmem:[%s11929_s12 + $0x598] sm:$0xf0]  ;;  %v8041_v37 = vld [vmem:[%s11929_s12 + $0x680] sm:$0xf] }
 0xa3e   :  { %v4305_v55 = vpop.f32.mrf.mxu0  ;;  %v4318_v36 = vpop.f32.mrf.mxu1  ;;  %v7892_v47 = vor.u32 %v8822_v3, %v7889_v11  ;;  %v8868_v3 = vld [vmem:[%s11929_s12 + $0x6f4] sm:$0xf0] }
 0xa3f   :  { %4818 = vmatpush.bf16.msra.mxu1 %v7916_v44  ;;  %v7887_v55 = vld [vmem:[%s11929_s12 + $0x588] sm:$0xf]  ;;  %v8824_v36 = vld [vmem:[%s11929_s12 + $0x594] sm:$0xf0]  ;;  %v8855_v44 = vld [vmem:[%s11929_s12 + $0x68c] sm:$0xf0] }
 0xa40   :  { %v7888_v60 = vor.u32 %v8824_v36, %v7887_v55  ;;  %v8042_v14 = vor.u32 %v8855_v44, %v8041_v37  ;;  %v8097_v55 = vld [vmem:[%s11929_s12 + $0x6e8] sm:$0xf]  ;;  %v8864_v44 = vld [vmem:[%s11929_s12 + $0x6d4] sm:$0xf0] }
 0xa41   :  { %v8098_v11 = vor.u32 %v8868_v3, %v8097_v55  ;;  %v8081_v37 = vld [vmem:[%s11929_s12 + $0x6c8] sm:$0xf]  ;;  %v8852_v55 = vld [vmem:[%s11929_s12 + $0x674] sm:$0xf0] }
 0xa42   :  { %4833 = vmatpush.bf16.msra.mxu2 %v7888_v60  ;;  %v8082_v30 = vor.u32 %v8864_v44, %v8081_v37  ;;  %v8883_v37 = vld [vmem:[%s11929_s12 + $0x76c] sm:$0xf0] }
 0xa43   :  { %v4279_v25 = vpop.f32.mrf.mxu2  ;;  %v4292_v23 = vpop.f32.mrf.mxu3  ;;  %4819 = vmatpush.bf16.msra.mxu1 %v7900_v43  ;;  %v8025_v43 = vld [vmem:[%s11929_s12 + $0x660] sm:$0xf] }
 0xa44   :  { %v8818_v25 = vld [vmem:[%s11929_s12 + $0x56c] sm:$0xf]  ;;  %v7873_v23 = vld [vmem:[%s11929_s12 + $0x578] sm:$0xf0]  ;;  %v8026_v48 = vor.u32 %v8851_v34, %v8025_v43  ;;  %v8027_v43 = vld [vmem:[%s11929_s12 + $0x670] sm:$0xf0] }
 0xa45   :  { %v7876_v46 = vor.u32 %v8818_v25, %v7873_v23  ;;  %v8849_v23 = vld [vmem:[%s11929_s12 + $0x664] sm:$0xf]  ;;  %v8065_v34 = vld [vmem:[%s11929_s12 + $0x6a8] sm:$0xf] }
 0xa46   :  { %4834 = vmatpush.bf16.msra.mxu2 %v7872_v5  ;;  %v8866_v5 = vld [vmem:[%s11929_s12 + $0x6ec] sm:$0xf] }
 0xa47   :  { %4820 = vmatpush.bf16.msra.mxu1 %v7884_v39  ;;  %v7856_v39 = vor.u32 %v8816_v58, %v7855_v0 }
 0xa4a   :  { %4835 = vmatpush.bf16.msra.mxu2 %v7856_v39  ;;  %v8030_v39 = vor.u32 %v8849_v23, %v8027_v43  ;;  %v8019_v23 = vld [vmem:[%s11929_s12 + $0x658] sm:$0xf0] }
 0xa4b   :  { %v4338_v27 = vpop.f32.mrf.mxu2  ;;  %4821 = vmatpush.bf16.msra.mxu1 %v7868_v21  ;;  %v8810_v21 = vld [vmem:[%s11929_s12 + $0x52c] sm:$0xf] }
 0xa4c   :  { %v4342_v40 = vpack.c.bf16 %v4338_v27, %v4338_v27  ;;  %v8010_v27 = vor.u32 %v8847_v52, %v8009_v51  ;;  %v8083_v51 = vld [vmem:[%s11929_s12 + $0x6d8] sm:$0xf0] }
 0xa4e   :  { %4544 = vmatmul.bf16.vlgmr.msra.gmra.mxu3 %v4342_v40  ;;  %4557 = vmatmul.bf16.vlgmr.msra.gmra.mxu0 %v4342_v40 }
 0xa4f   :  { %4570 = vmatmul.bf16.vlgmr.msrb.gmra.mxu1 %v4342_v40  ;;  %4583 = vmatmul.bf16.vlgmr.msrb.gmra.mxu2 %v4342_v40  ;;  %v7839_v40 = vld [vmem:[%s11929_s12 + $0x528] sm:$0xf] }
 0xa50   :  { %4872 = vmatpush.bf16.msra.mxu0 %v10165_v15  ;;  %4843 = vmatpush.bf16.msra.mxu3 %v7940_v57  ;;  %v8812_v57 = vld [vmem:[%s11929_s12 + $0x534] sm:$0xf0] }
 0xa51   :  { %4822 = vmatpush.bf16.msra.mxu1 %v7852_v62  ;;  %v7840_v41 = vor.u32 %v8812_v57, %v7839_v40  ;;  %v7994_v62 = vor.u32 %v8843_v45, %v7993_v61  ;;  %v8086_v40 = vor.u32 %v8862_v24, %v8083_v51  ;;  %v7995_v61 = vld [vmem:[%s11929_s12 + $0x630] sm:$0xf0]  ;;  %v8155_v24 = vld [vmem:[%s11929_s12 + $0x720] sm:$0xf]  ;;  %v8875_v51 = vld [vmem:[%s11929_s12 + $0x72c] sm:$0xf0] }
 0xa53   :  { %v4340_v17 = vpop.f32.mrf.mxu2  ;;  %4836 = vmatpush.bf16.msra.mxu2 %v7840_v41  ;;  %v8067_v41 = vld [vmem:[%s11929_s12 + $0x6b8] sm:$0xf0] }
 0xa54   :  { %4844 = vmatpush.bf16.msra.mxu3 %v7924_v1  ;;  %v7844_v1 = vor.u32 %v8810_v21, %v7841_v31  ;;  %v8806_v17 = vld [vmem:[%s11929_s12 + $0x50c] sm:$0xf]  ;;  %v8841_v31 = vld [vmem:[%s11929_s12 + $0x624] sm:$0xf] }
 0xa55   :  { %4823 = vmatpush.bf16.msra.mxu1 %v7836_v4  ;;  %v7824_v4 = vor.u32 %v8808_v2, %v7823_v63  ;;  %v7828_v8 = vor.u32 %v8806_v17, %v7825_v7  ;;  %v8858_v21 = vld [vmem:[%s11929_s12 + $0x6ac] sm:$0xf]  ;;  %v8837_v63 = vld [vmem:[%s11929_s12 + $0x604] sm:$0xf]  ;;  %v7979_v2 = vld [vmem:[%s11929_s12 + $0x610] sm:$0xf0] }
 0xa56   :  { %v8251_v17 = vld [vmem:[%s11929_s12 + $0x7e0] sm:$0xf]  ;;  %v7982_v7 = vor.u32 %v8837_v63, %v7979_v2 }
 0xa57   :  { %4837 = vmatpush.bf16.msra.mxu2 %v7824_v4  ;;  %v8899_v4 = vld [vmem:[%s11929_s12 + $0x7ec] sm:$0xf0] }
 0xa58   :  { %4845 = vmatpush.bf16.msra.mxu3 %v7908_v28  ;;  %v8857_v28 = vld [vmem:[%s11929_s12 + $0x6a4] sm:$0xf] }
 0xa59   :  { %4824 = vmatpush.bf16.msra.mxu1 %v7820_v12  ;;  %v7978_v12 = vor.u32 %v8839_v49, %v7977_v33  ;;  %v8252_v33 = vor.u32 %v8899_v4, %v8251_v17  ;;  %v7941_v49 = vld [vmem:[%s11930_s13 + $0xc] sm:$0x3]  ;;  %v8897_v4 = vld [vmem:[%s11929_s12 + $0x7e4] sm:$0xf] }
 0xa5c   :  { %4846 = vmatpush.bf16.msra.mxu3 %v7892_v47 }
 0xa5d   :  { %5072 = vmatpush.bf16.msrb.mxu1 %v8090_v13 }
 0xa5e   :  { %7780 = vmatmul.msk.bf16.vlgmr.msrb.gmra.mxu3 %vm3262_vm2, %v7779_v54 }
 0xa60   :  { %4847 = vmatpush.bf16.msra.mxu3 %v7876_v46  ;;  %v8099_v46 = vld [vmem:[%s11929_s12 + $0x6f8] sm:$0xf0] }
 0xa61   :  { %5073 = vmatpush.bf16.msrb.mxu1 %v8074_v56  ;;  %v8102_v9 = vor.u32 %v8866_v5, %v8099_v46  ;;  %v8171_v5 = vld [vmem:[%s11929_s12 + $0x740] sm:$0xf]  ;;  %v8879_v46 = vld [vmem:[%s11929_s12 + $0x74c] sm:$0xf0] }
 0xa64   :  { %4848 = vmatpush.bf16.msra.mxu3 %v7860_v53  ;;  %v8845_v53 = vld [vmem:[%s11929_s12 + $0x644] sm:$0xf] }
 0xa65   :  { %5074 = vmatpush.bf16.msrb.mxu1 %v8058_v29  ;;  %v8059_v29 = vld [vmem:[%s11929_s12 + $0x6b0] sm:$0xf0] }
 0xa66   :  { %v8062_v47 = vor.u32 %v8857_v28, %v8059_v29  ;;  %v8033_v29 = vld [vmem:[%s11929_s12 + $0x668] sm:$0xf] }
 0xa67   :  { %v8034_v3 = vor.u32 %v8852_v55, %v8033_v29  ;;  %v8892_v29 = vld [vmem:[%s11929_s12 + $0x7b4] sm:$0xf0] }
 0xa68   :  { %4849 = vmatpush.bf16.msra.mxu3 %v7844_v1  ;;  %v8070_v1 = vor.u32 %v8858_v21, %v8067_v41  ;;  %v7987_v41 = vld [vmem:[%s11929_s12 + $0x618] sm:$0xf0] }
 0xa69   :  { %5075 = vmatpush.bf16.msrb.mxu1 %v8042_v14  ;;  %v8043_v14 = vld [vmem:[%s11929_s12 + $0x690] sm:$0xf0] }
 0xa6a   :  { %v8046_v25 = vor.u32 %v8853_v10, %v8043_v14  ;;  %v8017_v10 = vld [vmem:[%s11929_s12 + $0x648] sm:$0xf]  ;;  %v8848_v14 = vld [vmem:[%s11929_s12 + $0x654] sm:$0xf0] }
 0xa6c   :  { %4850 = vmatpush.bf16.msra.mxu3 %v7828_v8  ;;  %v8235_v8 = vld [vmem:[%s11929_s12 + $0x7c0] sm:$0xf] }
 0xa6d   :  { %5076 = vmatpush.bf16.msrb.mxu1 %v8026_v48  ;;  %v8860_v48 = vld [vmem:[%s11929_s12 + $0x6b4] sm:$0xf0] }
 0xa6e   :  { %v8066_v52 = vor.u32 %v8860_v48, %v8065_v34  ;;  %v8172_v34 = vor.u32 %v8879_v46, %v8171_v5  ;;  %v8001_v48 = vld [vmem:[%s11929_s12 + $0x628] sm:$0xf]  ;;  %v8103_v46 = vld [vmem:[%s11930_s13 + $0xe] sm:$0x3] }
 0xa70   :  { %5098 = vmatpush.bf16.msrb.mxu3 %v8098_v11 }
 0xa71   :  { %5077 = vmatpush.bf16.msrb.mxu1 %v8010_v27  ;;  %v8011_v27 = vld [vmem:[%s11929_s12 + $0x650] sm:$0xf0] }
 0xa72   :  { %v8014_v57 = vor.u32 %v8845_v53, %v8011_v27  ;;  %v8156_v53 = vor.u32 %v8875_v51, %v8155_v24  ;;  %v7985_v27 = vld [vmem:[%s11929_s12 + $0x608] sm:$0xf]  ;;  %v8881_v51 = vld [vmem:[%s11929_s12 + $0x764] sm:$0xf] }
 0xa74   :  { %5099 = vmatpush.bf16.msrb.mxu3 %v8082_v30  ;;  %v8846_v30 = vld [vmem:[%s11929_s12 + $0x64c] sm:$0xf] }
 0xa75   :  { %5078 = vmatpush.bf16.msrb.mxu1 %v7994_v62  ;;  %v7998_v62 = vor.u32 %v8841_v31, %v7995_v61  ;;  %v8022_v43 = vor.u32 %v8846_v30, %v8019_v23  ;;  %v8139_v31 = vld [vmem:[%s11929_s12 + $0x700] sm:$0xf]  ;;  %v8871_v61 = vld [vmem:[%s11929_s12 + $0x70c] sm:$0xf0]  ;;  %v8890_v30 = vld [vmem:[%s11929_s12 + $0x7ac] sm:$0xf] }
 0xa78   :  { %5100 = vmatpush.bf16.msrb.mxu3 %v8066_v52 }
 0xa79   :  { %5079 = vmatpush.bf16.msrb.mxu1 %v7978_v12  ;;  %v8895_v12 = vld [vmem:[%s11929_s12 + $0x7cc] sm:$0xf0] }
 0xacb   :  { %v4558_v13 = vpop.f32.mrf.mxu0 }
 0xacc   :  { %v11329_v54 = vadd.f32 %v4558_v13, %v11129_v42  ;;  %v4571_v50 = vpop.f32.mrf.mxu1  ;;  %v8091_v42 = vld [vmem:[%s11929_s12 + $0x6f0] sm:$0xf0]  ;;  %v8236_v13 = vor.u32 %v8895_v12, %v8235_v8 }
 0xacd   :  { %v11332_v26 = vadd.f32 %v4571_v50, %v11120_v59  ;;  %v8861_v59 = vld [vmem:[%s11929_s12 + $0x6c4] sm:$0xf]  ;;  %v8219_v50 = vld [vmem:[%s11929_s12 + $0x7a0] sm:$0xf]  ;;  %v8237_v12 = vld [vmem:[%s11929_s12 + $0x7d0] sm:$0xf0] }
 0xad1   :  { %v4545_v56 = vpop.f32.mrf.mxu3 }
 0xad2   :  { %v11335_v18 = vadd.f32 %v4545_v56, %v11126_v35  ;;  %v4584_v16 = vpop.f32.mrf.mxu2  ;;  %v8094_v35 = vor.u32 %v8865_v32, %v8091_v42  ;;  %v8891_v56 = vld [vmem:[%s11929_s12 + $0x7ac] sm:$0xf0]  ;;  %v8854_v32 = vld [vmem:[%s11929_s12 + $0x68c] sm:$0xf] }
 0xad3   :  { %v11338_v19 = vadd.f32 %v4584_v16, %v11123_v6  ;;  %v4560_v38 = vpop.f32.mrf.mxu0  ;;  %v8075_v6 = vld [vmem:[%s11929_s12 + $0x6d0] sm:$0xf0]  ;;  %v8220_v16 = vor.u32 %v8891_v56, %v8219_v50  ;;  %v8896_v56 = vld [vmem:[%s11929_s12 + $0x7d4] sm:$0xf0] }
 0xad4   :  { %v4573_v22 = vpop.f32.mrf.mxu1  ;;  %5085 = vmatpush.bf16.msrb.mxu2 %v8094_v35  ;;  %v8078_v20 = vor.u32 %v8861_v59, %v8075_v6  ;;  %v8049_v38 = vld [vmem:[%s11929_s12 + $0x688] sm:$0xf]  ;;  %v8051_v59 = vld [vmem:[%s11929_s12 + $0x698] sm:$0xf0]  ;;  %v8203_v35 = vld [vmem:[%s11929_s12 + $0x780] sm:$0xf] }
 0xad5   :  { %v8856_v22 = vld [vmem:[%s11929_s12 + $0x694] sm:$0xf0]  ;;  %v8887_v6 = vld [vmem:[%s11929_s12 + $0x78c] sm:$0xf0] }
 0xad6   :  { %v8050_v42 = vor.u32 %v8856_v22, %v8049_v38  ;;  %v8204_v28 = vor.u32 %v8887_v6, %v8203_v35 }
 0xad8   :  { %5086 = vmatpush.bf16.msrb.mxu2 %v8078_v20  ;;  %v8054_v20 = vor.u32 %v8854_v32, %v8051_v59  ;;  %5101 = vmatpush.bf16.msrb.mxu3 %v8050_v42  ;;  %v8889_v32 = vld [vmem:[%s11929_s12 + $0x7a4] sm:$0xf]  ;;  %v8221_v42 = vld [vmem:[%s11929_s12 + $0x7b0] sm:$0xf0] }
 0xad9   :  { %v4547_v36 = vpop.f32.mrf.mxu3  ;;  %v8224_v55 = vor.u32 %v8889_v32, %v8221_v42  ;;  %v8141_v32 = vld [vmem:[%s11929_s12 + $0x710] sm:$0xf0]  ;;  %v8147_v42 = vld [vmem:[%s11929_s12 + $0x708] sm:$0xf] }
 0xada   :  { %v4586_v60 = vpop.f32.mrf.mxu2  ;;  %v8850_v36 = vld [vmem:[%s11929_s12 + $0x66c] sm:$0xf] }
 0xadb   :  { %v8035_v60 = vld [vmem:[%s11929_s12 + $0x678] sm:$0xf0] }
 0xadc   :  { %5087 = vmatpush.bf16.msrb.mxu2 %v8062_v47  ;;  %v8038_v11 = vor.u32 %v8850_v36, %v8035_v60  ;;  %v8187_v47 = vld [vmem:[%s11929_s12 + $0x760] sm:$0xf]  ;;  %5102 = vmatpush.bf16.msrb.mxu3 %v8034_v3 }
 0xadd   :  { %v8188_v44 = vor.u32 %v8883_v37, %v8187_v47 }
 0xae0   :  { %5088 = vmatpush.bf16.msrb.mxu2 %v8046_v25  ;;  %v8018_v25 = vor.u32 %v8848_v14, %v8017_v10  ;;  %v8245_v10 = vld [vmem:[%s11929_s12 + $0x7d8] sm:$0xf0] }
 0xae1   :  { %v4606_v0 = vpop.f32.mrf.mxu3 }
 0xae2   :  { %v4610_v58 = vpack.c.bf16 %v4606_v0, %v4606_v0  ;;  %v8844_v0 = vld [vmem:[%s11929_s12 + $0x634] sm:$0xf0]  ;;  %5103 = vmatpush.bf16.msrb.mxu3 %v8018_v25  ;;  %v8229_v25 = vld [vmem:[%s11929_s12 + $0x7b8] sm:$0xf0] }
 0xae3   :  { %v8232_v5 = vor.u32 %v8890_v30, %v8229_v25  ;;  %v8397_v25 = vld [vmem:[%s11929_s12 + $0x8c0] sm:$0xf] }
 0xae4   :  { %4812 = vmatmul.bf16.vlgmr.msrb.gmra.mxu0 %v4610_v58  ;;  %4825 = vmatmul.bf16.vlgmr.msra.gmra.mxu1 %v4610_v58 }
 0xae5   :  { %4838 = vmatmul.bf16.vlgmr.msra.gmra.mxu2 %v4610_v58  ;;  %4851 = vmatmul.bf16.vlgmr.msra.gmra.mxu3 %v4610_v58  ;;  %v8842_v58 = vld [vmem:[%s11929_s12 + $0x62c] sm:$0xf] }
 0xae6   :  { %5140 = vmatpush.bf16.msra.mxu1 %v10165_v15  ;;  %5111 = vmatpush.bf16.msrb.mxu0 %v8102_v9  ;;  %v8002_v9 = vor.u32 %v8844_v0, %v8001_v48  ;;  %v8888_v0 = vld [vmem:[%s11929_s12 + $0x794] sm:$0xf0] }
 0xae7   :  { %5089 = vmatpush.bf16.msrb.mxu2 %v8030_v39  ;;  %v8003_v39 = vld [vmem:[%s11929_s12 + $0x638] sm:$0xf0] }
 0xae8   :  { %v8006_v52 = vor.u32 %v8842_v58, %v8003_v39  ;;  %5104 = vmatpush.bf16.msrb.mxu3 %v8002_v9  ;;  %v8886_v58 = vld [vmem:[%s11929_s12 + $0x78c] sm:$0xf]  ;;  %v8213_v9 = vld [vmem:[%s11929_s12 + $0x798] sm:$0xf0] }
 0xae9   :  { %v4608_v45 = vpop.f32.mrf.mxu3  ;;  %v8216_v24 = vor.u32 %v8886_v58, %v8213_v9  ;;  %v8405_v58 = vld [vmem:[%s11929_s12 + $0x8c8] sm:$0xf]  ;;  %v8928_v9 = vld [vmem:[%s11929_s12 + $0x8d4] sm:$0xf0] }
 0xaea   :  { %5112 = vmatpush.bf16.msrb.mxu0 %v8086_v40  ;;  %v8840_v40 = vld [vmem:[%s11929_s12 + $0x614] sm:$0xf0] }
 0xaeb   :  { %5090 = vmatpush.bf16.msrb.mxu2 %v8014_v57  ;;  %v8838_v57 = vld [vmem:[%s11929_s12 + $0x60c] sm:$0xf]  ;;  %v7986_v21 = vor.u32 %v8840_v40, %v7985_v27  ;;  %v8884_v40 = vld [vmem:[%s11929_s12 + $0x774] sm:$0xf0] }
 0xaec   :  { %v7990_v45 = vor.u32 %v8838_v57, %v7987_v41  ;;  %v8882_v57 = vld [vmem:[%s11929_s12 + $0x76c] sm:$0xf] }
 0xaed   :  { %5105 = vmatpush.bf16.msrb.mxu3 %v7986_v21  ;;  %v8197_v21 = vld [vmem:[%s11929_s12 + $0x778] sm:$0xf0] }
 0xaee   :  { %5113 = vmatpush.bf16.msrb.mxu0 %v8070_v1  ;;  %v8140_v1 = vor.u32 %v8871_v61, %v8139_v31  ;;  %v8200_v31 = vor.u32 %v8882_v57, %v8197_v21  ;;  %v8877_v61 = vld [vmem:[%s11929_s12 + $0x744] sm:$0xf] }
 0xaef   :  { %5091 = vmatpush.bf16.msrb.mxu2 %v7998_v62 }
 0xaf2   :  { %5114 = vmatpush.bf16.msrb.mxu0 %v8054_v20 }
 0xaf3   :  { %5092 = vmatpush.bf16.msrb.mxu2 %v7982_v7  ;;  %v8253_v7 = vld [vmem:[%s11929_s12 + $0x7f0] sm:$0xf0] }
 0xaf4   :  { %7942 = vmatmul.msk.bf16.vlgmr.msra.gmra.mxu0 %vm3262_vm2, %v7941_v49  ;;  %v8256_v49 = vor.u32 %v8897_v4, %v8253_v7  ;;  %v8878_v4 = vld [vmem:[%s11929_s12 + $0x74c] sm:$0xf]  ;;  %v8181_v7 = vld [vmem:[%s11929_s12 + $0x758] sm:$0xf0] }
 0xaf6   :  { %5115 = vmatpush.bf16.msrb.mxu0 %v8038_v11  ;;  %5353 = vmatpush.bf16.msra.mxu3 %v8256_v49  ;;  %v8184_v49 = vor.u32 %v8878_v4, %v8181_v7  ;;  %v8921_v4 = vld [vmem:[%s11929_s12 + $0x8a4] sm:$0xf] }
 0xaf7   :  { %5340 = vmatpush.bf16.msra.mxu2 %v8252_v33  ;;  %v8259_v33 = vld [vmem:[%s11929_s12 + $0x7e8] sm:$0xf] }
 0xafa   :  { %5116 = vmatpush.bf16.msrb.mxu0 %v8022_v43  ;;  %v8205_v43 = vld [vmem:[%s11929_s12 + $0x790] sm:$0xf0] }
 0xafb   :  { %5341 = vmatpush.bf16.msra.mxu2 %v8236_v13  ;;  %v8243_v13 = vld [vmem:[%s11929_s12 + $0x7c8] sm:$0xf] }
 0xafc   :  { %v8244_v22 = vor.u32 %v8896_v56, %v8243_v13  ;;  %v8876_v13 = vld [vmem:[%s11929_s12 + $0x734] sm:$0xf0]  ;;  %v8165_v56 = vld [vmem:[%s11929_s12 + $0x738] sm:$0xf0] }
 0xafe   :  { %5117 = vmatpush.bf16.msrb.mxu0 %v8006_v52  ;;  %v8189_v52 = vld [vmem:[%s11929_s12 + $0x770] sm:$0xf0] }
 0xaff   :  { %5342 = vmatpush.bf16.msra.mxu2 %v8220_v16  ;;  %v8192_v27 = vor.u32 %v8881_v51, %v8189_v52  ;;  %v8406_v51 = vor.u32 %v8928_v9, %v8405_v58 }
 0xb02   :  { %5118 = vmatpush.bf16.msrb.mxu0 %v7990_v45  ;;  %v8173_v45 = vld [vmem:[%s11929_s12 + $0x750] sm:$0xf0] }
 0xb03   :  { %5343 = vmatpush.bf16.msra.mxu2 %v8204_v28  ;;  %v8227_v28 = vld [vmem:[%s11929_s12 + $0x7a8] sm:$0xf] }
 0xb04   :  { %v8228_v36 = vor.u32 %v8892_v29, %v8227_v28  ;;  %v8870_v28 = vld [vmem:[%s11929_s12 + $0x70c] sm:$0xf]  ;;  %v8149_v29 = vld [vmem:[%s11929_s12 + $0x718] sm:$0xf0] }
 0xb07   :  { %5344 = vmatpush.bf16.msra.mxu2 %v8188_v44  ;;  %v8894_v44 = vld [vmem:[%s11929_s12 + $0x7cc] sm:$0xf] }
 0xb08   :  { %v8248_v14 = vor.u32 %v8894_v44, %v8245_v10  ;;  %v8932_v10 = vld [vmem:[%s11929_s12 + $0x8f4] sm:$0xf0] }
 0xb0b   :  { %5345 = vmatpush.bf16.msra.mxu2 %v8172_v34  ;;  %v8211_v34 = vld [vmem:[%s11929_s12 + $0x788] sm:$0xf] }
 0xb0c   :  { %v8212_v39 = vor.u32 %v8888_v0, %v8211_v34 }
 0xb0f   :  { %5346 = vmatpush.bf16.msra.mxu2 %v8156_v53  ;;  %v8195_v53 = vld [vmem:[%s11929_s12 + $0x768] sm:$0xf] }
 0xb10   :  { %v8196_v41 = vor.u32 %v8884_v40, %v8195_v53  ;;  %v8930_v53 = vld [vmem:[%s11929_s12 + $0x8ec] sm:$0xf] }
 0xb13   :  { %5347 = vmatpush.bf16.msra.mxu2 %v8140_v1  ;;  %v8179_v1 = vld [vmem:[%s11929_s12 + $0x748] sm:$0xf] }
 0xb61   :  { %v4813_v62 = vpop.f32.mrf.mxu0  ;;  %v4826_v63 = vpop.f32.mrf.mxu1 }
 0xb62   :  { %v11538_v2 = vadd.f32 %v4813_v62, %v11335_v18  ;;  %v11541_v17 = vadd.f32 %v4826_v63, %v11329_v54  ;;  %v8900_v18 = vld [vmem:[%s11929_s12 + $0x7f4] sm:$0xf0]  ;;  %v8893_v54 = vld [vmem:[%s11929_s12 + $0x7c4] sm:$0xf]  ;;  %v8176_v62 = vor.u32 %v8877_v61, %v8173_v45 }
 0xb63   :  { %v8260_v8 = vor.u32 %v8900_v18, %v8259_v33  ;;  %v8240_v50 = vor.u32 %v8893_v54, %v8237_v12  ;;  %v8880_v63 = vld [vmem:[%s11929_s12 + $0x754] sm:$0xf0]  ;;  %v8873_v18 = vld [vmem:[%s11929_s12 + $0x724] sm:$0xf]  ;;  %v8163_v54 = vld [vmem:[%s11929_s12 + $0x728] sm:$0xf] }
 0xb64   :  { %v8180_v33 = vor.u32 %v8880_v63, %v8179_v1  ;;  %v8265_v1 = vld [vmem:[%s11930_s13 + $0x10] sm:$0x3] }
 0xb65   :  { %5366 = vmatpush.bf16.msra.mxu0 %v8260_v8  ;;  %5354 = vmatpush.bf16.msra.mxu3 %v8240_v50  ;;  %v8157_v8 = vld [vmem:[%s11929_s12 + $0x730] sm:$0xf0]  ;;  %v8874_v50 = vld [vmem:[%s11929_s12 + $0x72c] sm:$0xf]  ;;  %v8923_v63 = vld [vmem:[%s11929_s12 + $0x8ac] sm:$0xf0] }
 0xb66   :  { %v8160_v12 = vor.u32 %v8873_v18, %v8157_v8  ;;  %v8924_v18 = vld [vmem:[%s11929_s12 + $0x8b4] sm:$0xf0] }
 0xb68   :  { %v4839_v16 = vpop.f32.mrf.mxu2  ;;  %v4852_v38 = vpop.f32.mrf.mxu3 }
 0xb69   :  { %v11574_v59 = vadd.f32 %v4839_v16, %v11332_v26  ;;  %v11577_v35 = vadd.f32 %v4852_v38, %v11338_v19  ;;  %v4815_v6 = vpop.f32.mrf.mxu0  ;;  %v4828_v20 = vpop.f32.mrf.mxu1  ;;  %5367 = vmatpush.bf16.msra.mxu0 %v8244_v22  ;;  %v8898_v26 = vld [vmem:[%s11929_s12 + $0x7ec] sm:$0xf]  ;;  %v8261_v19 = vld [vmem:[%s11929_s12 + $0x7f8] sm:$0xf0]  ;;  %5355 = vmatpush.bf16.msra.mxu3 %v8224_v55  ;;  %v8164_v16 = vor.u32 %v8876_v13, %v8163_v54  ;;  %v8869_v22 = vld [vmem:[%s11929_s12 + $0x704] sm:$0xf] }
 0xb6a   :  { %v8264_v37 = vor.u32 %v8898_v26, %v8261_v19  ;;  %v8168_v38 = vor.u32 %v8874_v50, %v8165_v56  ;;  %v8144_v6 = vor.u32 %v8869_v22, %v8141_v32  ;;  %v8872_v20 = vld [vmem:[%s11929_s12 + $0x714] sm:$0xf0]  ;;  %v8391_v13 = vld [vmem:[%s11929_s12 + $0x8b8] sm:$0xf0]  ;;  %v8365_v56 = vld [vmem:[%s11929_s12 + $0x880] sm:$0xf] }
 0xb6b   :  { %v8148_v55 = vor.u32 %v8872_v20, %v8147_v42  ;;  %v8367_v32 = vld [vmem:[%s11929_s12 + $0x890] sm:$0xf0]  ;;  %v8373_v42 = vld [vmem:[%s11929_s12 + $0x888] sm:$0xf] }
 0xb6d   :  { %5368 = vmatpush.bf16.msra.mxu0 %v8228_v36  ;;  %v8152_v36 = vor.u32 %v8870_v28, %v8149_v29  ;;  %v8918_v29 = vld [vmem:[%s11929_s12 + $0x88c] sm:$0xf] }
 0xb70   :  { %v4841_v3 = vpop.f32.mrf.mxu2  ;;  %v4854_v60 = vpop.f32.mrf.mxu3 }
 0xb71   :  { %v4874_v11 = vpop.f32.mrf.mxu0  ;;  %5369 = vmatpush.bf16.msra.mxu0 %v8212_v39 }
 0xb72   :  { %v4878_v47 = vpack.c.bf16 %v4874_v11, %v4874_v11  ;;  %v8413_v11 = vld [vmem:[%s11929_s12 + $0x8e0] sm:$0xf] }
 0xb74   :  { %5080 = vmatmul.bf16.vlgmr.msrb.gmra.mxu1 %v4878_v47  ;;  %5093 = vmatmul.bf16.vlgmr.msrb.gmra.mxu2 %v4878_v47 }
 0xb75   :  { %5106 = vmatmul.bf16.vlgmr.msrb.gmra.mxu3 %v4878_v47  ;;  %5119 = vmatmul.bf16.vlgmr.msrb.gmra.mxu0 %v4878_v47  ;;  %v8931_v47 = vld [vmem:[%s11929_s12 + $0x8ec] sm:$0xf0] }
 0xb76   :  { %5408 = vmatpush.bf16.msrb.mxu2 %v10165_v15  ;;  %5379 = vmatpush.bf16.msrb.mxu1 %v8264_v37  ;;  %v8885_v15 = vld [vmem:[%s11929_s12 + $0x784] sm:$0xf]  ;;  %v8414_v44 = vor.u32 %v8931_v47, %v8413_v11  ;;  %v8351_v47 = vld [vmem:[%s11929_s12 + $0x870] sm:$0xf0] }
 0xb77   :  { %v8208_v48 = vor.u32 %v8885_v15, %v8205_v43  ;;  %5370 = vmatpush.bf16.msra.mxu0 %v8196_v41  ;;  %v8929_v37 = vld [vmem:[%s11929_s12 + $0x8e4] sm:$0xf]  ;;  %v8399_v15 = vld [vmem:[%s11929_s12 + $0x8d0] sm:$0xf0]  ;;  %v8926_v41 = vld [vmem:[%s11929_s12 + $0x8cc] sm:$0xf] }
 0xb78   :  { %v8913_v11 = vld [vmem:[%s11929_s12 + $0x864] sm:$0xf] }
 0xb79   :  { %v4876_v23 = vpop.f32.mrf.mxu0  ;;  %5356 = vmatpush.bf16.msra.mxu3 %v8208_v48 }
 0xb7a   :  { %5380 = vmatpush.bf16.msrb.mxu1 %v8248_v14 }
 0xb7b   :  { %5371 = vmatpush.bf16.msra.mxu0 %v8180_v33  ;;  %v8383_v33 = vld [vmem:[%s11929_s12 + $0x8b0] sm:$0xf0] }
 0xb7c   :  { %v8386_v8 = vor.u32 %v8921_v4, %v8383_v33  ;;  %v8901_v4 = vld [vmem:[%s11929_s12 + $0x804] sm:$0xf]  ;;  %v8303_v33 = vld [vmem:[%s11929_s12 + $0x810] sm:$0xf0] }
 0xb7d   :  { %5357 = vmatpush.bf16.msra.mxu3 %v8192_v27  ;;  %v8423_v27 = vld [vmem:[%s11929_s12 + $0x8f8] sm:$0xf0] }
 0xb7e   :  { %5381 = vmatpush.bf16.msrb.mxu1 %v8232_v5  ;;  %v8927_v5 = vld [vmem:[%s11929_s12 + $0x8cc] sm:$0xf0] }
 0xb7f   :  { %5372 = vmatpush.bf16.msra.mxu0 %v8164_v16  ;;  %v8398_v48 = vor.u32 %v8927_v5, %v8397_v25  ;;  %v8919_v16 = vld [vmem:[%s11929_s12 + $0x88c] sm:$0xf0] }
 0xb80   :  { %v8366_v22 = vor.u32 %v8919_v16, %v8365_v56  ;;  %v8911_v5 = vld [vmem:[%s11929_s12 + $0x84c] sm:$0xf0] }
 0xb81   :  { %5358 = vmatpush.bf16.msra.mxu3 %v8176_v62  ;;  %v8381_v62 = vld [vmem:[%s11929_s12 + $0x8a0] sm:$0xf] }
 0xb82   :  { %5382 = vmatpush.bf16.msrb.mxu1 %v8216_v24  ;;  %v8382_v7 = vor.u32 %v8923_v63, %v8381_v62  ;;  %v8301_v62 = vld [vmem:[%s11929_s12 + $0x800] sm:$0xf]  ;;  %v8903_v63 = vld [vmem:[%s11929_s12 + $0x80c] sm:$0xf0] }
 0xb83   :  { %5373 = vmatpush.bf16.msra.mxu0 %v8148_v55  ;;  %v8375_v55 = vld [vmem:[%s11929_s12 + $0x898] sm:$0xf0] }
 0xb84   :  { %8104 = vmatmul.msk.bf16.vlgmr.msra.gmra.mxu1 %vm3262_vm2, %v8103_v46  ;;  %v8925_v46 = vld [vmem:[%s11929_s12 + $0x8c4] sm:$0xf] }
 0xb85   :  { %5359 = vmatpush.bf16.msra.mxu3 %v8160_v12  ;;  %v8402_v0 = vor.u32 %v8925_v46, %v8399_v15  ;;  %v8922_v12 = vld [vmem:[%s11929_s12 + $0x8ac] sm:$0xf]  ;;  %v8909_v46 = vld [vmem:[%s11929_s12 + $0x844] sm:$0xf] }
 0xb86   :  { %5383 = vmatpush.bf16.msrb.mxu1 %v8200_v31  ;;  %v8407_v31 = vld [vmem:[%s11929_s12 + $0x8d8] sm:$0xf0]  ;;  %v8394_v50 = vor.u32 %v8922_v12, %v8391_v13  ;;  %v8902_v12 = vld [vmem:[%s11929_s12 + $0x80c] sm:$0xf] }
 0xb87   :  { %v8410_v61 = vor.u32 %v8926_v41, %v8407_v31  ;;  %v8908_v41 = vld [vmem:[%s11929_s12 + $0x834] sm:$0xf0]  ;;  %v8906_v31 = vld [vmem:[%s11929_s12 + $0x82c] sm:$0xf]  ;;  %v8311_v13 = vld [vmem:[%s11929_s12 + $0x818] sm:$0xf0] }
 0xb89   :  { %5360 = vmatpush.bf16.msra.mxu3 %v8144_v6  ;;  %v8920_v6 = vld [vmem:[%s11929_s12 + $0x894] sm:$0xf0] }
 0xb8a   :  { %5384 = vmatpush.bf16.msrb.mxu1 %v8184_v49  ;;  %v8389_v49 = vld [vmem:[%s11929_s12 + $0x8a8] sm:$0xf]  ;;  %v8374_v28 = vor.u32 %v8920_v6, %v8373_v42 }
 0xb8b   :  { %v8390_v54 = vor.u32 %v8924_v18, %v8389_v49  ;;  %v8309_v49 = vld [vmem:[%s11929_s12 + $0x808] sm:$0xf]  ;;  %v8904_v18 = vld [vmem:[%s11929_s12 + $0x814] sm:$0xf0] }
 0xb8d   :  { %5608 = vmatpush.bf16.msrb.mxu3 %v8414_v44  ;;  %v8354_v44 = vor.u32 %v8913_v11, %v8351_v47 }
 0xb8e   :  { %5385 = vmatpush.bf16.msrb.mxu1 %v8168_v38  ;;  %v8917_v38 = vld [vmem:[%s11929_s12 + $0x884] sm:$0xf] }
 0xb8f   :  { %v8370_v20 = vor.u32 %v8917_v38, %v8367_v32 }
 0xb91   :  { %5609 = vmatpush.bf16.msrb.mxu3 %v8398_v48  ;;  %v8341_v48 = vld [vmem:[%s11929_s12 + $0x848] sm:$0xf] }
 0xb92   :  { %5386 = vmatpush.bf16.msrb.mxu1 %v8152_v36  ;;  %v8349_v36 = vld [vmem:[%s11929_s12 + $0x860] sm:$0xf] }
 0xb95   :  { %5610 = vmatpush.bf16.msrb.mxu3 %v8382_v7  ;;  %v8302_v7 = vor.u32 %v8903_v63, %v8301_v62 }
 0xb99   :  { %5611 = vmatpush.bf16.msrb.mxu3 %v8366_v22 }
 0xbf1   :  { %v5081_v26 = vpop.f32.mrf.mxu1 }
 0xbf2   :  { %v11699_v19 = vadd.f32 %v5081_v26, %v11538_v2  ;;  %v5120_v3 = vpop.f32.mrf.mxu0  ;;  %v8415_v2 = vld [vmem:[%s11929_s12 + $0x8f0] sm:$0xf0]  ;;  %v8378_v26 = vor.u32 %v8918_v29, %v8375_v55 }
 0xbf3   :  { %v11702_v60 = vadd.f32 %v5120_v3, %v11577_v35  ;;  %v8421_v35 = vld [vmem:[%s11929_s12 + $0x8e8] sm:$0xf]  ;;  %v8418_v14 = vor.u32 %v8929_v37, %v8415_v2  ;;  %v8915_v3 = vld [vmem:[%s11929_s12 + $0x86c] sm:$0xf0] }
 0xbf4   :  { %v8422_v30 = vor.u32 %v8932_v10, %v8421_v35  ;;  %v8350_v37 = vor.u32 %v8915_v3, %v8349_v36  ;;  %v8357_v2 = vld [vmem:[%s11929_s12 + $0x868] sm:$0xf]  ;;  %v8916_v35 = vld [vmem:[%s11929_s12 + $0x874] sm:$0xf0]  ;;  %v8914_v10 = vld [vmem:[%s11929_s12 + $0x86c] sm:$0xf] }
 0xbf5   :  { %5621 = vmatpush.bf16.msrb.mxu0 %v8418_v14  ;;  %v8358_v14 = vor.u32 %v8916_v35, %v8357_v2 }
 0xbf6   :  { %5634 = vmatpush.bf16.msra.mxu1 %v8422_v30  ;;  %v8359_v30 = vld [vmem:[%s11929_s12 + $0x878] sm:$0xf0]  ;;  %5612 = vmatpush.bf16.msrb.mxu3 %v8350_v37  ;;  %v5668_v37 = vpop.permute.xlu2 %5667 }
 0xbf7   :  { %v5094_v23 = vpop.f32.mrf.mxu2  ;;  %v8362_v25 = vor.u32 %v8914_v10, %v8359_v30 }
 0xbf8   :  { %v11735_v43 = vadd.f32 %v5094_v23, %v11541_v17  ;;  %v5107_v34 = vpop.f32.mrf.mxu3  ;;  %v8333_v23 = vld [vmem:[%s11929_s12 + $0x840] sm:$0xf] }
 0xbf9   :  { %v11744_v39 = vadd.f32 %v5107_v34, %v11574_v59  ;;  %v5083_v24 = vpop.f32.mrf.mxu1  ;;  %5622 = vmatpush.bf16.msrb.mxu0 %v8402_v0  ;;  %v8426_v59 = vor.u32 %v8930_v53, %v8423_v27  ;;  %v8334_v15 = vor.u32 %v8911_v5, %v8333_v23  ;;  %v8335_v34 = vld [vmem:[%s11929_s12 + $0x850] sm:$0xf0]  ;;  %v8912_v0 = vld [vmem:[%s11929_s12 + $0x854] sm:$0xf0]  ;;  %v8907_v53 = vld [vmem:[%s11929_s12 + $0x82c] sm:$0xf0] }
 0xbfa   :  { %v5122_v17 = vpop.f32.mrf.mxu0  ;;  %5635 = vmatpush.bf16.msra.mxu1 %v8406_v51  ;;  %v8338_v58 = vor.u32 %v8909_v46, %v8335_v34  ;;  %v8342_v9 = vor.u32 %v8912_v0, %v8341_v48  ;;  %v8910_v24 = vld [vmem:[%s11929_s12 + $0x84c] sm:$0xf]  ;;  %v8343_v51 = vld [vmem:[%s11929_s12 + $0x858] sm:$0xf0]  ;;  %v8905_v27 = vld [vmem:[%s11929_s12 + $0x824] sm:$0xf] }
 0xbfb   :  { %v8317_v17 = vld [vmem:[%s11929_s12 + $0x820] sm:$0xf]  ;;  %5613 = vmatpush.bf16.msrb.mxu3 %v8334_v15 }
 0xbfd   :  { %5623 = vmatpush.bf16.msrb.mxu0 %v8386_v8  ;;  %v8306_v8 = vor.u32 %v8901_v4, %v8303_v33 }
 0xbfe   :  { %5636 = vmatpush.bf16.msra.mxu1 %v8390_v54  ;;  %v8310_v54 = vor.u32 %v8904_v18, %v8309_v49 }
 0xbff   :  { %v5096_v52 = vpop.f32.mrf.mxu2 }
 0xc00   :  { %v5109_v40 = vpop.f32.mrf.mxu3  ;;  %v8346_v52 = vor.u32 %v8910_v24, %v8343_v51 }
 0xc01   :  { %v5142_v57 = vpop.f32.mrf.mxu1  ;;  %5624 = vmatpush.bf16.msrb.mxu0 %v8370_v20  ;;  %v8319_v40 = vld [vmem:[%s11929_s12 + $0x830] sm:$0xf0] }
 0xc02   :  { %v5146_v21 = vpack.c.bf16 %v5142_v57, %v5142_v57  ;;  %5637 = vmatpush.bf16.msra.mxu1 %v8374_v28  ;;  %v8318_v57 = vor.u32 %v8907_v53, %v8317_v17 }
 0xc04   :  { %5348 = vmatmul.bf16.vlgmr.msra.gmra.mxu2 %v5146_v21  ;;  %5361 = vmatmul.bf16.vlgmr.msra.gmra.mxu3 %v5146_v21 }
 0xc05   :  { %5374 = vmatmul.bf16.vlgmr.msra.gmra.mxu0 %v5146_v21  ;;  %5387 = vmatmul.bf16.vlgmr.msrb.gmra.mxu1 %v5146_v21  ;;  %v8322_v21 = vor.u32 %v8905_v27, %v8319_v40 }
 0xc06   :  { %5647 = vmatpush.bf16.msra.mxu2 %v8426_v59  ;;  %5625 = vmatpush.bf16.msrb.mxu0 %v8354_v44  ;;  %v8325_v59 = vld [vmem:[%s11929_s12 + $0x828] sm:$0xf] }
 0xc07   :  { %5638 = vmatpush.bf16.msra.mxu1 %v8358_v14  ;;  %5614 = vmatpush.bf16.msrb.mxu3 %v8318_v57 }
 0xc09   :  { %v5144_v45 = vpop.f32.mrf.mxu1 }
 0xc0a   :  { %5648 = vmatpush.bf16.msra.mxu2 %v8410_v61  ;;  %5626 = vmatpush.bf16.msrb.mxu0 %v8338_v58  ;;  %v8326_v61 = vor.u32 %v8908_v41, %v8325_v59  ;;  %v8327_v45 = vld [vmem:[%s11929_s12 + $0x838] sm:$0xf0] }
 0xc0b   :  { %5639 = vmatpush.bf16.msra.mxu1 %v8342_v9  ;;  %5615 = vmatpush.bf16.msrb.mxu3 %v8302_v7 }
 0xc0e   :  { %5649 = vmatpush.bf16.msra.mxu2 %v8394_v50  ;;  %5627 = vmatpush.bf16.msrb.mxu0 %v8322_v21  ;;  %v8314_v50 = vor.u32 %v8902_v12, %v8311_v13 }
 0xc0f   :  { %5640 = vmatpush.bf16.msra.mxu1 %v8326_v61 }
 0xc12   :  { %5650 = vmatpush.bf16.msra.mxu2 %v8378_v26  ;;  %5628 = vmatpush.bf16.msrb.mxu0 %v8306_v8 }
 0xc13   :  { %5641 = vmatpush.bf16.msra.mxu1 %v8310_v54 }
 0xc14   :  { %8266 = vmatmul.msk.bf16.vlgmr.msrb.gmra.mxu2 %vm3262_vm2, %v8265_v1  ;;  %v8330_v1 = vor.u32 %v8906_v31, %v8327_v45 }
 0xc16   :  { %5651 = vmatpush.bf16.msra.mxu2 %v8362_v25 }
 0xc1a   :  { %5652 = vmatpush.bf16.msra.mxu2 %v8346_v52 }
 0xc1e   :  { %5653 = vmatpush.bf16.msra.mxu2 %v8330_v1 }
 0xc22   :  { %5654 = vmatpush.bf16.msra.mxu2 %v8314_v50 }
 0xc82   :  { %v5375_v56 = vpop.f32.mrf.mxu0  ;;  %v5388_v16 = vpop.f32.mrf.mxu1 }
 0xc83   :  { %v5394_v38 = vadd.f32 %v5375_v56, %v11744_v39  ;;  %v5395_v22 = vadd.f32 %v5388_v16, %v11702_v60 }
 0xc87   :  { %v5349_v32 = vpop.f32.mrf.mxu2  ;;  %v5362_v42 = vpop.f32.mrf.mxu3 }
 0xc88   :  { %v5392_v6 = vadd.f32 %v5349_v32, %v11699_v19  ;;  %v5393_v20 = vadd.f32 %v5362_v42, %v11735_v43 }
 0xc8a   :  { %v5377_v28 = vpop.f32.mrf.mxu0  ;;  %v5390_v29 = vpop.f32.mrf.mxu1 }
 0xc8f   :  { %v5351_v55 = vpop.f32.mrf.mxu2  ;;  %v5364_v36 = vpop.f32.mrf.mxu3 }
 0xc97   :  { %v5410_v26 = vpop.f32.mrf.mxu2 }
 0xc98   :  { %v5414_v3 = vpack.c.bf16 %v5410_v26, %v5410_v26 }
 0xc9a   :  { %5616 = vmatmul.bf16.vlgmr.msrb.gmra.mxu3 %v5414_v3  ;;  %5629 = vmatmul.bf16.vlgmr.msrb.gmra.mxu0 %v5414_v3 }
 0xc9b   :  { %5642 = vmatmul.bf16.vlgmr.msra.gmra.mxu1 %v5414_v3  ;;  %5655 = vmatmul.bf16.vlgmr.msra.gmra.mxu2 %v5414_v3 }
 0xc9f   :  { %v5412_v11 = vpop.f32.mrf.mxu2 }
 0xd17   :  { %v5630_v39 = vpop.f32.mrf.mxu0 }
 0xd18   :  { %v5661_v47 = vadd.f32 %v5630_v39, %v5393_v20  ;;  %v5643_v60 = vpop.f32.mrf.mxu1 }
 0xd19   :  { %v5662_v2 = vadd.f32 %v5643_v60, %v5394_v38 }
 0xd1a   :  { %v5671_v44 = vadd.f32 %v5668_v37, %v5661_v47 }
 0xd1b   :  { %v5672_v23 = vadd.f32 %v5668_v37, %v5662_v2 }
 0xd1c   :  { %8939 = vtanh.f32 %v5671_v44 }
 0xd1d   :  { %v5617_v19 = vpop.f32.mrf.mxu3 }
 0xd1e   :  { %v5660_v43 = vadd.f32 %v5617_v19, %v5392_v6  ;;  %v5656_v35 = vpop.f32.mrf.mxu2 }
 0xd1f   :  { %v5663_v10 = vadd.f32 %v5656_v35, %v5395_v22  ;;  %v5632_v14 = vpop.f32.mrf.mxu0 }
 0xd20   :  { %v5670_v30 = vadd.f32 %v5668_v37, %v5660_v43  ;;  %v5645_v25 = vpop.f32.mrf.mxu1 }
 0xd21   :  { %v5673_v5 = vadd.f32 %v5668_v37, %v5663_v10 }
 0xd22   :  { %8941 = vtanh.f32 %v5670_v30  ;;  %v8940_v46 = vpop.eup %8939 }
 0xd23   :  { %8943 = vtanh.f32 %v5673_v5  ;;  %v5680_v48 = vrot.slane %v8940_v46, 4 }
 0xd24   :  { %8945 = vtanh.f32 %v5672_v23 }
 0xd25   :  { %v5619_v15 = vpop.f32.mrf.mxu3 }
 0xd26   :  { %v5658_v34 = vpop.f32.mrf.mxu2 }
 0xd28   :  { %v8942_v0 = vpop.eup %8941 }
 0xd29   :  { %v8944_v58 = vpop.eup %8943  ;;  %v5682_v9 = vsel %vm5681_vm3, %v8942_v0, %v5680_v48 }
 0xd2a   :  { %5684 = vst [vmem:[%s11931_s15] sm:$0x77] %v5682_v9  ;;  %v5687_v24 = vrot.slane %v8944_v58, 4  ;;  %v8946_v51 = vpop.eup %8945 }
 0xd2c   :  { %v5688_v17 = vsel %vm5681_vm3, %v8946_v51, %v5687_v24 }
 0xd2d   :  { %8427 = vst [vmem:[%s11931_s15 + $0x8] sm:$0x77] %v5688_v17 }

</bundles_post_ra>
